<compile_context>
chip_gen: v7x
topology: tpu7x:2x2x1
jax: 0.10.0
libtpu: 0.0.40
codegen_flags: <defaults>
</compile_context>

<pallas_src>
import functools

import jax
import jax.numpy as jnp
from jax import lax
from jax.experimental import pallas as pl
from jax.experimental.pallas import tpu as pltpu

LANE = 128  # padded channel / feature width for lane-dense stores


# ---------------------------------------------------------------------------
# Fused conv(3x3, valid, stride 1) + bias + ReLU + 2x2 max-pool kernel
# ---------------------------------------------------------------------------
def _conv_relu_pool_kernel(xph_ref, w_ref, b_ref, o_ref, *, kh, kw):
    """Grid: (batch, pooled_rows).  Each program emits one pooled output row.

    xph_ref : (1, 2, H, Wph, Cin)  column-phase-split input (phase p holds
              input columns p, p+2, ...), bf16 — so every slice below is
              contiguous (no strided access needed for the pool).
    w_ref   : (kh*kw, Cin, Cout)   per-tap weight matrices, bf16.
    b_ref   : (1, Cout)            bias, f32.
    o_ref   : (1, 1, PW, Cout)     one pooled output row, bf16 (Cout = 128).
    """
    po = pl.program_id(1)
    pw = o_ref.shape[2]
    cout = o_ref.shape[3]

    pooled = None
    for dy in range(2):              # pool-window row offset
        for dx in range(2):          # pool-window col offset
            acc = jnp.zeros((pw, cout), jnp.float32)
            for i in range(kh):
                for j in range(kw):
                    phase = (dx + j) & 1
                    cstart = (dx + j) >> 1
                    row = 2 * po + dy + i
                    # (PW, Cin) bf16 slice; conv at rows 2*po+dy, cols 2*q+dx
                    patch = xph_ref[0, phase, row, pl.ds(cstart, pw), :]
                    acc = acc + jnp.dot(patch, w_ref[i * kw + j],
                                        preferred_element_type=jnp.float32)
            pooled = acc if pooled is None else jnp.maximum(pooled, acc)
    # max/ReLU/bias commute: max(relu(a+b)) == relu(max(a)+b)
    y = jnp.maximum(pooled + b_ref[...], 0.0)
    o_ref[0, 0] = y.astype(o_ref.dtype)


def conv_relu_pool(x_nhwc, w_taps, b):
    """x_nhwc: (N,H,W,Cin) bf16; w_taps: (9,Cin,Cout) bf16; b: (1,Cout) f32."""
    n, h, w, cin = x_nhwc.shape
    kh = kw = 3
    oh, ow = h - kh + 1, w - kw + 1
    ph, pw = oh // 2, ow // 2          # floor-mode 2x2 pooling (PyTorch default)
    cout = w_taps.shape[-1]
    wph = (w + 1) // 2

    # Column even/odd phase split — cheap XLA strided slice on the raw input
    # (same total bytes as x, NOT a 9x im2col expansion).
    x0 = x_nhwc[:, :, 0::2, :]
    x1 = x_nhwc[:, :, 1::2, :]
    if x1.shape[2] < wph:
        x1 = jnp.pad(x1, ((0, 0), (0, 0), (0, wph - x1.shape[2]), (0, 0)))
    xph = jnp.stack([x0, x1], axis=1)                  # (N, 2, H, Wph, Cin)

    return pl.pallas_call(
        functools.partial(_conv_relu_pool_kernel, kh=kh, kw=kw),
        out_shape=jax.ShapeDtypeStruct((n, ph, pw, cout), jnp.bfloat16),
        grid=(n, ph),
        in_specs=[
            pl.BlockSpec((1, 2, h, wph, cin), lambda bi, pi: (bi, 0, 0, 0, 0)),
            pl.BlockSpec((kh * kw, w_taps.shape[1], cout),
                         lambda bi, pi: (0, 0, 0)),
            pl.BlockSpec((1, cout), lambda bi, pi: (0, 0)),
        ],
        out_specs=pl.BlockSpec((1, 1, pw, cout), lambda bi, pi: (bi, pi, 0, 0)),
        compiler_params=pltpu.CompilerParams(
            dimension_semantics=("parallel", "arbitrary")),
    )(xph, w_taps, b)


# ---------------------------------------------------------------------------
# Fused fc1 + ReLU + fc2 + ReLU + fc3 kernel (everything VMEM-resident)
# ---------------------------------------------------------------------------
def _fc_fused_kernel(x_ref, w1_ref, b1_ref, w2_ref, b2_ref, w3_ref, b3_ref,
                     o_ref):
    x = x_ref[...]
    h = jnp.dot(x, w1_ref[...], preferred_element_type=jnp.float32) + b1_ref[...]
    h = jnp.maximum(h, 0.0).astype(jnp.bfloat16)
    h = jnp.dot(h, w2_ref[...], preferred_element_type=jnp.float32) + b2_ref[...]
    h = jnp.maximum(h, 0.0).astype(jnp.bfloat16)
    out = jnp.dot(h, w3_ref[...], preferred_element_type=jnp.float32) + b3_ref[...]
    o_ref[...] = out


def fc_fused(x, w1, b1, w2, b2, w3, b3):
    m = x.shape[0]
    n_out = w3.shape[1]

    def full(a):
        return pl.BlockSpec(a.shape, lambda: (0,) * a.ndim)

    return pl.pallas_call(
        _fc_fused_kernel,
        out_shape=jax.ShapeDtypeStruct((m, n_out), jnp.float32),
        in_specs=[full(x), full(w1), full(b1), full(w2), full(b2),
                  full(w3), full(b3)],
        out_specs=pl.BlockSpec((m, n_out), lambda: (0, 0)),
    )(x, w1, b1, w2, b2, w3, b3)


# ---------------------------------------------------------------------------
# Parameters: PyTorch-shaped f32 "raw" params + one-time kernel-ready layout
# ---------------------------------------------------------------------------
def init_raw_params(key, spatial):
    ph1 = (spatial - 2) // 2
    ph2 = (ph1 - 2) // 2
    flat = 64 * ph2 * ph2
    ks = jax.random.split(key, 10)

    def u(k, shape, fan_in):
        bound = 1.0 / (fan_in ** 0.5)
        return jax.random.uniform(k, shape, jnp.float32, -bound, bound)

    return {
        "conv1_w": u(ks[0], (32, 3, 3, 3), 3 * 9),
        "conv1_b": u(ks[1], (32,), 3 * 9),
        "conv2_w": u(ks[2], (64, 32, 3, 3), 32 * 9),   # see TODO(synk) above
        "conv2_b": u(ks[3], (64,), 32 * 9),
        "fc1_w": u(ks[4], (150, flat), flat),          # see TODO(synk) above
        "fc1_b": u(ks[5], (150,), flat),
        "fc2_w": u(ks[6], (90, 150), 150),
        "fc2_b": u(ks[7], (90,), 150),
        "fc3_w": u(ks[8], (10, 90), 90),
        "fc3_b": u(ks[9], (10,), 90),
    }


def prepare_params(raw, spatial):
    """One-time layout work (kept out of the jitted forward)."""
    ph1 = (spatial - 2) // 2
    ph2 = (ph1 - 2) // 2
    CP = LANE                         # padded channel width
    H1, H2, H3 = 256, 128, 128        # padded fc widths (150 / 90 / 10)

    def conv_taps(w, cin_pad, cout_pad):
        cout, cin, kh, kw = w.shape
        t = jnp.transpose(w, (2, 3, 1, 0)).reshape(kh * kw, cin, cout)
        t = jnp.pad(t, ((0, 0), (0, cin_pad - cin), (0, cout_pad - cout)))
        return t.astype(jnp.bfloat16)

    def pad_bias(b, n):
        return jnp.pad(b, (0, n - b.shape[0])).reshape(1, n).astype(jnp.float32)

    # fc1: fold the PyTorch NCHW flatten order AND the channel padding into
    # the weight, so the kernel consumes the padded NHWC-flattened activation.
    w1 = raw["fc1_w"].reshape(150, 64, ph2, ph2)       # (out, c, h, w)
    w1 = jnp.transpose(w1, (2, 3, 1, 0))               # (h, w, c, out)
    w1 = jnp.pad(w1, ((0, 0), (0, 0), (0, CP - 64), (0, H1 - 150)))
    w1 = w1.reshape(ph2 * ph2 * CP, H1)

    return {
        "conv1_wt": conv_taps(raw["conv1_w"], 3, CP),      # (9, 3, 128)
        "conv1_b": pad_bias(raw["conv1_b"], CP),
        "conv2_wt": conv_taps(raw["conv2_w"], CP, CP),     # (9, 128, 128)
        "conv2_b": pad_bias(raw["conv2_b"], CP),
        "fc1_wt": w1.astype(jnp.bfloat16),
        "fc1_b": pad_bias(raw["fc1_b"], H1),
        "fc2_wt": jnp.pad(raw["fc2_w"].T,
                          ((0, H1 - 150), (0, H2 - 90))).astype(jnp.bfloat16),
        "fc2_b": pad_bias(raw["fc2_b"], H2),
        "fc3_wt": jnp.pad(raw["fc3_w"].T,
                          ((0, H2 - 90), (0, H3 - 10))).astype(jnp.bfloat16),
        "fc3_b": pad_bias(raw["fc3_b"], H3),
    }


# ---------------------------------------------------------------------------
# Forward pass (3 pallas_calls + minimal XLA glue)
# ---------------------------------------------------------------------------
@jax.jit
def forward(params, x_nchw):
    x = jnp.transpose(x_nchw, (0, 2, 3, 1)).astype(jnp.bfloat16)   # NCHW->NHWC
    x = conv_relu_pool(x, params["conv1_wt"], params["conv1_b"])   # (N,7,7,128)
    x = conv_relu_pool(x, params["conv2_wt"], params["conv2_b"])   # (N,2,2,128)
    xf = x.reshape(x.shape[0], -1)                                 # (N, 512)
    out = fc_fused(xf, params["fc1_wt"], params["fc1_b"],
                   params["fc2_wt"], params["fc2_b"],
                   params["fc3_wt"], params["fc3_b"])              # (N,128) f32
    return out[:, :10]


# Pure-JAX f32 reference (test harness only — not part of the kernel path).
@jax.jit
def reference_forward(raw, x_nchw):
    def conv(x, w, b):
        y = lax.conv_general_dilated(x, w, (1, 1), "VALID",
                                     dimension_numbers=("NCHW", "OIHW", "NCHW"))
        return y + b.reshape(1, -1, 1, 1)

    def pool(x):
        return lax.reduce_window(x, -jnp.inf, lax.max,
                                 (1, 1, 2, 2), (1, 1, 2, 2), "VALID")

    x = pool(jax.nn.relu(conv(x_nchw, raw["conv1_w"], raw["conv1_b"])))
    x = pool(jax.nn.relu(conv(x, raw["conv2_w"], raw["conv2_b"])))
    x = x.reshape(x.shape[0], -1)
    x = jax.nn.relu(x @ raw["fc1_w"].T + raw["fc1_b"])
    x = jax.nn.relu(x @ raw["fc2_w"].T + raw["fc2_b"])
    return x @ raw["fc3_w"].T + raw["fc3_b"]


if __name__ == "__main__":
    key = jax.random.PRNGKey(0)
    pkey, xkey = jax.random.split(key)

    batch, channels, spatial = 2, 3, 16
    raw = init_raw_params(pkey, spatial)
    params = prepare_params(raw, spatial)
    x = jax.random.normal(xkey, (batch, channels, spatial, spatial), jnp.float32)

    out = jax.block_until_ready(forward(params, x))
    assert out.shape == (batch, 10), out.shape
    assert bool(jnp.all(jnp.isfinite(out)))

    # Sanity check vs the f32 reference (loose tol: bf16 matmul operands).
    ref = jax.block_until_ready(reference_forward(raw, x))
    err = float(jnp.max(jnp.abs(out - ref)))
    assert err < 0.1, f"mismatch vs reference: max abs err = {err}"
    print("KERNEL_OK")
</pallas_src>

<mosaic_0001>
module attributes {stable_mosaic.version = 11 : i64} {
  func.func @_conv_relu_pool_kernel(%arg0: i32, %arg1: i32, %arg2: memref<1x2x16x8x3xbf16, #tpu.memory_space<vmem>>, %arg3: memref<9x3x128xbf16, #tpu.memory_space<vmem>>, %arg4: memref<1x128xf32, #tpu.memory_space<vmem>>, %arg5: memref<1x1x7x128xbf16, #tpu.memory_space<vmem>>) attributes {dimension_semantics = [#tpu.dimension_semantics<parallel>, #tpu.dimension_semantics<arbitrary>], iteration_bounds = array<i64: 2, 7>, scalar_prefetch = 0 : i64, scratch_operands = 0 : i64, tpu.core_type = #tpu.core_type<tc>, window_params = [{transform_indices = @transform_0, window_bounds = array<i64: 1, 2, 16, 8, 3>}, {pipeline_mode = #tpu.pipeline_mode<synchronous>, transform_indices = @transform_1, window_bounds = array<i64: 9, 3, 128>}, {pipeline_mode = #tpu.pipeline_mode<synchronous>, transform_indices = @transform_2, window_bounds = array<i64: 1, 128>}, {transform_indices = @transform_3, window_bounds = array<i64: 1, 1, 7, 128>}]} {
    %cst = arith.constant 0.000000e+00 : f32
    %0 = vector.broadcast %cst : f32 to vector<7x128xf32>
    %c2_i32 = arith.constant 2 : i32
    %1 = arith.muli %c2_i32, %arg1 : i32
    %c0_i32 = arith.constant 0 : i32
    %2 = arith.addi %1, %c0_i32 : i32
    %c0_i32_0 = arith.constant 0 : i32
    %3 = arith.addi %2, %c0_i32_0 : i32
    %c0 = arith.constant 0 : index
    %c0_1 = arith.constant 0 : index
    %4 = arith.index_cast %3 : i32 to index
    %c0_2 = arith.constant 0 : index
    %c0_3 = arith.constant 0 : index
    %5 = vector.load %arg2[%c0, %c0_1, %4, %c0_2, %c0_3] : memref<1x2x16x8x3xbf16, #tpu.memory_space<vmem>>, vector<1x1x1x7x3xbf16>
    %6 = vector.shape_cast %5 : vector<1x1x1x7x3xbf16> to vector<7x3xbf16>
    %c0_4 = arith.constant 0 : index
    %c0_5 = arith.constant 0 : index
    %c0_6 = arith.constant 0 : index
    %7 = vector.load %arg3[%c0_4, %c0_5, %c0_6] : memref<9x3x128xbf16, #tpu.memory_space<vmem>>, vector<1x3x128xbf16>
    %8 = vector.shape_cast %7 : vector<1x3x128xbf16> to vector<3x128xbf16>
    %cst_7 = arith.constant dense<0.000000e+00> : vector<7x128xf32>
    %9 = tpu.matmul %6, %8, %cst_7 {dimension_numbers = #tpu.dot_dimension_numbers<[1], [0], [0], [1], [0, 0, 1, 1], [], []>} : vector<7x3xbf16>, vector<3x128xbf16>, vector<7x128xf32> -> vector<7x128xf32>
    %10 = arith.addf %0, %9 : vector<7x128xf32>
    %c2_i32_8 = arith.constant 2 : i32
    %11 = arith.muli %c2_i32_8, %arg1 : i32
    %c0_i32_9 = arith.constant 0 : i32
    %12 = arith.addi %11, %c0_i32_9 : i32
    %c0_i32_10 = arith.constant 0 : i32
    %13 = arith.addi %12, %c0_i32_10 : i32
    %c0_11 = arith.constant 0 : index
    %c1 = arith.constant 1 : index
    %14 = arith.index_cast %13 : i32 to index
    %c0_12 = arith.constant 0 : index
    %c0_13 = arith.constant 0 : index
    %15 = vector.load %arg2[%c0_11, %c1, %14, %c0_12, %c0_13] : memref<1x2x16x8x3xbf16, #tpu.memory_space<vmem>>, vector<1x1x1x7x3xbf16>
    %16 = vector.shape_cast %15 : vector<1x1x1x7x3xbf16> to vector<7x3xbf16>
    %c1_14 = arith.constant 1 : index
    %c0_15 = arith.constant 0 : index
    %c0_16 = arith.constant 0 : index
    %17 = vector.load %arg3[%c1_14, %c0_15, %c0_16] : memref<9x3x128xbf16, #tpu.memory_space<vmem>>, vector<1x3x128xbf16>
    %18 = vector.shape_cast %17 : vector<1x3x128xbf16> to vector<3x128xbf16>
    %cst_17 = arith.constant dense<0.000000e+00> : vector<7x128xf32>
    %19 = tpu.matmul %16, %18, %cst_17 {dimension_numbers = #tpu.dot_dimension_numbers<[1], [0], [0], [1], [0, 0, 1, 1], [], []>} : vector<7x3xbf16>, vector<3x128xbf16>, vector<7x128xf32> -> vector<7x128xf32>
    %20 = arith.addf %10, %19 : vector<7x128xf32>
    %c2_i32_18 = arith.constant 2 : i32
    %21 = arith.muli %c2_i32_18, %arg1 : i32
    %c0_i32_19 = arith.constant 0 : i32
    %22 = arith.addi %21, %c0_i32_19 : i32
    %c0_i32_20 = arith.constant 0 : i32
    %23 = arith.addi %22, %c0_i32_20 : i32
    %c0_21 = arith.constant 0 : index
    %c0_22 = arith.constant 0 : index
    %24 = arith.index_cast %23 : i32 to index
    %c1_23 = arith.constant 1 : index
    %c0_24 = arith.constant 0 : index
    %25 = vector.load %arg2[%c0_21, %c0_22, %24, %c1_23, %c0_24] : memref<1x2x16x8x3xbf16, #tpu.memory_space<vmem>>, vector<1x1x1x7x3xbf16>
    %26 = vector.shape_cast %25 : vector<1x1x1x7x3xbf16> to vector<7x3xbf16>
    %c2 = arith.constant 2 : index
    %c0_25 = arith.constant 0 : index
    %c0_26 = arith.constant 0 : index
    %27 = vector.load %arg3[%c2, %c0_25, %c0_26] : memref<9x3x128xbf16, #tpu.memory_space<vmem>>, vector<1x3x128xbf16>
    %28 = vector.shape_cast %27 : vector<1x3x128xbf16> to vector<3x128xbf16>
    %cst_27 = arith.constant dense<0.000000e+00> : vector<7x128xf32>
    %29 = tpu.matmul %26, %28, %cst_27 {dimension_numbers = #tpu.dot_dimension_numbers<[1], [0], [0], [1], [0, 0, 1, 1], [], []>} : vector<7x3xbf16>, vector<3x128xbf16>, vector<7x128xf32> -> vector<7x128xf32>
    %30 = arith.addf %20, %29 : vector<7x128xf32>
    %c2_i32_28 = arith.constant 2 : i32
    %31 = arith.muli %c2_i32_28, %arg1 : i32
    %c0_i32_29 = arith.constant 0 : i32
    %32 = arith.addi %31, %c0_i32_29 : i32
    %c1_i32 = arith.constant 1 : i32
    %33 = arith.addi %32, %c1_i32 : i32
    %c0_30 = arith.constant 0 : index
    %c0_31 = arith.constant 0 : index
    %34 = arith.index_cast %33 : i32 to index
    %c0_32 = arith.constant 0 : index
    %c0_33 = arith.constant 0 : index
    %35 = vector.load %arg2[%c0_30, %c0_31, %34, %c0_32, %c0_33] : memref<1x2x16x8x3xbf16, #tpu.memory_space<vmem>>, vector<1x1x1x7x3xbf16>
    %36 = vector.shape_cast %35 : vector<1x1x1x7x3xbf16> to vector<7x3xbf16>
    %c3 = arith.constant 3 : index
    %c0_34 = arith.constant 0 : index
    %c0_35 = arith.constant 0 : index
    %37 = vector.load %arg3[%c3, %c0_34, %c0_35] : memref<9x3x128xbf16, #tpu.memory_space<vmem>>, vector<1x3x128xbf16>
    %38 = vector.shape_cast %37 : vector<1x3x128xbf16> to vector<3x128xbf16>
    %cst_36 = arith.constant dense<0.000000e+00> : vector<7x128xf32>
    %39 = tpu.matmul %36, %38, %cst_36 {dimension_numbers = #tpu.dot_dimension_numbers<[1], [0], [0], [1], [0, 0, 1, 1], [], []>} : vector<7x3xbf16>, vector<3x128xbf16>, vector<7x128xf32> -> vector<7x128xf32>
    %40 = arith.addf %30, %39 : vector<7x128xf32>
    %c2_i32_37 = arith.constant 2 : i32
    %41 = arith.muli %c2_i32_37, %arg1 : i32
    %c0_i32_38 = arith.constant 0 : i32
    %42 = arith.addi %41, %c0_i32_38 : i32
    %c1_i32_39 = arith.constant 1 : i32
    %43 = arith.addi %42, %c1_i32_39 : i32
    %c0_40 = arith.constant 0 : index
    %c1_41 = arith.constant 1 : index
    %44 = arith.index_cast %43 : i32 to index
    %c0_42 = arith.constant 0 : index
    %c0_43 = arith.constant 0 : index
    %45 = vector.load %arg2[%c0_40, %c1_41, %44, %c0_42, %c0_43] : memref<1x2x16x8x3xbf16, #tpu.memory_space<vmem>>, vector<1x1x1x7x3xbf16>
    %46 = vector.shape_cast %45 : vector<1x1x1x7x3xbf16> to vector<7x3xbf16>
    %c4 = arith.constant 4 : index
    %c0_44 = arith.constant 0 : index
    %c0_45 = arith.constant 0 : index
    %47 = vector.load %arg3[%c4, %c0_44, %c0_45] : memref<9x3x128xbf16, #tpu.memory_space<vmem>>, vector<1x3x128xbf16>
    %48 = vector.shape_cast %47 : vector<1x3x128xbf16> to vector<3x128xbf16>
    %cst_46 = arith.constant dense<0.000000e+00> : vector<7x128xf32>
    %49 = tpu.matmul %46, %48, %cst_46 {dimension_numbers = #tpu.dot_dimension_numbers<[1], [0], [0], [1], [0, 0, 1, 1], [], []>} : vector<7x3xbf16>, vector<3x128xbf16>, vector<7x128xf32> -> vector<7x128xf32>
    %50 = arith.addf %40, %49 : vector<7x128xf32>
    %c2_i32_47 = arith.constant 2 : i32
    %51 = arith.muli %c2_i32_47, %arg1 : i32
    %c0_i32_48 = arith.constant 0 : i32
    %52 = arith.addi %51, %c0_i32_48 : i32
    %c1_i32_49 = arith.constant 1 : i32
    %53 = arith.addi %52, %c1_i32_49 : i32
    %c0_50 = arith.constant 0 : index
    %c0_51 = arith.constant 0 : index
    %54 = arith.index_cast %53 : i32 to index
    %c1_52 = arith.constant 1 : index
    %c0_53 = arith.constant 0 : index
    %55 = vector.load %arg2[%c0_50, %c0_51, %54, %c1_52, %c0_53] : memref<1x2x16x8x3xbf16, #tpu.memory_space<vmem>>, vector<1x1x1x7x3xbf16>
    %56 = vector.shape_cast %55 : vector<1x1x1x7x3xbf16> to vector<7x3xbf16>
    %c5 = arith.constant 5 : index
    %c0_54 = arith.constant 0 : index
    %c0_55 = arith.constant 0 : index
    %57 = vector.load %arg3[%c5, %c0_54, %c0_55] : memref<9x3x128xbf16, #tpu.memory_space<vmem>>, vector<1x3x128xbf16>
    %58 = vector.shape_cast %57 : vector<1x3x128xbf16> to vector<3x128xbf16>
    %cst_56 = arith.constant dense<0.000000e+00> : vector<7x128xf32>
    %59 = tpu.matmul %56, %58, %cst_56 {dimension_numbers = #tpu.dot_dimension_numbers<[1], [0], [0], [1], [0, 0, 1, 1], [], []>} : vector<7x3xbf16>, vector<3x128xbf16>, vector<7x128xf32> -> vector<7x128xf32>
    %60 = arith.addf %50, %59 : vector<7x128xf32>
    %c2_i32_57 = arith.constant 2 : i32
    %61 = arith.muli %c2_i32_57, %arg1 : i32
    %c0_i32_58 = arith.constant 0 : i32
    %62 = arith.addi %61, %c0_i32_58 : i32
    %c2_i32_59 = arith.constant 2 : i32
    %63 = arith.addi %62, %c2_i32_59 : i32
    %c0_60 = arith.constant 0 : index
    %c0_61 = arith.constant 0 : index
    %64 = arith.index_cast %63 : i32 to index
    %c0_62 = arith.constant 0 : index
    %c0_63 = arith.constant 0 : index
    %65 = vector.load %arg2[%c0_60, %c0_61, %64, %c0_62, %c0_63] : memref<1x2x16x8x3xbf16, #tpu.memory_space<vmem>>, vector<1x1x1x7x3xbf16>
    %66 = vector.shape_cast %65 : vector<1x1x1x7x3xbf16> to vector<7x3xbf16>
    %c6 = arith.constant 6 : index
    %c0_64 = arith.constant 0 : index
    %c0_65 = arith.constant 0 : index
    %67 = vector.load %arg3[%c6, %c0_64, %c0_65] : memref<9x3x128xbf16, #tpu.memory_space<vmem>>, vector<1x3x128xbf16>
    %68 = vector.shape_cast %67 : vector<1x3x128xbf16> to vector<3x128xbf16>
    %cst_66 = arith.constant dense<0.000000e+00> : vector<7x128xf32>
    %69 = tpu.matmul %66, %68, %cst_66 {dimension_numbers = #tpu.dot_dimension_numbers<[1], [0], [0], [1], [0, 0, 1, 1], [], []>} : vector<7x3xbf16>, vector<3x128xbf16>, vector<7x128xf32> -> vector<7x128xf32>
    %70 = arith.addf %60, %69 : vector<7x128xf32>
    %c2_i32_67 = arith.constant 2 : i32
    %71 = arith.muli %c2_i32_67, %arg1 : i32
    %c0_i32_68 = arith.constant 0 : i32
    %72 = arith.addi %71, %c0_i32_68 : i32
    %c2_i32_69 = arith.constant 2 : i32
    %73 = arith.addi %72, %c2_i32_69 : i32
    %c0_70 = arith.constant 0 : index
    %c1_71 = arith.constant 1 : index
    %74 = arith.index_cast %73 : i32 to index
    %c0_72 = arith.constant 0 : index
    %c0_73 = arith.constant 0 : index
    %75 = vector.load %arg2[%c0_70, %c1_71, %74, %c0_72, %c0_73] : memref<1x2x16x8x3xbf16, #tpu.memory_space<vmem>>, vector<1x1x1x7x3xbf16>
    %76 = vector.shape_cast %75 : vector<1x1x1x7x3xbf16> to vector<7x3xbf16>
    %c7 = arith.constant 7 : index
    %c0_74 = arith.constant 0 : index
    %c0_75 = arith.constant 0 : index
    %77 = vector.load %arg3[%c7, %c0_74, %c0_75] : memref<9x3x128xbf16, #tpu.memory_space<vmem>>, vector<1x3x128xbf16>
    %78 = vector.shape_cast %77 : vector<1x3x128xbf16> to vector<3x128xbf16>
    %cst_76 = arith.constant dense<0.000000e+00> : vector<7x128xf32>
    %79 = tpu.matmul %76, %78, %cst_76 {dimension_numbers = #tpu.dot_dimension_numbers<[1], [0], [0], [1], [0, 0, 1, 1], [], []>} : vector<7x3xbf16>, vector<3x128xbf16>, vector<7x128xf32> -> vector<7x128xf32>
    %80 = arith.addf %70, %79 : vector<7x128xf32>
    %c2_i32_77 = arith.constant 2 : i32
    %81 = arith.muli %c2_i32_77, %arg1 : i32
    %c0_i32_78 = arith.constant 0 : i32
    %82 = arith.addi %81, %c0_i32_78 : i32
    %c2_i32_79 = arith.constant 2 : i32
    %83 = arith.addi %82, %c2_i32_79 : i32
    %c0_80 = arith.constant 0 : index
    %c0_81 = arith.constant 0 : index
    %84 = arith.index_cast %83 : i32 to index
    %c1_82 = arith.constant 1 : index
    %c0_83 = arith.constant 0 : index
    %85 = vector.load %arg2[%c0_80, %c0_81, %84, %c1_82, %c0_83] : memref<1x2x16x8x3xbf16, #tpu.memory_space<vmem>>, vector<1x1x1x7x3xbf16>
    %86 = vector.shape_cast %85 : vector<1x1x1x7x3xbf16> to vector<7x3xbf16>
    %c8 = arith.constant 8 : index
    %c0_84 = arith.constant 0 : index
    %c0_85 = arith.constant 0 : index
    %87 = vector.load %arg3[%c8, %c0_84, %c0_85] : memref<9x3x128xbf16, #tpu.memory_space<vmem>>, vector<1x3x128xbf16>
    %88 = vector.shape_cast %87 : vector<1x3x128xbf16> to vector<3x128xbf16>
    %cst_86 = arith.constant dense<0.000000e+00> : vector<7x128xf32>
    %89 = tpu.matmul %86, %88, %cst_86 {dimension_numbers = #tpu.dot_dimension_numbers<[1], [0], [0], [1], [0, 0, 1, 1], [], []>} : vector<7x3xbf16>, vector<3x128xbf16>, vector<7x128xf32> -> vector<7x128xf32>
    %90 = arith.addf %80, %89 : vector<7x128xf32>
    %cst_87 = arith.constant 0.000000e+00 : f32
    %91 = vector.broadcast %cst_87 : f32 to vector<7x128xf32>
    %c2_i32_88 = arith.constant 2 : i32
    %92 = arith.muli %c2_i32_88, %arg1 : i32
    %c0_i32_89 = arith.constant 0 : i32
    %93 = arith.addi %92, %c0_i32_89 : i32
    %c0_i32_90 = arith.constant 0 : i32
    %94 = arith.addi %93, %c0_i32_90 : i32
    %c0_91 = arith.constant 0 : index
    %c1_92 = arith.constant 1 : index
    %95 = arith.index_cast %94 : i32 to index
    %c0_93 = arith.constant 0 : index
    %c0_94 = arith.constant 0 : index
    %96 = vector.load %arg2[%c0_91, %c1_92, %95, %c0_93, %c0_94] : memref<1x2x16x8x3xbf16, #tpu.memory_space<vmem>>, vector<1x1x1x7x3xbf16>
    %97 = vector.shape_cast %96 : vector<1x1x1x7x3xbf16> to vector<7x3xbf16>
    %c0_95 = arith.constant 0 : index
    %c0_96 = arith.constant 0 : index
    %c0_97 = arith.constant 0 : index
    %98 = vector.load %arg3[%c0_95, %c0_96, %c0_97] : memref<9x3x128xbf16, #tpu.memory_space<vmem>>, vector<1x3x128xbf16>
    %99 = vector.shape_cast %98 : vector<1x3x128xbf16> to vector<3x128xbf16>
    %cst_98 = arith.constant dense<0.000000e+00> : vector<7x128xf32>
    %100 = tpu.matmul %97, %99, %cst_98 {dimension_numbers = #tpu.dot_dimension_numbers<[1], [0], [0], [1], [0, 0, 1, 1], [], []>} : vector<7x3xbf16>, vector<3x128xbf16>, vector<7x128xf32> -> vector<7x128xf32>
    %101 = arith.addf %91, %100 : vector<7x128xf32>
    %c2_i32_99 = arith.constant 2 : i32
    %102 = arith.muli %c2_i32_99, %arg1 : i32
    %c0_i32_100 = arith.constant 0 : i32
    %103 = arith.addi %102, %c0_i32_100 : i32
    %c0_i32_101 = arith.constant 0 : i32
    %104 = arith.addi %103, %c0_i32_101 : i32
    %c0_102 = arith.constant 0 : index
    %c0_103 = arith.constant 0 : index
    %105 = arith.index_cast %104 : i32 to index
    %c1_104 = arith.constant 1 : index
    %c0_105 = arith.constant 0 : index
    %106 = vector.load %arg2[%c0_102, %c0_103, %105, %c1_104, %c0_105] : memref<1x2x16x8x3xbf16, #tpu.memory_space<vmem>>, vector<1x1x1x7x3xbf16>
    %107 = vector.shape_cast %106 : vector<1x1x1x7x3xbf16> to vector<7x3xbf16>
    %c1_106 = arith.constant 1 : index
    %c0_107 = arith.constant 0 : index
    %c0_108 = arith.constant 0 : index
    %108 = vector.load %arg3[%c1_106, %c0_107, %c0_108] : memref<9x3x128xbf16, #tpu.memory_space<vmem>>, vector<1x3x128xbf16>
    %109 = vector.shape_cast %108 : vector<1x3x128xbf16> to vector<3x128xbf16>
    %cst_109 = arith.constant dense<0.000000e+00> : vector<7x128xf32>
    %110 = tpu.matmul %107, %109, %cst_109 {dimension_numbers = #tpu.dot_dimension_numbers<[1], [0], [0], [1], [0, 0, 1, 1], [], []>} : vector<7x3xbf16>, vector<3x128xbf16>, vector<7x128xf32> -> vector<7x128xf32>
    %111 = arith.addf %101, %110 : vector<7x128xf32>
    %c2_i32_110 = arith.constant 2 : i32
    %112 = arith.muli %c2_i32_110, %arg1 : i32
    %c0_i32_111 = arith.constant 0 : i32
    %113 = arith.addi %112, %c0_i32_111 : i32
    %c0_i32_112 = arith.constant 0 : i32
    %114 = arith.addi %113, %c0_i32_112 : i32
    %c0_113 = arith.constant 0 : index
    %c1_114 = arith.constant 1 : index
    %115 = arith.index_cast %114 : i32 to index
    %c1_115 = arith.constant 1 : index
    %c0_116 = arith.constant 0 : index
    %116 = vector.load %arg2[%c0_113, %c1_114, %115, %c1_115, %c0_116] : memref<1x2x16x8x3xbf16, #tpu.memory_space<vmem>>, vector<1x1x1x7x3xbf16>
    %117 = vector.shape_cast %116 : vector<1x1x1x7x3xbf16> to vector<7x3xbf16>
    %c2_117 = arith.constant 2 : index
    %c0_118 = arith.constant 0 : index
    %c0_119 = arith.constant 0 : index
    %118 = vector.load %arg3[%c2_117, %c0_118, %c0_119] : memref<9x3x128xbf16, #tpu.memory_space<vmem>>, vector<1x3x128xbf16>
    %119 = vector.shape_cast %118 : vector<1x3x128xbf16> to vector<3x128xbf16>
    %cst_120 = arith.constant dense<0.000000e+00> : vector<7x128xf32>
    %120 = tpu.matmul %117, %119, %cst_120 {dimension_numbers = #tpu.dot_dimension_numbers<[1], [0], [0], [1], [0, 0, 1, 1], [], []>} : vector<7x3xbf16>, vector<3x128xbf16>, vector<7x128xf32> -> vector<7x128xf32>
    %121 = arith.addf %111, %120 : vector<7x128xf32>
    %c2_i32_121 = arith.constant 2 : i32
    %122 = arith.muli %c2_i32_121, %arg1 : i32
    %c0_i32_122 = arith.constant 0 : i32
    %123 = arith.addi %122, %c0_i32_122 : i32
    %c1_i32_123 = arith.constant 1 : i32
    %124 = arith.addi %123, %c1_i32_123 : i32
    %c0_124 = arith.constant 0 : index
    %c1_125 = arith.constant 1 : index
    %125 = arith.index_cast %124 : i32 to index
    %c0_126 = arith.constant 0 : index
    %c0_127 = arith.constant 0 : index
    %126 = vector.load %arg2[%c0_124, %c1_125, %125, %c0_126, %c0_127] : memref<1x2x16x8x3xbf16, #tpu.memory_space<vmem>>, vector<1x1x1x7x3xbf16>
    %127 = vector.shape_cast %126 : vector<1x1x1x7x3xbf16> to vector<7x3xbf16>
    %c3_128 = arith.constant 3 : index
    %c0_129 = arith.constant 0 : index
    %c0_130 = arith.constant 0 : index
    %128 = vector.load %arg3[%c3_128, %c0_129, %c0_130] : memref<9x3x128xbf16, #tpu.memory_space<vmem>>, vector<1x3x128xbf16>
    %129 = vector.shape_cast %128 : vector<1x3x128xbf16> to vector<3x128xbf16>
    %cst_131 = arith.constant dense<0.000000e+00> : vector<7x128xf32>
    %130 = tpu.matmul %127, %129, %cst_131 {dimension_numbers = #tpu.dot_dimension_numbers<[1], [0], [0], [1], [0, 0, 1, 1], [], []>} : vector<7x3xbf16>, vector<3x128xbf16>, vector<7x128xf32> -> vector<7x128xf32>
    %131 = arith.addf %121, %130 : vector<7x128xf32>
    %c2_i32_132 = arith.constant 2 : i32
    %132 = arith.muli %c2_i32_132, %arg1 : i32
    %c0_i32_133 = arith.constant 0 : i32
    %133 = arith.addi %132, %c0_i32_133 : i32
    %c1_i32_134 = arith.constant 1 : i32
    %134 = arith.addi %133, %c1_i32_134 : i32
    %c0_135 = arith.constant 0 : index
    %c0_136 = arith.constant 0 : index
    %135 = arith.index_cast %134 : i32 to index
    %c1_137 = arith.constant 1 : index
    %c0_138 = arith.constant 0 : index
    %136 = vector.load %arg2[%c0_135, %c0_136, %135, %c1_137, %c0_138] : memref<1x2x16x8x3xbf16, #tpu.memory_space<vmem>>, vector<1x1x1x7x3xbf16>
    %137 = vector.shape_cast %136 : vector<1x1x1x7x3xbf16> to vector<7x3xbf16>
    %c4_139 = arith.constant 4 : index
    %c0_140 = arith.constant 0 : index
    %c0_141 = arith.constant 0 : index
    %138 = vector.load %arg3[%c4_139, %c0_140, %c0_141] : memref<9x3x128xbf16, #tpu.memory_space<vmem>>, vector<1x3x128xbf16>
    %139 = vector.shape_cast %138 : vector<1x3x128xbf16> to vector<3x128xbf16>
    %cst_142 = arith.constant dense<0.000000e+00> : vector<7x128xf32>
    %140 = tpu.matmul %137, %139, %cst_142 {dimension_numbers = #tpu.dot_dimension_numbers<[1], [0], [0], [1], [0, 0, 1, 1], [], []>} : vector<7x3xbf16>, vector<3x128xbf16>, vector<7x128xf32> -> vector<7x128xf32>
    %141 = arith.addf %131, %140 : vector<7x128xf32>
    %c2_i32_143 = arith.constant 2 : i32
    %142 = arith.muli %c2_i32_143, %arg1 : i32
    %c0_i32_144 = arith.constant 0 : i32
    %143 = arith.addi %142, %c0_i32_144 : i32
    %c1_i32_145 = arith.constant 1 : i32
    %144 = arith.addi %143, %c1_i32_145 : i32
    %c0_146 = arith.constant 0 : index
    %c1_147 = arith.constant 1 : index
    %145 = arith.index_cast %144 : i32 to index
    %c1_148 = arith.constant 1 : index
    %c0_149 = arith.constant 0 : index
    %146 = vector.load %arg2[%c0_146, %c1_147, %145, %c1_148, %c0_149] : memref<1x2x16x8x3xbf16, #tpu.memory_space<vmem>>, vector<1x1x1x7x3xbf16>
    %147 = vector.shape_cast %146 : vector<1x1x1x7x3xbf16> to vector<7x3xbf16>
    %c5_150 = arith.constant 5 : index
    %c0_151 = arith.constant 0 : index
    %c0_152 = arith.constant 0 : index
    %148 = vector.load %arg3[%c5_150, %c0_151, %c0_152] : memref<9x3x128xbf16, #tpu.memory_space<vmem>>, vector<1x3x128xbf16>
    %149 = vector.shape_cast %148 : vector<1x3x128xbf16> to vector<3x128xbf16>
    %cst_153 = arith.constant dense<0.000000e+00> : vector<7x128xf32>
    %150 = tpu.matmul %147, %149, %cst_153 {dimension_numbers = #tpu.dot_dimension_numbers<[1], [0], [0], [1], [0, 0, 1, 1], [], []>} : vector<7x3xbf16>, vector<3x128xbf16>, vector<7x128xf32> -> vector<7x128xf32>
    %151 = arith.addf %141, %150 : vector<7x128xf32>
    %c2_i32_154 = arith.constant 2 : i32
    %152 = arith.muli %c2_i32_154, %arg1 : i32
    %c0_i32_155 = arith.constant 0 : i32
    %153 = arith.addi %152, %c0_i32_155 : i32
    %c2_i32_156 = arith.constant 2 : i32
    %154 = arith.addi %153, %c2_i32_156 : i32
    %c0_157 = arith.constant 0 : index
    %c1_158 = arith.constant 1 : index
    %155 = arith.index_cast %154 : i32 to index
    %c0_159 = arith.constant 0 : index
    %c0_160 = arith.constant 0 : index
    %156 = vector.load %arg2[%c0_157, %c1_158, %155, %c0_159, %c0_160] : memref<1x2x16x8x3xbf16, #tpu.memory_space<vmem>>, vector<1x1x1x7x3xbf16>
    %157 = vector.shape_cast %156 : vector<1x1x1x7x3xbf16> to vector<7x3xbf16>
    %c6_161 = arith.constant 6 : index
    %c0_162 = arith.constant 0 : index
    %c0_163 = arith.constant 0 : index
    %158 = vector.load %arg3[%c6_161, %c0_162, %c0_163] : memref<9x3x128xbf16, #tpu.memory_space<vmem>>, vector<1x3x128xbf16>
    %159 = vector.shape_cast %158 : vector<1x3x128xbf16> to vector<3x128xbf16>
    %cst_164 = arith.constant dense<0.000000e+00> : vector<7x128xf32>
    %160 = tpu.matmul %157, %159, %cst_164 {dimension_numbers = #tpu.dot_dimension_numbers<[1], [0], [0], [1], [0, 0, 1, 1], [], []>} : vector<7x3xbf16>, vector<3x128xbf16>, vector<7x128xf32> -> vector<7x128xf32>
    %161 = arith.addf %151, %160 : vector<7x128xf32>
    %c2_i32_165 = arith.constant 2 : i32
    %162 = arith.muli %c2_i32_165, %arg1 : i32
    %c0_i32_166 = arith.constant 0 : i32
    %163 = arith.addi %162, %c0_i32_166 : i32
    %c2_i32_167 = arith.constant 2 : i32
    %164 = arith.addi %163, %c2_i32_167 : i32
    %c0_168 = arith.constant 0 : index
    %c0_169 = arith.constant 0 : index
    %165 = arith.index_cast %164 : i32 to index
    %c1_170 = arith.constant 1 : index
    %c0_171 = arith.constant 0 : index
    %166 = vector.load %arg2[%c0_168, %c0_169, %165, %c1_170, %c0_171] : memref<1x2x16x8x3xbf16, #tpu.memory_space<vmem>>, vector<1x1x1x7x3xbf16>
    %167 = vector.shape_cast %166 : vector<1x1x1x7x3xbf16> to vector<7x3xbf16>
    %c7_172 = arith.constant 7 : index
    %c0_173 = arith.constant 0 : index
    %c0_174 = arith.constant 0 : index
    %168 = vector.load %arg3[%c7_172, %c0_173, %c0_174] : memref<9x3x128xbf16, #tpu.memory_space<vmem>>, vector<1x3x128xbf16>
    %169 = vector.shape_cast %168 : vector<1x3x128xbf16> to vector<3x128xbf16>
    %cst_175 = arith.constant dense<0.000000e+00> : vector<7x128xf32>
    %170 = tpu.matmul %167, %169, %cst_175 {dimension_numbers = #tpu.dot_dimension_numbers<[1], [0], [0], [1], [0, 0, 1, 1], [], []>} : vector<7x3xbf16>, vector<3x128xbf16>, vector<7x128xf32> -> vector<7x128xf32>
    %171 = arith.addf %161, %170 : vector<7x128xf32>
    %c2_i32_176 = arith.constant 2 : i32
    %172 = arith.muli %c2_i32_176, %arg1 : i32
    %c0_i32_177 = arith.constant 0 : i32
    %173 = arith.addi %172, %c0_i32_177 : i32
    %c2_i32_178 = arith.constant 2 : i32
    %174 = arith.addi %173, %c2_i32_178 : i32
    %c0_179 = arith.constant 0 : index
    %c1_180 = arith.constant 1 : index
    %175 = arith.index_cast %174 : i32 to index
    %c1_181 = arith.constant 1 : index
    %c0_182 = arith.constant 0 : index
    %176 = vector.load %arg2[%c0_179, %c1_180, %175, %c1_181, %c0_182] : memref<1x2x16x8x3xbf16, #tpu.memory_space<vmem>>, vector<1x1x1x7x3xbf16>
    %177 = vector.shape_cast %176 : vector<1x1x1x7x3xbf16> to vector<7x3xbf16>
    %c8_183 = arith.constant 8 : index
    %c0_184 = arith.constant 0 : index
    %c0_185 = arith.constant 0 : index
    %178 = vector.load %arg3[%c8_183, %c0_184, %c0_185] : memref<9x3x128xbf16, #tpu.memory_space<vmem>>, vector<1x3x128xbf16>
    %179 = vector.shape_cast %178 : vector<1x3x128xbf16> to vector<3x128xbf16>
    %cst_186 = arith.constant dense<0.000000e+00> : vector<7x128xf32>
    %180 = tpu.matmul %177, %179, %cst_186 {dimension_numbers = #tpu.dot_dimension_numbers<[1], [0], [0], [1], [0, 0, 1, 1], [], []>} : vector<7x3xbf16>, vector<3x128xbf16>, vector<7x128xf32> -> vector<7x128xf32>
    %181 = arith.addf %171, %180 : vector<7x128xf32>
    %182 = arith.maximumf %90, %181 : vector<7x128xf32>
    %cst_187 = arith.constant 0.000000e+00 : f32
    %183 = vector.broadcast %cst_187 : f32 to vector<7x128xf32>
    %c2_i32_188 = arith.constant 2 : i32
    %184 = arith.muli %c2_i32_188, %arg1 : i32
    %c1_i32_189 = arith.constant 1 : i32
    %185 = arith.addi %184, %c1_i32_189 : i32
    %c0_i32_190 = arith.constant 0 : i32
    %186 = arith.addi %185, %c0_i32_190 : i32
    %c0_191 = arith.constant 0 : index
    %c0_192 = arith.constant 0 : index
    %187 = arith.index_cast %186 : i32 to index
    %c0_193 = arith.constant 0 : index
    %c0_194 = arith.constant 0 : index
    %188 = vector.load %arg2[%c0_191, %c0_192, %187, %c0_193, %c0_194] : memref<1x2x16x8x3xbf16, #tpu.memory_space<vmem>>, vector<1x1x1x7x3xbf16>
    %189 = vector.shape_cast %188 : vector<1x1x1x7x3xbf16> to vector<7x3xbf16>
    %c0_195 = arith.constant 0 : index
    %c0_196 = arith.constant 0 : index
    %c0_197 = arith.constant 0 : index
    %190 = vector.load %arg3[%c0_195, %c0_196, %c0_197] : memref<9x3x128xbf16, #tpu.memory_space<vmem>>, vector<1x3x128xbf16>
    %191 = vector.shape_cast %190 : vector<1x3x128xbf16> to vector<3x128xbf16>
    %cst_198 = arith.constant dense<0.000000e+00> : vector<7x128xf32>
    %192 = tpu.matmul %189, %191, %cst_198 {dimension_numbers = #tpu.dot_dimension_numbers<[1], [0], [0], [1], [0, 0, 1, 1], [], []>} : vector<7x3xbf16>, vector<3x128xbf16>, vector<7x128xf32> -> vector<7x128xf32>
    %193 = arith.addf %183, %192 : vector<7x128xf32>
    %c2_i32_199 = arith.constant 2 : i32
    %194 = arith.muli %c2_i32_199, %arg1 : i32
    %c1_i32_200 = arith.constant 1 : i32
    %195 = arith.addi %194, %c1_i32_200 : i32
    %c0_i32_201 = arith.constant 0 : i32
    %196 = arith.addi %195, %c0_i32_201 : i32
    %c0_202 = arith.constant 0 : index
    %c1_203 = arith.constant 1 : index
    %197 = arith.index_cast %196 : i32 to index
    %c0_204 = arith.constant 0 : index
    %c0_205 = arith.constant 0 : index
    %198 = vector.load %arg2[%c0_202, %c1_203, %197, %c0_204, %c0_205] : memref<1x2x16x8x3xbf16, #tpu.memory_space<vmem>>, vector<1x1x1x7x3xbf16>
    %199 = vector.shape_cast %198 : vector<1x1x1x7x3xbf16> to vector<7x3xbf16>
    %c1_206 = arith.constant 1 : index
    %c0_207 = arith.constant 0 : index
    %c0_208 = arith.constant 0 : index
    %200 = vector.load %arg3[%c1_206, %c0_207, %c0_208] : memref<9x3x128xbf16, #tpu.memory_space<vmem>>, vector<1x3x128xbf16>
    %201 = vector.shape_cast %200 : vector<1x3x128xbf16> to vector<3x128xbf16>
    %cst_209 = arith.constant dense<0.000000e+00> : vector<7x128xf32>
    %202 = tpu.matmul %199, %201, %cst_209 {dimension_numbers = #tpu.dot_dimension_numbers<[1], [0], [0], [1], [0, 0, 1, 1], [], []>} : vector<7x3xbf16>, vector<3x128xbf16>, vector<7x128xf32> -> vector<7x128xf32>
    %203 = arith.addf %193, %202 : vector<7x128xf32>
    %c2_i32_210 = arith.constant 2 : i32
    %204 = arith.muli %c2_i32_210, %arg1 : i32
    %c1_i32_211 = arith.constant 1 : i32
    %205 = arith.addi %204, %c1_i32_211 : i32
    %c0_i32_212 = arith.constant 0 : i32
    %206 = arith.addi %205, %c0_i32_212 : i32
    %c0_213 = arith.constant 0 : index
    %c0_214 = arith.constant 0 : index
    %207 = arith.index_cast %206 : i32 to index
    %c1_215 = arith.constant 1 : index
    %c0_216 = arith.constant 0 : index
    %208 = vector.load %arg2[%c0_213, %c0_214, %207, %c1_215, %c0_216] : memref<1x2x16x8x3xbf16, #tpu.memory_space<vmem>>, vector<1x1x1x7x3xbf16>
    %209 = vector.shape_cast %208 : vector<1x1x1x7x3xbf16> to vector<7x3xbf16>
    %c2_217 = arith.constant 2 : index
    %c0_218 = arith.constant 0 : index
    %c0_219 = arith.constant 0 : index
    %210 = vector.load %arg3[%c2_217, %c0_218, %c0_219] : memref<9x3x128xbf16, #tpu.memory_space<vmem>>, vector<1x3x128xbf16>
    %211 = vector.shape_cast %210 : vector<1x3x128xbf16> to vector<3x128xbf16>
    %cst_220 = arith.constant dense<0.000000e+00> : vector<7x128xf32>
    %212 = tpu.matmul %209, %211, %cst_220 {dimension_numbers = #tpu.dot_dimension_numbers<[1], [0], [0], [1], [0, 0, 1, 1], [], []>} : vector<7x3xbf16>, vector<3x128xbf16>, vector<7x128xf32> -> vector<7x128xf32>
    %213 = arith.addf %203, %212 : vector<7x128xf32>
    %c2_i32_221 = arith.constant 2 : i32
    %214 = arith.muli %c2_i32_221, %arg1 : i32
    %c1_i32_222 = arith.constant 1 : i32
    %215 = arith.addi %214, %c1_i32_222 : i32
    %c1_i32_223 = arith.constant 1 : i32
    %216 = arith.addi %215, %c1_i32_223 : i32
    %c0_224 = arith.constant 0 : index
    %c0_225 = arith.constant 0 : index
    %217 = arith.index_cast %216 : i32 to index
    %c0_226 = arith.constant 0 : index
    %c0_227 = arith.constant 0 : index
    %218 = vector.load %arg2[%c0_224, %c0_225, %217, %c0_226, %c0_227] : memref<1x2x16x8x3xbf16, #tpu.memory_space<vmem>>, vector<1x1x1x7x3xbf16>
    %219 = vector.shape_cast %218 : vector<1x1x1x7x3xbf16> to vector<7x3xbf16>
    %c3_228 = arith.constant 3 : index
    %c0_229 = arith.constant 0 : index
    %c0_230 = arith.constant 0 : index
    %220 = vector.load %arg3[%c3_228, %c0_229, %c0_230] : memref<9x3x128xbf16, #tpu.memory_space<vmem>>, vector<1x3x128xbf16>
    %221 = vector.shape_cast %220 : vector<1x3x128xbf16> to vector<3x128xbf16>
    %cst_231 = arith.constant dense<0.000000e+00> : vector<7x128xf32>
    %222 = tpu.matmul %219, %221, %cst_231 {dimension_numbers = #tpu.dot_dimension_numbers<[1], [0], [0], [1], [0, 0, 1, 1], [], []>} : vector<7x3xbf16>, vector<3x128xbf16>, vector<7x128xf32> -> vector<7x128xf32>
    %223 = arith.addf %213, %222 : vector<7x128xf32>
    %c2_i32_232 = arith.constant 2 : i32
    %224 = arith.muli %c2_i32_232, %arg1 : i32
    %c1_i32_233 = arith.constant 1 : i32
    %225 = arith.addi %224, %c1_i32_233 : i32
    %c1_i32_234 = arith.constant 1 : i32
    %226 = arith.addi %225, %c1_i32_234 : i32
    %c0_235 = arith.constant 0 : index
    %c1_236 = arith.constant 1 : index
    %227 = arith.index_cast %226 : i32 to index
    %c0_237 = arith.constant 0 : index
    %c0_238 = arith.constant 0 : index
    %228 = vector.load %arg2[%c0_235, %c1_236, %227, %c0_237, %c0_238] : memref<1x2x16x8x3xbf16, #tpu.memory_space<vmem>>, vector<1x1x1x7x3xbf16>
    %229 = vector.shape_cast %228 : vector<1x1x1x7x3xbf16> to vector<7x3xbf16>
    %c4_239 = arith.constant 4 : index
    %c0_240 = arith.constant 0 : index
    %c0_241 = arith.constant 0 : index
    %230 = vector.load %arg3[%c4_239, %c0_240, %c0_241] : memref<9x3x128xbf16, #tpu.memory_space<vmem>>, vector<1x3x128xbf16>
    %231 = vector.shape_cast %230 : vector<1x3x128xbf16> to vector<3x128xbf16>
    %cst_242 = arith.constant dense<0.000000e+00> : vector<7x128xf32>
    %232 = tpu.matmul %229, %231, %cst_242 {dimension_numbers = #tpu.dot_dimension_numbers<[1], [0], [0], [1], [0, 0, 1, 1], [], []>} : vector<7x3xbf16>, vector<3x128xbf16>, vector<7x128xf32> -> vector<7x128xf32>
    %233 = arith.addf %223, %232 : vector<7x128xf32>
    %c2_i32_243 = arith.constant 2 : i32
    %234 = arith.muli %c2_i32_243, %arg1 : i32
    %c1_i32_244 = arith.constant 1 : i32
    %235 = arith.addi %234, %c1_i32_244 : i32
    %c1_i32_245 = arith.constant 1 : i32
    %236 = arith.addi %235, %c1_i32_245 : i32
    %c0_246 = arith.constant 0 : index
    %c0_247 = arith.constant 0 : index
    %237 = arith.index_cast %236 : i32 to index
    %c1_248 = arith.constant 1 : index
    %c0_249 = arith.constant 0 : index
    %238 = vector.load %arg2[%c0_246, %c0_247, %237, %c1_248, %c0_249] : memref<1x2x16x8x3xbf16, #tpu.memory_space<vmem>>, vector<1x1x1x7x3xbf16>
    %239 = vector.shape_cast %238 : vector<1x1x1x7x3xbf16> to vector<7x3xbf16>
    %c5_250 = arith.constant 5 : index
    %c0_251 = arith.constant 0 : index
    %c0_252 = arith.constant 0 : index
    %240 = vector.load %arg3[%c5_250, %c0_251, %c0_252] : memref<9x3x128xbf16, #tpu.memory_space<vmem>>, vector<1x3x128xbf16>
    %241 = vector.shape_cast %240 : vector<1x3x128xbf16> to vector<3x128xbf16>
    %cst_253 = arith.constant dense<0.000000e+00> : vector<7x128xf32>
    %242 = tpu.matmul %239, %241, %cst_253 {dimension_numbers = #tpu.dot_dimension_numbers<[1], [0], [0], [1], [0, 0, 1, 1], [], []>} : vector<7x3xbf16>, vector<3x128xbf16>, vector<7x128xf32> -> vector<7x128xf32>
    %243 = arith.addf %233, %242 : vector<7x128xf32>
    %c2_i32_254 = arith.constant 2 : i32
    %244 = arith.muli %c2_i32_254, %arg1 : i32
    %c1_i32_255 = arith.constant 1 : i32
    %245 = arith.addi %244, %c1_i32_255 : i32
    %c2_i32_256 = arith.constant 2 : i32
    %246 = arith.addi %245, %c2_i32_256 : i32
    %c0_257 = arith.constant 0 : index
    %c0_258 = arith.constant 0 : index
    %247 = arith.index_cast %246 : i32 to index
    %c0_259 = arith.constant 0 : index
    %c0_260 = arith.constant 0 : index
    %248 = vector.load %arg2[%c0_257, %c0_258, %247, %c0_259, %c0_260] : memref<1x2x16x8x3xbf16, #tpu.memory_space<vmem>>, vector<1x1x1x7x3xbf16>
    %249 = vector.shape_cast %248 : vector<1x1x1x7x3xbf16> to vector<7x3xbf16>
    %c6_261 = arith.constant 6 : index
    %c0_262 = arith.constant 0 : index
    %c0_263 = arith.constant 0 : index
    %250 = vector.load %arg3[%c6_261, %c0_262, %c0_263] : memref<9x3x128xbf16, #tpu.memory_space<vmem>>, vector<1x3x128xbf16>
    %251 = vector.shape_cast %250 : vector<1x3x128xbf16> to vector<3x128xbf16>
    %cst_264 = arith.constant dense<0.000000e+00> : vector<7x128xf32>
    %252 = tpu.matmul %249, %251, %cst_264 {dimension_numbers = #tpu.dot_dimension_numbers<[1], [0], [0], [1], [0, 0, 1, 1], [], []>} : vector<7x3xbf16>, vector<3x128xbf16>, vector<7x128xf32> -> vector<7x128xf32>
    %253 = arith.addf %243, %252 : vector<7x128xf32>
    %c2_i32_265 = arith.constant 2 : i32
    %254 = arith.muli %c2_i32_265, %arg1 : i32
    %c1_i32_266 = arith.constant 1 : i32
    %255 = arith.addi %254, %c1_i32_266 : i32
    %c2_i32_267 = arith.constant 2 : i32
    %256 = arith.addi %255, %c2_i32_267 : i32
    %c0_268 = arith.constant 0 : index
    %c1_269 = arith.constant 1 : index
    %257 = arith.index_cast %256 : i32 to index
    %c0_270 = arith.constant 0 : index
    %c0_271 = arith.constant 0 : index
    %258 = vector.load %arg2[%c0_268, %c1_269, %257, %c0_270, %c0_271] : memref<1x2x16x8x3xbf16, #tpu.memory_space<vmem>>, vector<1x1x1x7x3xbf16>
    %259 = vector.shape_cast %258 : vector<1x1x1x7x3xbf16> to vector<7x3xbf16>
    %c7_272 = arith.constant 7 : index
    %c0_273 = arith.constant 0 : index
    %c0_274 = arith.constant 0 : index
    %260 = vector.load %arg3[%c7_272, %c0_273, %c0_274] : memref<9x3x128xbf16, #tpu.memory_space<vmem>>, vector<1x3x128xbf16>
    %261 = vector.shape_cast %260 : vector<1x3x128xbf16> to vector<3x128xbf16>
    %cst_275 = arith.constant dense<0.000000e+00> : vector<7x128xf32>
    %262 = tpu.matmul %259, %261, %cst_275 {dimension_numbers = #tpu.dot_dimension_numbers<[1], [0], [0], [1], [0, 0, 1, 1], [], []>} : vector<7x3xbf16>, vector<3x128xbf16>, vector<7x128xf32> -> vector<7x128xf32>
    %263 = arith.addf %253, %262 : vector<7x128xf32>
    %c2_i32_276 = arith.constant 2 : i32
    %264 = arith.muli %c2_i32_276, %arg1 : i32
    %c1_i32_277 = arith.constant 1 : i32
    %265 = arith.addi %264, %c1_i32_277 : i32
    %c2_i32_278 = arith.constant 2 : i32
    %266 = arith.addi %265, %c2_i32_278 : i32
    %c0_279 = arith.constant 0 : index
    %c0_280 = arith.constant 0 : index
    %267 = arith.index_cast %266 : i32 to index
    %c1_281 = arith.constant 1 : index
    %c0_282 = arith.constant 0 : index
    %268 = vector.load %arg2[%c0_279, %c0_280, %267, %c1_281, %c0_282] : memref<1x2x16x8x3xbf16, #tpu.memory_space<vmem>>, vector<1x1x1x7x3xbf16>
    %269 = vector.shape_cast %268 : vector<1x1x1x7x3xbf16> to vector<7x3xbf16>
    %c8_283 = arith.constant 8 : index
    %c0_284 = arith.constant 0 : index
    %c0_285 = arith.constant 0 : index
    %270 = vector.load %arg3[%c8_283, %c0_284, %c0_285] : memref<9x3x128xbf16, #tpu.memory_space<vmem>>, vector<1x3x128xbf16>
    %271 = vector.shape_cast %270 : vector<1x3x128xbf16> to vector<3x128xbf16>
    %cst_286 = arith.constant dense<0.000000e+00> : vector<7x128xf32>
    %272 = tpu.matmul %269, %271, %cst_286 {dimension_numbers = #tpu.dot_dimension_numbers<[1], [0], [0], [1], [0, 0, 1, 1], [], []>} : vector<7x3xbf16>, vector<3x128xbf16>, vector<7x128xf32> -> vector<7x128xf32>
    %273 = arith.addf %263, %272 : vector<7x128xf32>
    %274 = arith.maximumf %182, %273 : vector<7x128xf32>
    %cst_287 = arith.constant 0.000000e+00 : f32
    %275 = vector.broadcast %cst_287 : f32 to vector<7x128xf32>
    %c2_i32_288 = arith.constant 2 : i32
    %276 = arith.muli %c2_i32_288, %arg1 : i32
    %c1_i32_289 = arith.constant 1 : i32
    %277 = arith.addi %276, %c1_i32_289 : i32
    %c0_i32_290 = arith.constant 0 : i32
    %278 = arith.addi %277, %c0_i32_290 : i32
    %c0_291 = arith.constant 0 : index
    %c1_292 = arith.constant 1 : index
    %279 = arith.index_cast %278 : i32 to index
    %c0_293 = arith.constant 0 : index
    %c0_294 = arith.constant 0 : index
    %280 = vector.load %arg2[%c0_291, %c1_292, %279, %c0_293, %c0_294] : memref<1x2x16x8x3xbf16, #tpu.memory_space<vmem>>, vector<1x1x1x7x3xbf16>
    %281 = vector.shape_cast %280 : vector<1x1x1x7x3xbf16> to vector<7x3xbf16>
    %c0_295 = arith.constant 0 : index
    %c0_296 = arith.constant 0 : index
    %c0_297 = arith.constant 0 : index
    %282 = vector.load %arg3[%c0_295, %c0_296, %c0_297] : memref<9x3x128xbf16, #tpu.memory_space<vmem>>, vector<1x3x128xbf16>
    %283 = vector.shape_cast %282 : vector<1x3x128xbf16> to vector<3x128xbf16>
    %cst_298 = arith.constant dense<0.000000e+00> : vector<7x128xf32>
    %284 = tpu.matmul %281, %283, %cst_298 {dimension_numbers = #tpu.dot_dimension_numbers<[1], [0], [0], [1], [0, 0, 1, 1], [], []>} : vector<7x3xbf16>, vector<3x128xbf16>, vector<7x128xf32> -> vector<7x128xf32>
    %285 = arith.addf %275, %284 : vector<7x128xf32>
    %c2_i32_299 = arith.constant 2 : i32
    %286 = arith.muli %c2_i32_299, %arg1 : i32
    %c1_i32_300 = arith.constant 1 : i32
    %287 = arith.addi %286, %c1_i32_300 : i32
    %c0_i32_301 = arith.constant 0 : i32
    %288 = arith.addi %287, %c0_i32_301 : i32
    %c0_302 = arith.constant 0 : index
    %c0_303 = arith.constant 0 : index
    %289 = arith.index_cast %288 : i32 to index
    %c1_304 = arith.constant 1 : index
    %c0_305 = arith.constant 0 : index
    %290 = vector.load %arg2[%c0_302, %c0_303, %289, %c1_304, %c0_305] : memref<1x2x16x8x3xbf16, #tpu.memory_space<vmem>>, vector<1x1x1x7x3xbf16>
    %291 = vector.shape_cast %290 : vector<1x1x1x7x3xbf16> to vector<7x3xbf16>
    %c1_306 = arith.constant 1 : index
    %c0_307 = arith.constant 0 : index
    %c0_308 = arith.constant 0 : index
    %292 = vector.load %arg3[%c1_306, %c0_307, %c0_308] : memref<9x3x128xbf16, #tpu.memory_space<vmem>>, vector<1x3x128xbf16>
    %293 = vector.shape_cast %292 : vector<1x3x128xbf16> to vector<3x128xbf16>
    %cst_309 = arith.constant dense<0.000000e+00> : vector<7x128xf32>
    %294 = tpu.matmul %291, %293, %cst_309 {dimension_numbers = #tpu.dot_dimension_numbers<[1], [0], [0], [1], [0, 0, 1, 1], [], []>} : vector<7x3xbf16>, vector<3x128xbf16>, vector<7x128xf32> -> vector<7x128xf32>
    %295 = arith.addf %285, %294 : vector<7x128xf32>
    %c2_i32_310 = arith.constant 2 : i32
    %296 = arith.muli %c2_i32_310, %arg1 : i32
    %c1_i32_311 = arith.constant 1 : i32
    %297 = arith.addi %296, %c1_i32_311 : i32
    %c0_i32_312 = arith.constant 0 : i32
    %298 = arith.addi %297, %c0_i32_312 : i32
    %c0_313 = arith.constant 0 : index
    %c1_314 = arith.constant 1 : index
    %299 = arith.index_cast %298 : i32 to index
    %c1_315 = arith.constant 1 : index
    %c0_316 = arith.constant 0 : index
    %300 = vector.load %arg2[%c0_313, %c1_314, %299, %c1_315, %c0_316] : memref<1x2x16x8x3xbf16, #tpu.memory_space<vmem>>, vector<1x1x1x7x3xbf16>
    %301 = vector.shape_cast %300 : vector<1x1x1x7x3xbf16> to vector<7x3xbf16>
    %c2_317 = arith.constant 2 : index
    %c0_318 = arith.constant 0 : index
    %c0_319 = arith.constant 0 : index
    %302 = vector.load %arg3[%c2_317, %c0_318, %c0_319] : memref<9x3x128xbf16, #tpu.memory_space<vmem>>, vector<1x3x128xbf16>
    %303 = vector.shape_cast %302 : vector<1x3x128xbf16> to vector<3x128xbf16>
    %cst_320 = arith.constant dense<0.000000e+00> : vector<7x128xf32>
    %304 = tpu.matmul %301, %303, %cst_320 {dimension_numbers = #tpu.dot_dimension_numbers<[1], [0], [0], [1], [0, 0, 1, 1], [], []>} : vector<7x3xbf16>, vector<3x128xbf16>, vector<7x128xf32> -> vector<7x128xf32>
    %305 = arith.addf %295, %304 : vector<7x128xf32>
    %c2_i32_321 = arith.constant 2 : i32
    %306 = arith.muli %c2_i32_321, %arg1 : i32
    %c1_i32_322 = arith.constant 1 : i32
    %307 = arith.addi %306, %c1_i32_322 : i32
    %c1_i32_323 = arith.constant 1 : i32
    %308 = arith.addi %307, %c1_i32_323 : i32
    %c0_324 = arith.constant 0 : index
    %c1_325 = arith.constant 1 : index
    %309 = arith.index_cast %308 : i32 to index
    %c0_326 = arith.constant 0 : index
    %c0_327 = arith.constant 0 : index
    %310 = vector.load %arg2[%c0_324, %c1_325, %309, %c0_326, %c0_327] : memref<1x2x16x8x3xbf16, #tpu.memory_space<vmem>>, vector<1x1x1x7x3xbf16>
    %311 = vector.shape_cast %310 : vector<1x1x1x7x3xbf16> to vector<7x3xbf16>
    %c3_328 = arith.constant 3 : index
    %c0_329 = arith.constant 0 : index
    %c0_330 = arith.constant 0 : index
    %312 = vector.load %arg3[%c3_328, %c0_329, %c0_330] : memref<9x3x128xbf16, #tpu.memory_space<vmem>>, vector<1x3x128xbf16>
    %313 = vector.shape_cast %312 : vector<1x3x128xbf16> to vector<3x128xbf16>
    %cst_331 = arith.constant dense<0.000000e+00> : vector<7x128xf32>
    %314 = tpu.matmul %311, %313, %cst_331 {dimension_numbers = #tpu.dot_dimension_numbers<[1], [0], [0], [1], [0, 0, 1, 1], [], []>} : vector<7x3xbf16>, vector<3x128xbf16>, vector<7x128xf32> -> vector<7x128xf32>
    %315 = arith.addf %305, %314 : vector<7x128xf32>
    %c2_i32_332 = arith.constant 2 : i32
    %316 = arith.muli %c2_i32_332, %arg1 : i32
    %c1_i32_333 = arith.constant 1 : i32
    %317 = arith.addi %316, %c1_i32_333 : i32
    %c1_i32_334 = arith.constant 1 : i32
    %318 = arith.addi %317, %c1_i32_334 : i32
    %c0_335 = arith.constant 0 : index
    %c0_336 = arith.constant 0 : index
    %319 = arith.index_cast %318 : i32 to index
    %c1_337 = arith.constant 1 : index
    %c0_338 = arith.constant 0 : index
    %320 = vector.load %arg2[%c0_335, %c0_336, %319, %c1_337, %c0_338] : memref<1x2x16x8x3xbf16, #tpu.memory_space<vmem>>, vector<1x1x1x7x3xbf16>
    %321 = vector.shape_cast %320 : vector<1x1x1x7x3xbf16> to vector<7x3xbf16>
    %c4_339 = arith.constant 4 : index
    %c0_340 = arith.constant 0 : index
    %c0_341 = arith.constant 0 : index
    %322 = vector.load %arg3[%c4_339, %c0_340, %c0_341] : memref<9x3x128xbf16, #tpu.memory_space<vmem>>, vector<1x3x128xbf16>
    %323 = vector.shape_cast %322 : vector<1x3x128xbf16> to vector<3x128xbf16>
    %cst_342 = arith.constant dense<0.000000e+00> : vector<7x128xf32>
    %324 = tpu.matmul %321, %323, %cst_342 {dimension_numbers = #tpu.dot_dimension_numbers<[1], [0], [0], [1], [0, 0, 1, 1], [], []>} : vector<7x3xbf16>, vector<3x128xbf16>, vector<7x128xf32> -> vector<7x128xf32>
    %325 = arith.addf %315, %324 : vector<7x128xf32>
    %c2_i32_343 = arith.constant 2 : i32
    %326 = arith.muli %c2_i32_343, %arg1 : i32
    %c1_i32_344 = arith.constant 1 : i32
    %327 = arith.addi %326, %c1_i32_344 : i32
    %c1_i32_345 = arith.constant 1 : i32
    %328 = arith.addi %327, %c1_i32_345 : i32
    %c0_346 = arith.constant 0 : index
    %c1_347 = arith.constant 1 : index
    %329 = arith.index_cast %328 : i32 to index
    %c1_348 = arith.constant 1 : index
    %c0_349 = arith.constant 0 : index
    %330 = vector.load %arg2[%c0_346, %c1_347, %329, %c1_348, %c0_349] : memref<1x2x16x8x3xbf16, #tpu.memory_space<vmem>>, vector<1x1x1x7x3xbf16>
    %331 = vector.shape_cast %330 : vector<1x1x1x7x3xbf16> to vector<7x3xbf16>
    %c5_350 = arith.constant 5 : index
    %c0_351 = arith.constant 0 : index
    %c0_352 = arith.constant 0 : index
    %332 = vector.load %arg3[%c5_350, %c0_351, %c0_352] : memref<9x3x128xbf16, #tpu.memory_space<vmem>>, vector<1x3x128xbf16>
    %333 = vector.shape_cast %332 : vector<1x3x128xbf16> to vector<3x128xbf16>
    %cst_353 = arith.constant dense<0.000000e+00> : vector<7x128xf32>
    %334 = tpu.matmul %331, %333, %cst_353 {dimension_numbers = #tpu.dot_dimension_numbers<[1], [0], [0], [1], [0, 0, 1, 1], [], []>} : vector<7x3xbf16>, vector<3x128xbf16>, vector<7x128xf32> -> vector<7x128xf32>
    %335 = arith.addf %325, %334 : vector<7x128xf32>
    %c2_i32_354 = arith.constant 2 : i32
    %336 = arith.muli %c2_i32_354, %arg1 : i32
    %c1_i32_355 = arith.constant 1 : i32
    %337 = arith.addi %336, %c1_i32_355 : i32
    %c2_i32_356 = arith.constant 2 : i32
    %338 = arith.addi %337, %c2_i32_356 : i32
    %c0_357 = arith.constant 0 : index
    %c1_358 = arith.constant 1 : index
    %339 = arith.index_cast %338 : i32 to index
    %c0_359 = arith.constant 0 : index
    %c0_360 = arith.constant 0 : index
    %340 = vector.load %arg2[%c0_357, %c1_358, %339, %c0_359, %c0_360] : memref<1x2x16x8x3xbf16, #tpu.memory_space<vmem>>, vector<1x1x1x7x3xbf16>
    %341 = vector.shape_cast %340 : vector<1x1x1x7x3xbf16> to vector<7x3xbf16>
    %c6_361 = arith.constant 6 : index
    %c0_362 = arith.constant 0 : index
    %c0_363 = arith.constant 0 : index
    %342 = vector.load %arg3[%c6_361, %c0_362, %c0_363] : memref<9x3x128xbf16, #tpu.memory_space<vmem>>, vector<1x3x128xbf16>
    %343 = vector.shape_cast %342 : vector<1x3x128xbf16> to vector<3x128xbf16>
    %cst_364 = arith.constant dense<0.000000e+00> : vector<7x128xf32>
    %344 = tpu.matmul %341, %343, %cst_364 {dimension_numbers = #tpu.dot_dimension_numbers<[1], [0], [0], [1], [0, 0, 1, 1], [], []>} : vector<7x3xbf16>, vector<3x128xbf16>, vector<7x128xf32> -> vector<7x128xf32>
    %345 = arith.addf %335, %344 : vector<7x128xf32>
    %c2_i32_365 = arith.constant 2 : i32
    %346 = arith.muli %c2_i32_365, %arg1 : i32
    %c1_i32_366 = arith.constant 1 : i32
    %347 = arith.addi %346, %c1_i32_366 : i32
    %c2_i32_367 = arith.constant 2 : i32
    %348 = arith.addi %347, %c2_i32_367 : i32
    %c0_368 = arith.constant 0 : index
    %c0_369 = arith.constant 0 : index
    %349 = arith.index_cast %348 : i32 to index
    %c1_370 = arith.constant 1 : index
    %c0_371 = arith.constant 0 : index
    %350 = vector.load %arg2[%c0_368, %c0_369, %349, %c1_370, %c0_371] : memref<1x2x16x8x3xbf16, #tpu.memory_space<vmem>>, vector<1x1x1x7x3xbf16>
    %351 = vector.shape_cast %350 : vector<1x1x1x7x3xbf16> to vector<7x3xbf16>
    %c7_372 = arith.constant 7 : index
    %c0_373 = arith.constant 0 : index
    %c0_374 = arith.constant 0 : index
    %352 = vector.load %arg3[%c7_372, %c0_373, %c0_374] : memref<9x3x128xbf16, #tpu.memory_space<vmem>>, vector<1x3x128xbf16>
    %353 = vector.shape_cast %352 : vector<1x3x128xbf16> to vector<3x128xbf16>
    %cst_375 = arith.constant dense<0.000000e+00> : vector<7x128xf32>
    %354 = tpu.matmul %351, %353, %cst_375 {dimension_numbers = #tpu.dot_dimension_numbers<[1], [0], [0], [1], [0, 0, 1, 1], [], []>} : vector<7x3xbf16>, vector<3x128xbf16>, vector<7x128xf32> -> vector<7x128xf32>
    %355 = arith.addf %345, %354 : vector<7x128xf32>
    %c2_i32_376 = arith.constant 2 : i32
    %356 = arith.muli %c2_i32_376, %arg1 : i32
    %c1_i32_377 = arith.constant 1 : i32
    %357 = arith.addi %356, %c1_i32_377 : i32
    %c2_i32_378 = arith.constant 2 : i32
    %358 = arith.addi %357, %c2_i32_378 : i32
    %c0_379 = arith.constant 0 : index
    %c1_380 = arith.constant 1 : index
    %359 = arith.index_cast %358 : i32 to index
    %c1_381 = arith.constant 1 : index
    %c0_382 = arith.constant 0 : index
    %360 = vector.load %arg2[%c0_379, %c1_380, %359, %c1_381, %c0_382] : memref<1x2x16x8x3xbf16, #tpu.memory_space<vmem>>, vector<1x1x1x7x3xbf16>
    %361 = vector.shape_cast %360 : vector<1x1x1x7x3xbf16> to vector<7x3xbf16>
    %c8_383 = arith.constant 8 : index
    %c0_384 = arith.constant 0 : index
    %c0_385 = arith.constant 0 : index
    %362 = vector.load %arg3[%c8_383, %c0_384, %c0_385] : memref<9x3x128xbf16, #tpu.memory_space<vmem>>, vector<1x3x128xbf16>
    %363 = vector.shape_cast %362 : vector<1x3x128xbf16> to vector<3x128xbf16>
    %cst_386 = arith.constant dense<0.000000e+00> : vector<7x128xf32>
    %364 = tpu.matmul %361, %363, %cst_386 {dimension_numbers = #tpu.dot_dimension_numbers<[1], [0], [0], [1], [0, 0, 1, 1], [], []>} : vector<7x3xbf16>, vector<3x128xbf16>, vector<7x128xf32> -> vector<7x128xf32>
    %365 = arith.addf %355, %364 : vector<7x128xf32>
    %366 = arith.maximumf %274, %365 : vector<7x128xf32>
    %c0_387 = arith.constant 0 : index
    %c0_388 = arith.constant 0 : index
    %367 = vector.load %arg4[%c0_387, %c0_388] : memref<1x128xf32, #tpu.memory_space<vmem>>, vector<1x128xf32>
    %368 = vector.broadcast %367 : vector<1x128xf32> to vector<7x128xf32>
    %369 = arith.addf %366, %368 : vector<7x128xf32>
    %cst_389 = arith.constant 0.000000e+00 : f32
    %370 = vector.broadcast %cst_389 : f32 to vector<7x128xf32>
    %371 = arith.maximumf %369, %370 : vector<7x128xf32>
    %372 = arith.truncf %371 : vector<7x128xf32> to vector<7x128xbf16>
    %c0_390 = arith.constant 0 : index
    %c0_391 = arith.constant 0 : index
    %c0_392 = arith.constant 0 : index
    %c0_393 = arith.constant 0 : index
    %373 = vector.load %arg5[%c0_390, %c0_391, %c0_392, %c0_393] : memref<1x1x7x128xbf16, #tpu.memory_space<vmem>>, vector<1x1x7x128xbf16>
    %374 = vector.shape_cast %373 : vector<1x1x7x128xbf16> to vector<7x128xbf16>
    %375 = vector.shape_cast %372 : vector<7x128xbf16> to vector<1x1x7x128xbf16>
    tpu.vector_store %arg5[%c0_390, %c0_391, %c0_392, %c0_393], %375 {strides = array<i32>} : memref<1x1x7x128xbf16, #tpu.memory_space<vmem>>, vector<1x1x7x128xbf16>,
    return
  }
  func.func @transform_0(%arg0: i32, %arg1: i32) -> (i32, i32, i32, i32, i32) {
    %c0_i32 = arith.constant 0 : i32
    %c0_i32_0 = arith.constant 0 : i32
    %c0_i32_1 = arith.constant 0 : i32
    %c0_i32_2 = arith.constant 0 : i32
    %c0_i32_3 = arith.constant 0 : i32
    return %arg0, %c0_i32, %c0_i32_0, %c0_i32_1, %c0_i32_2 : i32, i32, i32, i32, i32
  }
  func.func @transform_1(%arg0: i32, %arg1: i32) -> (i32, i32, i32) {
    %c0_i32 = arith.constant 0 : i32
    %c0_i32_0 = arith.constant 0 : i32
    %c0_i32_1 = arith.constant 0 : i32
    %c0_i32_2 = arith.constant 0 : i32
    return %c0_i32, %c0_i32_0, %c0_i32_1 : i32, i32, i32
  }
  func.func @transform_2(%arg0: i32, %arg1: i32) -> (i32, i32) {
    %c0_i32 = arith.constant 0 : i32
    %c0_i32_0 = arith.constant 0 : i32
    %c0_i32_1 = arith.constant 0 : i32
    return %c0_i32, %c0_i32_0 : i32, i32
  }
  func.func @transform_3(%arg0: i32, %arg1: i32) -> (i32, i32, i32, i32) {
    %c0_i32 = arith.constant 0 : i32
    %c0_i32_0 = arith.constant 0 : i32
    %c0_i32_1 = arith.constant 0 : i32
    return %arg0, %arg1, %c0_i32, %c0_i32_0 : i32, i32, i32, i32
  }
}

module attributes {stable_mosaic.version = 11 : i64} {
  func.func @_conv_relu_pool_kernel(%arg0: i32, %arg1: i32, %arg2: memref<1x2x7x4x128xbf16, #tpu.memory_space<vmem>>, %arg3: memref<9x128x128xbf16, #tpu.memory_space<vmem>>, %arg4: memref<1x128xf32, #tpu.memory_space<vmem>>, %arg5: memref<1x1x2x128xbf16, #tpu.memory_space<vmem>>) attributes {dimension_semantics = [#tpu.dimension_semantics<parallel>, #tpu.dimension_semantics<arbitrary>], iteration_bounds = array<i64: 2, 2>, scalar_prefetch = 0 : i64, scratch_operands = 0 : i64, tpu.core_type = #tpu.core_type<tc>, window_params = [{transform_indices = @transform_0, window_bounds = array<i64: 1, 2, 7, 4, 128>}, {pipeline_mode = #tpu.pipeline_mode<synchronous>, transform_indices = @transform_1, window_bounds = array<i64: 9, 128, 128>}, {pipeline_mode = #tpu.pipeline_mode<synchronous>, transform_indices = @transform_2, window_bounds = array<i64: 1, 128>}, {transform_indices = @transform_3, window_bounds = array<i64: 1, 1, 2, 128>}]} {
    %cst = arith.constant 0.000000e+00 : f32
    %0 = vector.broadcast %cst : f32 to vector<2x128xf32>
    %c2_i32 = arith.constant 2 : i32
    %1 = arith.muli %c2_i32, %arg1 : i32
    %c0_i32 = arith.constant 0 : i32
    %2 = arith.addi %1, %c0_i32 : i32
    %c0_i32_0 = arith.constant 0 : i32
    %3 = arith.addi %2, %c0_i32_0 : i32
    %c0 = arith.constant 0 : index
    %c0_1 = arith.constant 0 : index
    %4 = arith.index_cast %3 : i32 to index
    %c0_2 = arith.constant 0 : index
    %c0_3 = arith.constant 0 : index
    %5 = vector.load %arg2[%c0, %c0_1, %4, %c0_2, %c0_3] : memref<1x2x7x4x128xbf16, #tpu.memory_space<vmem>>, vector<1x1x1x2x128xbf16>
    %6 = vector.shape_cast %5 : vector<1x1x1x2x128xbf16> to vector<2x128xbf16>
    %c0_4 = arith.constant 0 : index
    %c0_5 = arith.constant 0 : index
    %c0_6 = arith.constant 0 : index
    %7 = vector.load %arg3[%c0_4, %c0_5, %c0_6] : memref<9x128x128xbf16, #tpu.memory_space<vmem>>, vector<1x128x128xbf16>
    %8 = vector.shape_cast %7 : vector<1x128x128xbf16> to vector<128x128xbf16>
    %cst_7 = arith.constant dense<0.000000e+00> : vector<2x128xf32>
    %9 = tpu.matmul %6, %8, %cst_7 {dimension_numbers = #tpu.dot_dimension_numbers<[1], [0], [0], [1], [0, 0, 1, 1], [], []>} : vector<2x128xbf16>, vector<128x128xbf16>, vector<2x128xf32> -> vector<2x128xf32>
    %10 = arith.addf %0, %9 : vector<2x128xf32>
    %c2_i32_8 = arith.constant 2 : i32
    %11 = arith.muli %c2_i32_8, %arg1 : i32
    %c0_i32_9 = arith.constant 0 : i32
    %12 = arith.addi %11, %c0_i32_9 : i32
    %c0_i32_10 = arith.constant 0 : i32
    %13 = arith.addi %12, %c0_i32_10 : i32
    %c0_11 = arith.constant 0 : index
    %c1 = arith.constant 1 : index
    %14 = arith.index_cast %13 : i32 to index
    %c0_12 = arith.constant 0 : index
    %c0_13 = arith.constant 0 : index
    %15 = vector.load %arg2[%c0_11, %c1, %14, %c0_12, %c0_13] : memref<1x2x7x4x128xbf16, #tpu.memory_space<vmem>>, vector<1x1x1x2x128xbf16>
    %16 = vector.shape_cast %15 : vector<1x1x1x2x128xbf16> to vector<2x128xbf16>
    %c1_14 = arith.constant 1 : index
    %c0_15 = arith.constant 0 : index
    %c0_16 = arith.constant 0 : index
    %17 = vector.load %arg3[%c1_14, %c0_15, %c0_16] : memref<9x128x128xbf16, #tpu.memory_space<vmem>>, vector<1x128x128xbf16>
    %18 = vector.shape_cast %17 : vector<1x128x128xbf16> to vector<128x128xbf16>
    %cst_17 = arith.constant dense<0.000000e+00> : vector<2x128xf32>
    %19 = tpu.matmul %16, %18, %cst_17 {dimension_numbers = #tpu.dot_dimension_numbers<[1], [0], [0], [1], [0, 0, 1, 1], [], []>} : vector<2x128xbf16>, vector<128x128xbf16>, vector<2x128xf32> -> vector<2x128xf32>
    %20 = arith.addf %10, %19 : vector<2x128xf32>
    %c2_i32_18 = arith.constant 2 : i32
    %21 = arith.muli %c2_i32_18, %arg1 : i32
    %c0_i32_19 = arith.constant 0 : i32
    %22 = arith.addi %21, %c0_i32_19 : i32
    %c0_i32_20 = arith.constant 0 : i32
    %23 = arith.addi %22, %c0_i32_20 : i32
    %c0_21 = arith.constant 0 : index
    %c0_22 = arith.constant 0 : index
    %24 = arith.index_cast %23 : i32 to index
    %c1_23 = arith.constant 1 : index
    %c0_24 = arith.constant 0 : index
    %25 = vector.load %arg2[%c0_21, %c0_22, %24, %c1_23, %c0_24] : memref<1x2x7x4x128xbf16, #tpu.memory_space<vmem>>, vector<1x1x1x2x128xbf16>
    %26 = vector.shape_cast %25 : vector<1x1x1x2x128xbf16> to vector<2x128xbf16>
    %c2 = arith.constant 2 : index
    %c0_25 = arith.constant 0 : index
    %c0_26 = arith.constant 0 : index
    %27 = vector.load %arg3[%c2, %c0_25, %c0_26] : memref<9x128x128xbf16, #tpu.memory_space<vmem>>, vector<1x128x128xbf16>
    %28 = vector.shape_cast %27 : vector<1x128x128xbf16> to vector<128x128xbf16>
    %cst_27 = arith.constant dense<0.000000e+00> : vector<2x128xf32>
    %29 = tpu.matmul %26, %28, %cst_27 {dimension_numbers = #tpu.dot_dimension_numbers<[1], [0], [0], [1], [0, 0, 1, 1], [], []>} : vector<2x128xbf16>, vector<128x128xbf16>, vector<2x128xf32> -> vector<2x128xf32>
    %30 = arith.addf %20, %29 : vector<2x128xf32>
    %c2_i32_28 = arith.constant 2 : i32
    %31 = arith.muli %c2_i32_28, %arg1 : i32
    %c0_i32_29 = arith.constant 0 : i32
    %32 = arith.addi %31, %c0_i32_29 : i32
    %c1_i32 = arith.constant 1 : i32
    %33 = arith.addi %32, %c1_i32 : i32
    %c0_30 = arith.constant 0 : index
    %c0_31 = arith.constant 0 : index
    %34 = arith.index_cast %33 : i32 to index
    %c0_32 = arith.constant 0 : index
    %c0_33 = arith.constant 0 : index
    %35 = vector.load %arg2[%c0_30, %c0_31, %34, %c0_32, %c0_33] : memref<1x2x7x4x128xbf16, #tpu.memory_space<vmem>>, vector<1x1x1x2x128xbf16>
    %36 = vector.shape_cast %35 : vector<1x1x1x2x128xbf16> to vector<2x128xbf16>
    %c3 = arith.constant 3 : index
    %c0_34 = arith.constant 0 : index
    %c0_35 = arith.constant 0 : index
    %37 = vector.load %arg3[%c3, %c0_34, %c0_35] : memref<9x128x128xbf16, #tpu.memory_space<vmem>>, vector<1x128x128xbf16>
    %38 = vector.shape_cast %37 : vector<1x128x128xbf16> to vector<128x128xbf16>
    %cst_36 = arith.constant dense<0.000000e+00> : vector<2x128xf32>
    %39 = tpu.matmul %36, %38, %cst_36 {dimension_numbers = #tpu.dot_dimension_numbers<[1], [0], [0], [1], [0, 0, 1, 1], [], []>} : vector<2x128xbf16>, vector<128x128xbf16>, vector<2x128xf32> -> vector<2x128xf32>
    %40 = arith.addf %30, %39 : vector<2x128xf32>
    %c2_i32_37 = arith.constant 2 : i32
    %41 = arith.muli %c2_i32_37, %arg1 : i32
    %c0_i32_38 = arith.constant 0 : i32
    %42 = arith.addi %41, %c0_i32_38 : i32
    %c1_i32_39 = arith.constant 1 : i32
    %43 = arith.addi %42, %c1_i32_39 : i32
    %c0_40 = arith.constant 0 : index
    %c1_41 = arith.constant 1 : index
    %44 = arith.index_cast %43 : i32 to index
    %c0_42 = arith.constant 0 : index
    %c0_43 = arith.constant 0 : index
    %45 = vector.load %arg2[%c0_40, %c1_41, %44, %c0_42, %c0_43] : memref<1x2x7x4x128xbf16, #tpu.memory_space<vmem>>, vector<1x1x1x2x128xbf16>
    %46 = vector.shape_cast %45 : vector<1x1x1x2x128xbf16> to vector<2x128xbf16>
    %c4 = arith.constant 4 : index
    %c0_44 = arith.constant 0 : index
    %c0_45 = arith.constant 0 : index
    %47 = vector.load %arg3[%c4, %c0_44, %c0_45] : memref<9x128x128xbf16, #tpu.memory_space<vmem>>, vector<1x128x128xbf16>
    %48 = vector.shape_cast %47 : vector<1x128x128xbf16> to vector<128x128xbf16>
    %cst_46 = arith.constant dense<0.000000e+00> : vector<2x128xf32>
    %49 = tpu.matmul %46, %48, %cst_46 {dimension_numbers = #tpu.dot_dimension_numbers<[1], [0], [0], [1], [0, 0, 1, 1], [], []>} : vector<2x128xbf16>, vector<128x128xbf16>, vector<2x128xf32> -> vector<2x128xf32>
    %50 = arith.addf %40, %49 : vector<2x128xf32>
    %c2_i32_47 = arith.constant 2 : i32
    %51 = arith.muli %c2_i32_47, %arg1 : i32
    %c0_i32_48 = arith.constant 0 : i32
    %52 = arith.addi %51, %c0_i32_48 : i32
    %c1_i32_49 = arith.constant 1 : i32
    %53 = arith.addi %52, %c1_i32_49 : i32
    %c0_50 = arith.constant 0 : index
    %c0_51 = arith.constant 0 : index
    %54 = arith.index_cast %53 : i32 to index
    %c1_52 = arith.constant 1 : index
    %c0_53 = arith.constant 0 : index
    %55 = vector.load %arg2[%c0_50, %c0_51, %54, %c1_52, %c0_53] : memref<1x2x7x4x128xbf16, #tpu.memory_space<vmem>>, vector<1x1x1x2x128xbf16>
    %56 = vector.shape_cast %55 : vector<1x1x1x2x128xbf16> to vector<2x128xbf16>
    %c5 = arith.constant 5 : index
    %c0_54 = arith.constant 0 : index
    %c0_55 = arith.constant 0 : index
    %57 = vector.load %arg3[%c5, %c0_54, %c0_55] : memref<9x128x128xbf16, #tpu.memory_space<vmem>>, vector<1x128x128xbf16>
    %58 = vector.shape_cast %57 : vector<1x128x128xbf16> to vector<128x128xbf16>
    %cst_56 = arith.constant dense<0.000000e+00> : vector<2x128xf32>
    %59 = tpu.matmul %56, %58, %cst_56 {dimension_numbers = #tpu.dot_dimension_numbers<[1], [0], [0], [1], [0, 0, 1, 1], [], []>} : vector<2x128xbf16>, vector<128x128xbf16>, vector<2x128xf32> -> vector<2x128xf32>
    %60 = arith.addf %50, %59 : vector<2x128xf32>
    %c2_i32_57 = arith.constant 2 : i32
    %61 = arith.muli %c2_i32_57, %arg1 : i32
    %c0_i32_58 = arith.constant 0 : i32
    %62 = arith.addi %61, %c0_i32_58 : i32
    %c2_i32_59 = arith.constant 2 : i32
    %63 = arith.addi %62, %c2_i32_59 : i32
    %c0_60 = arith.constant 0 : index
    %c0_61 = arith.constant 0 : index
    %64 = arith.index_cast %63 : i32 to index
    %c0_62 = arith.constant 0 : index
    %c0_63 = arith.constant 0 : index
    %65 = vector.load %arg2[%c0_60, %c0_61, %64, %c0_62, %c0_63] : memref<1x2x7x4x128xbf16, #tpu.memory_space<vmem>>, vector<1x1x1x2x128xbf16>
    %66 = vector.shape_cast %65 : vector<1x1x1x2x128xbf16> to vector<2x128xbf16>
    %c6 = arith.constant 6 : index
    %c0_64 = arith.constant 0 : index
    %c0_65 = arith.constant 0 : index
    %67 = vector.load %arg3[%c6, %c0_64, %c0_65] : memref<9x128x128xbf16, #tpu.memory_space<vmem>>, vector<1x128x128xbf16>
    %68 = vector.shape_cast %67 : vector<1x128x128xbf16> to vector<128x128xbf16>
    %cst_66 = arith.constant dense<0.000000e+00> : vector<2x128xf32>
    %69 = tpu.matmul %66, %68, %cst_66 {dimension_numbers = #tpu.dot_dimension_numbers<[1], [0], [0], [1], [0, 0, 1, 1], [], []>} : vector<2x128xbf16>, vector<128x128xbf16>, vector<2x128xf32> -> vector<2x128xf32>
    %70 = arith.addf %60, %69 : vector<2x128xf32>
    %c2_i32_67 = arith.constant 2 : i32
    %71 = arith.muli %c2_i32_67, %arg1 : i32
    %c0_i32_68 = arith.constant 0 : i32
    %72 = arith.addi %71, %c0_i32_68 : i32
    %c2_i32_69 = arith.constant 2 : i32
    %73 = arith.addi %72, %c2_i32_69 : i32
    %c0_70 = arith.constant 0 : index
    %c1_71 = arith.constant 1 : index
    %74 = arith.index_cast %73 : i32 to index
    %c0_72 = arith.constant 0 : index
    %c0_73 = arith.constant 0 : index
    %75 = vector.load %arg2[%c0_70, %c1_71, %74, %c0_72, %c0_73] : memref<1x2x7x4x128xbf16, #tpu.memory_space<vmem>>, vector<1x1x1x2x128xbf16>
    %76 = vector.shape_cast %75 : vector<1x1x1x2x128xbf16> to vector<2x128xbf16>
    %c7 = arith.constant 7 : index
    %c0_74 = arith.constant 0 : index
    %c0_75 = arith.constant 0 : index
    %77 = vector.load %arg3[%c7, %c0_74, %c0_75] : memref<9x128x128xbf16, #tpu.memory_space<vmem>>, vector<1x128x128xbf16>
    %78 = vector.shape_cast %77 : vector<1x128x128xbf16> to vector<128x128xbf16>
    %cst_76 = arith.constant dense<0.000000e+00> : vector<2x128xf32>
    %79 = tpu.matmul %76, %78, %cst_76 {dimension_numbers = #tpu.dot_dimension_numbers<[1], [0], [0], [1], [0, 0, 1, 1], [], []>} : vector<2x128xbf16>, vector<128x128xbf16>, vector<2x128xf32> -> vector<2x128xf32>
    %80 = arith.addf %70, %79 : vector<2x128xf32>
    %c2_i32_77 = arith.constant 2 : i32
    %81 = arith.muli %c2_i32_77, %arg1 : i32
    %c0_i32_78 = arith.constant 0 : i32
    %82 = arith.addi %81, %c0_i32_78 : i32
    %c2_i32_79 = arith.constant 2 : i32
    %83 = arith.addi %82, %c2_i32_79 : i32
    %c0_80 = arith.constant 0 : index
    %c0_81 = arith.constant 0 : index
    %84 = arith.index_cast %83 : i32 to index
    %c1_82 = arith.constant 1 : index
    %c0_83 = arith.constant 0 : index
    %85 = vector.load %arg2[%c0_80, %c0_81, %84, %c1_82, %c0_83] : memref<1x2x7x4x128xbf16, #tpu.memory_space<vmem>>, vector<1x1x1x2x128xbf16>
    %86 = vector.shape_cast %85 : vector<1x1x1x2x128xbf16> to vector<2x128xbf16>
    %c8 = arith.constant 8 : index
    %c0_84 = arith.constant 0 : index
    %c0_85 = arith.constant 0 : index
    %87 = vector.load %arg3[%c8, %c0_84, %c0_85] : memref<9x128x128xbf16, #tpu.memory_space<vmem>>, vector<1x128x128xbf16>
    %88 = vector.shape_cast %87 : vector<1x128x128xbf16> to vector<128x128xbf16>
    %cst_86 = arith.constant dense<0.000000e+00> : vector<2x128xf32>
    %89 = tpu.matmul %86, %88, %cst_86 {dimension_numbers = #tpu.dot_dimension_numbers<[1], [0], [0], [1], [0, 0, 1, 1], [], []>} : vector<2x128xbf16>, vector<128x128xbf16>, vector<2x128xf32> -> vector<2x128xf32>
    %90 = arith.addf %80, %89 : vector<2x128xf32>
    %cst_87 = arith.constant 0.000000e+00 : f32
    %91 = vector.broadcast %cst_87 : f32 to vector<2x128xf32>
    %c2_i32_88 = arith.constant 2 : i32
    %92 = arith.muli %c2_i32_88, %arg1 : i32
    %c0_i32_89 = arith.constant 0 : i32
    %93 = arith.addi %92, %c0_i32_89 : i32
    %c0_i32_90 = arith.constant 0 : i32
    %94 = arith.addi %93, %c0_i32_90 : i32
    %c0_91 = arith.constant 0 : index
    %c1_92 = arith.constant 1 : index
    %95 = arith.index_cast %94 : i32 to index
    %c0_93 = arith.constant 0 : index
    %c0_94 = arith.constant 0 : index
    %96 = vector.load %arg2[%c0_91, %c1_92, %95, %c0_93, %c0_94] : memref<1x2x7x4x128xbf16, #tpu.memory_space<vmem>>, vector<1x1x1x2x128xbf16>
    %97 = vector.shape_cast %96 : vector<1x1x1x2x128xbf16> to vector<2x128xbf16>
    %c0_95 = arith.constant 0 : index
    %c0_96 = arith.constant 0 : index
    %c0_97 = arith.constant 0 : index
    %98 = vector.load %arg3[%c0_95, %c0_96, %c0_97] : memref<9x128x128xbf16, #tpu.memory_space<vmem>>, vector<1x128x128xbf16>
    %99 = vector.shape_cast %98 : vector<1x128x128xbf16> to vector<128x128xbf16>
    %cst_98 = arith.constant dense<0.000000e+00> : vector<2x128xf32>
    %100 = tpu.matmul %97, %99, %cst_98 {dimension_numbers = #tpu.dot_dimension_numbers<[1], [0], [0], [1], [0, 0, 1, 1], [], []>} : vector<2x128xbf16>, vector<128x128xbf16>, vector<2x128xf32> -> vector<2x128xf32>
    %101 = arith.addf %91, %100 : vector<2x128xf32>
    %c2_i32_99 = arith.constant 2 : i32
    %102 = arith.muli %c2_i32_99, %arg1 : i32
    %c0_i32_100 = arith.constant 0 : i32
    %103 = arith.addi %102, %c0_i32_100 : i32
    %c0_i32_101 = arith.constant 0 : i32
    %104 = arith.addi %103, %c0_i32_101 : i32
    %c0_102 = arith.constant 0 : index
    %c0_103 = arith.constant 0 : index
    %105 = arith.index_cast %104 : i32 to index
    %c1_104 = arith.constant 1 : index
    %c0_105 = arith.constant 0 : index
    %106 = vector.load %arg2[%c0_102, %c0_103, %105, %c1_104, %c0_105] : memref<1x2x7x4x128xbf16, #tpu.memory_space<vmem>>, vector<1x1x1x2x128xbf16>
    %107 = vector.shape_cast %106 : vector<1x1x1x2x128xbf16> to vector<2x128xbf16>
    %c1_106 = arith.constant 1 : index
    %c0_107 = arith.constant 0 : index
    %c0_108 = arith.constant 0 : index
    %108 = vector.load %arg3[%c1_106, %c0_107, %c0_108] : memref<9x128x128xbf16, #tpu.memory_space<vmem>>, vector<1x128x128xbf16>
    %109 = vector.shape_cast %108 : vector<1x128x128xbf16> to vector<128x128xbf16>
    %cst_109 = arith.constant dense<0.000000e+00> : vector<2x128xf32>
    %110 = tpu.matmul %107, %109, %cst_109 {dimension_numbers = #tpu.dot_dimension_numbers<[1], [0], [0], [1], [0, 0, 1, 1], [], []>} : vector<2x128xbf16>, vector<128x128xbf16>, vector<2x128xf32> -> vector<2x128xf32>
    %111 = arith.addf %101, %110 : vector<2x128xf32>
    %c2_i32_110 = arith.constant 2 : i32
    %112 = arith.muli %c2_i32_110, %arg1 : i32
    %c0_i32_111 = arith.constant 0 : i32
    %113 = arith.addi %112, %c0_i32_111 : i32
    %c0_i32_112 = arith.constant 0 : i32
    %114 = arith.addi %113, %c0_i32_112 : i32
    %c0_113 = arith.constant 0 : index
    %c1_114 = arith.constant 1 : index
    %115 = arith.index_cast %114 : i32 to index
    %c1_115 = arith.constant 1 : index
    %c0_116 = arith.constant 0 : index
    %116 = vector.load %arg2[%c0_113, %c1_114, %115, %c1_115, %c0_116] : memref<1x2x7x4x128xbf16, #tpu.memory_space<vmem>>, vector<1x1x1x2x128xbf16>
    %117 = vector.shape_cast %116 : vector<1x1x1x2x128xbf16> to vector<2x128xbf16>
    %c2_117 = arith.constant 2 : index
    %c0_118 = arith.constant 0 : index
    %c0_119 = arith.constant 0 : index
    %118 = vector.load %arg3[%c2_117, %c0_118, %c0_119] : memref<9x128x128xbf16, #tpu.memory_space<vmem>>, vector<1x128x128xbf16>
    %119 = vector.shape_cast %118 : vector<1x128x128xbf16> to vector<128x128xbf16>
    %cst_120 = arith.constant dense<0.000000e+00> : vector<2x128xf32>
    %120 = tpu.matmul %117, %119, %cst_120 {dimension_numbers = #tpu.dot_dimension_numbers<[1], [0], [0], [1], [0, 0, 1, 1], [], []>} : vector<2x128xbf16>, vector<128x128xbf16>, vector<2x128xf32> -> vector<2x128xf32>
    %121 = arith.addf %111, %120 : vector<2x128xf32>
    %c2_i32_121 = arith.constant 2 : i32
    %122 = arith.muli %c2_i32_121, %arg1 : i32
    %c0_i32_122 = arith.constant 0 : i32
    %123 = arith.addi %122, %c0_i32_122 : i32
    %c1_i32_123 = arith.constant 1 : i32
    %124 = arith.addi %123, %c1_i32_123 : i32
    %c0_124 = arith.constant 0 : index
    %c1_125 = arith.constant 1 : index
    %125 = arith.index_cast %124 : i32 to index
    %c0_126 = arith.constant 0 : index
    %c0_127 = arith.constant 0 : index
    %126 = vector.load %arg2[%c0_124, %c1_125, %125, %c0_126, %c0_127] : memref<1x2x7x4x128xbf16, #tpu.memory_space<vmem>>, vector<1x1x1x2x128xbf16>
    %127 = vector.shape_cast %126 : vector<1x1x1x2x128xbf16> to vector<2x128xbf16>
    %c3_128 = arith.constant 3 : index
    %c0_129 = arith.constant 0 : index
    %c0_130 = arith.constant 0 : index
    %128 = vector.load %arg3[%c3_128, %c0_129, %c0_130] : memref<9x128x128xbf16, #tpu.memory_space<vmem>>, vector<1x128x128xbf16>
    %129 = vector.shape_cast %128 : vector<1x128x128xbf16> to vector<128x128xbf16>
    %cst_131 = arith.constant dense<0.000000e+00> : vector<2x128xf32>
    %130 = tpu.matmul %127, %129, %cst_131 {dimension_numbers = #tpu.dot_dimension_numbers<[1], [0], [0], [1], [0, 0, 1, 1], [], []>} : vector<2x128xbf16>, vector<128x128xbf16>, vector<2x128xf32> -> vector<2x128xf32>
    %131 = arith.addf %121, %130 : vector<2x128xf32>
    %c2_i32_132 = arith.constant 2 : i32
    %132 = arith.muli %c2_i32_132, %arg1 : i32
    %c0_i32_133 = arith.constant 0 : i32
    %133 = arith.addi %132, %c0_i32_133 : i32
    %c1_i32_134 = arith.constant 1 : i32
    %134 = arith.addi %133, %c1_i32_134 : i32
    %c0_135 = arith.constant 0 : index
    %c0_136 = arith.constant 0 : index
    %135 = arith.index_cast %134 : i32 to index
    %c1_137 = arith.constant 1 : index
    %c0_138 = arith.constant 0 : index
    %136 = vector.load %arg2[%c0_135, %c0_136, %135, %c1_137, %c0_138] : memref<1x2x7x4x128xbf16, #tpu.memory_space<vmem>>, vector<1x1x1x2x128xbf16>
    %137 = vector.shape_cast %136 : vector<1x1x1x2x128xbf16> to vector<2x128xbf16>
    %c4_139 = arith.constant 4 : index
    %c0_140 = arith.constant 0 : index
    %c0_141 = arith.constant 0 : index
    %138 = vector.load %arg3[%c4_139, %c0_140, %c0_141] : memref<9x128x128xbf16, #tpu.memory_space<vmem>>, vector<1x128x128xbf16>
    %139 = vector.shape_cast %138 : vector<1x128x128xbf16> to vector<128x128xbf16>
    %cst_142 = arith.constant dense<0.000000e+00> : vector<2x128xf32>
    %140 = tpu.matmul %137, %139, %cst_142 {dimension_numbers = #tpu.dot_dimension_numbers<[1], [0], [0], [1], [0, 0, 1, 1], [], []>} : vector<2x128xbf16>, vector<128x128xbf16>, vector<2x128xf32> -> vector<2x128xf32>
    %141 = arith.addf %131, %140 : vector<2x128xf32>
    %c2_i32_143 = arith.constant 2 : i32
    %142 = arith.muli %c2_i32_143, %arg1 : i32
    %c0_i32_144 = arith.constant 0 : i32
    %143 = arith.addi %142, %c0_i32_144 : i32
    %c1_i32_145 = arith.constant 1 : i32
    %144 = arith.addi %143, %c1_i32_145 : i32
    %c0_146 = arith.constant 0 : index
    %c1_147 = arith.constant 1 : index
    %145 = arith.index_cast %144 : i32 to index
    %c1_148 = arith.constant 1 : index
    %c0_149 = arith.constant 0 : index
    %146 = vector.load %arg2[%c0_146, %c1_147, %145, %c1_148, %c0_149] : memref<1x2x7x4x128xbf16, #tpu.memory_space<vmem>>, vector<1x1x1x2x128xbf16>
    %147 = vector.shape_cast %146 : vector<1x1x1x2x128xbf16> to vector<2x128xbf16>
    %c5_150 = arith.constant 5 : index
    %c0_151 = arith.constant 0 : index
    %c0_152 = arith.constant 0 : index
    %148 = vector.load %arg3[%c5_150, %c0_151, %c0_152] : memref<9x128x128xbf16, #tpu.memory_space<vmem>>, vector<1x128x128xbf16>
    %149 = vector.shape_cast %148 : vector<1x128x128xbf16> to vector<128x128xbf16>
    %cst_153 = arith.constant dense<0.000000e+00> : vector<2x128xf32>
    %150 = tpu.matmul %147, %149, %cst_153 {dimension_numbers = #tpu.dot_dimension_numbers<[1], [0], [0], [1], [0, 0, 1, 1], [], []>} : vector<2x128xbf16>, vector<128x128xbf16>, vector<2x128xf32> -> vector<2x128xf32>
    %151 = arith.addf %141, %150 : vector<2x128xf32>
    %c2_i32_154 = arith.constant 2 : i32
    %152 = arith.muli %c2_i32_154, %arg1 : i32
    %c0_i32_155 = arith.constant 0 : i32
    %153 = arith.addi %152, %c0_i32_155 : i32
    %c2_i32_156 = arith.constant 2 : i32
    %154 = arith.addi %153, %c2_i32_156 : i32
    %c0_157 = arith.constant 0 : index
    %c1_158 = arith.constant 1 : index
    %155 = arith.index_cast %154 : i32 to index
    %c0_159 = arith.constant 0 : index
    %c0_160 = arith.constant 0 : index
    %156 = vector.load %arg2[%c0_157, %c1_158, %155, %c0_159, %c0_160] : memref<1x2x7x4x128xbf16, #tpu.memory_space<vmem>>, vector<1x1x1x2x128xbf16>
    %157 = vector.shape_cast %156 : vector<1x1x1x2x128xbf16> to vector<2x128xbf16>
    %c6_161 = arith.constant 6 : index
    %c0_162 = arith.constant 0 : index
    %c0_163 = arith.constant 0 : index
    %158 = vector.load %arg3[%c6_161, %c0_162, %c0_163] : memref<9x128x128xbf16, #tpu.memory_space<vmem>>, vector<1x128x128xbf16>
    %159 = vector.shape_cast %158 : vector<1x128x128xbf16> to vector<128x128xbf16>
    %cst_164 = arith.constant dense<0.000000e+00> : vector<2x128xf32>
    %160 = tpu.matmul %157, %159, %cst_164 {dimension_numbers = #tpu.dot_dimension_numbers<[1], [0], [0], [1], [0, 0, 1, 1], [], []>} : vector<2x128xbf16>, vector<128x128xbf16>, vector<2x128xf32> -> vector<2x128xf32>
    %161 = arith.addf %151, %160 : vector<2x128xf32>
    %c2_i32_165 = arith.constant 2 : i32
    %162 = arith.muli %c2_i32_165, %arg1 : i32
    %c0_i32_166 = arith.constant 0 : i32
    %163 = arith.addi %162, %c0_i32_166 : i32
    %c2_i32_167 = arith.constant 2 : i32
    %164 = arith.addi %163, %c2_i32_167 : i32
    %c0_168 = arith.constant 0 : index
    %c0_169 = arith.constant 0 : index
    %165 = arith.index_cast %164 : i32 to index
    %c1_170 = arith.constant 1 : index
    %c0_171 = arith.constant 0 : index
    %166 = vector.load %arg2[%c0_168, %c0_169, %165, %c1_170, %c0_171] : memref<1x2x7x4x128xbf16, #tpu.memory_space<vmem>>, vector<1x1x1x2x128xbf16>
    %167 = vector.shape_cast %166 : vector<1x1x1x2x128xbf16> to vector<2x128xbf16>
    %c7_172 = arith.constant 7 : index
    %c0_173 = arith.constant 0 : index
    %c0_174 = arith.constant 0 : index
    %168 = vector.load %arg3[%c7_172, %c0_173, %c0_174] : memref<9x128x128xbf16, #tpu.memory_space<vmem>>, vector<1x128x128xbf16>
    %169 = vector.shape_cast %168 : vector<1x128x128xbf16> to vector<128x128xbf16>
    %cst_175 = arith.constant dense<0.000000e+00> : vector<2x128xf32>
    %170 = tpu.matmul %167, %169, %cst_175 {dimension_numbers = #tpu.dot_dimension_numbers<[1], [0], [0], [1], [0, 0, 1, 1], [], []>} : vector<2x128xbf16>, vector<128x128xbf16>, vector<2x128xf32> -> vector<2x128xf32>
    %171 = arith.addf %161, %170 : vector<2x128xf32>
    %c2_i32_176 = arith.constant 2 : i32
    %172 = arith.muli %c2_i32_176, %arg1 : i32
    %c0_i32_177 = arith.constant 0 : i32
    %173 = arith.addi %172, %c0_i32_177 : i32
    %c2_i32_178 = arith.constant 2 : i32
    %174 = arith.addi %173, %c2_i32_178 : i32
    %c0_179 = arith.constant 0 : index
    %c1_180 = arith.constant 1 : index
    %175 = arith.index_cast %174 : i32 to index
    %c1_181 = arith.constant 1 : index
    %c0_182 = arith.constant 0 : index
    %176 = vector.load %arg2[%c0_179, %c1_180, %175, %c1_181, %c0_182] : memref<1x2x7x4x128xbf16, #tpu.memory_space<vmem>>, vector<1x1x1x2x128xbf16>
    %177 = vector.shape_cast %176 : vector<1x1x1x2x128xbf16> to vector<2x128xbf16>
    %c8_183 = arith.constant 8 : index
    %c0_184 = arith.constant 0 : index
    %c0_185 = arith.constant 0 : index
    %178 = vector.load %arg3[%c8_183, %c0_184, %c0_185] : memref<9x128x128xbf16, #tpu.memory_space<vmem>>, vector<1x128x128xbf16>
    %179 = vector.shape_cast %178 : vector<1x128x128xbf16> to vector<128x128xbf16>
    %cst_186 = arith.constant dense<0.000000e+00> : vector<2x128xf32>
    %180 = tpu.matmul %177, %179, %cst_186 {dimension_numbers = #tpu.dot_dimension_numbers<[1], [0], [0], [1], [0, 0, 1, 1], [], []>} : vector<2x128xbf16>, vector<128x128xbf16>, vector<2x128xf32> -> vector<2x128xf32>
    %181 = arith.addf %171, %180 : vector<2x128xf32>
    %182 = arith.maximumf %90, %181 : vector<2x128xf32>
    %cst_187 = arith.constant 0.000000e+00 : f32
    %183 = vector.broadcast %cst_187 : f32 to vector<2x128xf32>
    %c2_i32_188 = arith.constant 2 : i32
    %184 = arith.muli %c2_i32_188, %arg1 : i32
    %c1_i32_189 = arith.constant 1 : i32
    %185 = arith.addi %184, %c1_i32_189 : i32
    %c0_i32_190 = arith.constant 0 : i32
    %186 = arith.addi %185, %c0_i32_190 : i32
    %c0_191 = arith.constant 0 : index
    %c0_192 = arith.constant 0 : index
    %187 = arith.index_cast %186 : i32 to index
    %c0_193 = arith.constant 0 : index
    %c0_194 = arith.constant 0 : index
    %188 = vector.load %arg2[%c0_191, %c0_192, %187, %c0_193, %c0_194] : memref<1x2x7x4x128xbf16, #tpu.memory_space<vmem>>, vector<1x1x1x2x128xbf16>
    %189 = vector.shape_cast %188 : vector<1x1x1x2x128xbf16> to vector<2x128xbf16>
    %c0_195 = arith.constant 0 : index
    %c0_196 = arith.constant 0 : index
    %c0_197 = arith.constant 0 : index
    %190 = vector.load %arg3[%c0_195, %c0_196, %c0_197] : memref<9x128x128xbf16, #tpu.memory_space<vmem>>, vector<1x128x128xbf16>
    %191 = vector.shape_cast %190 : vector<1x128x128xbf16> to vector<128x128xbf16>
    %cst_198 = arith.constant dense<0.000000e+00> : vector<2x128xf32>
    %192 = tpu.matmul %189, %191, %cst_198 {dimension_numbers = #tpu.dot_dimension_numbers<[1], [0], [0], [1], [0, 0, 1, 1], [], []>} : vector<2x128xbf16>, vector<128x128xbf16>, vector<2x128xf32> -> vector<2x128xf32>
    %193 = arith.addf %183, %192 : vector<2x128xf32>
    %c2_i32_199 = arith.constant 2 : i32
    %194 = arith.muli %c2_i32_199, %arg1 : i32
    %c1_i32_200 = arith.constant 1 : i32
    %195 = arith.addi %194, %c1_i32_200 : i32
    %c0_i32_201 = arith.constant 0 : i32
    %196 = arith.addi %195, %c0_i32_201 : i32
    %c0_202 = arith.constant 0 : index
    %c1_203 = arith.constant 1 : index
    %197 = arith.index_cast %196 : i32 to index
    %c0_204 = arith.constant 0 : index
    %c0_205 = arith.constant 0 : index
    %198 = vector.load %arg2[%c0_202, %c1_203, %197, %c0_204, %c0_205] : memref<1x2x7x4x128xbf16, #tpu.memory_space<vmem>>, vector<1x1x1x2x128xbf16>
    %199 = vector.shape_cast %198 : vector<1x1x1x2x128xbf16> to vector<2x128xbf16>
    %c1_206 = arith.constant 1 : index
    %c0_207 = arith.constant 0 : index
    %c0_208 = arith.constant 0 : index
    %200 = vector.load %arg3[%c1_206, %c0_207, %c0_208] : memref<9x128x128xbf16, #tpu.memory_space<vmem>>, vector<1x128x128xbf16>
    %201 = vector.shape_cast %200 : vector<1x128x128xbf16> to vector<128x128xbf16>
    %cst_209 = arith.constant dense<0.000000e+00> : vector<2x128xf32>
    %202 = tpu.matmul %199, %201, %cst_209 {dimension_numbers = #tpu.dot_dimension_numbers<[1], [0], [0], [1], [0, 0, 1, 1], [], []>} : vector<2x128xbf16>, vector<128x128xbf16>, vector<2x128xf32> -> vector<2x128xf32>
    %203 = arith.addf %193, %202 : vector<2x128xf32>
    %c2_i32_210 = arith.constant 2 : i32
    %204 = arith.muli %c2_i32_210, %arg1 : i32
    %c1_i32_211 = arith.constant 1 : i32
    %205 = arith.addi %204, %c1_i32_211 : i32
    %c0_i32_212 = arith.constant 0 : i32
    %206 = arith.addi %205, %c0_i32_212 : i32
    %c0_213 = arith.constant 0 : index
    %c0_214 = arith.constant 0 : index
    %207 = arith.index_cast %206 : i32 to index
    %c1_215 = arith.constant 1 : index
    %c0_216 = arith.constant 0 : index
    %208 = vector.load %arg2[%c0_213, %c0_214, %207, %c1_215, %c0_216] : memref<1x2x7x4x128xbf16, #tpu.memory_space<vmem>>, vector<1x1x1x2x128xbf16>
    %209 = vector.shape_cast %208 : vector<1x1x1x2x128xbf16> to vector<2x128xbf16>
    %c2_217 = arith.constant 2 : index
    %c0_218 = arith.constant 0 : index
    %c0_219 = arith.constant 0 : index
    %210 = vector.load %arg3[%c2_217, %c0_218, %c0_219] : memref<9x128x128xbf16, #tpu.memory_space<vmem>>, vector<1x128x128xbf16>
    %211 = vector.shape_cast %210 : vector<1x128x128xbf16> to vector<128x128xbf16>
    %cst_220 = arith.constant dense<0.000000e+00> : vector<2x128xf32>
    %212 = tpu.matmul %209, %211, %cst_220 {dimension_numbers = #tpu.dot_dimension_numbers<[1], [0], [0], [1], [0, 0, 1, 1], [], []>} : vector<2x128xbf16>, vector<128x128xbf16>, vector<2x128xf32> -> vector<2x128xf32>
    %213 = arith.addf %203, %212 : vector<2x128xf32>
    %c2_i32_221 = arith.constant 2 : i32
    %214 = arith.muli %c2_i32_221, %arg1 : i32
    %c1_i32_222 = arith.constant 1 : i32
    %215 = arith.addi %214, %c1_i32_222 : i32
    %c1_i32_223 = arith.constant 1 : i32
    %216 = arith.addi %215, %c1_i32_223 : i32
    %c0_224 = arith.constant 0 : index
    %c0_225 = arith.constant 0 : index
    %217 = arith.index_cast %216 : i32 to index
    %c0_226 = arith.constant 0 : index
    %c0_227 = arith.constant 0 : index
    %218 = vector.load %arg2[%c0_224, %c0_225, %217, %c0_226, %c0_227] : memref<1x2x7x4x128xbf16, #tpu.memory_space<vmem>>, vector<1x1x1x2x128xbf16>
    %219 = vector.shape_cast %218 : vector<1x1x1x2x128xbf16> to vector<2x128xbf16>
    %c3_228 = arith.constant 3 : index
    %c0_229 = arith.constant 0 : index
    %c0_230 = arith.constant 0 : index
    %220 = vector.load %arg3[%c3_228, %c0_229, %c0_230] : memref<9x128x128xbf16, #tpu.memory_space<vmem>>, vector<1x128x128xbf16>
    %221 = vector.shape_cast %220 : vector<1x128x128xbf16> to vector<128x128xbf16>
    %cst_231 = arith.constant dense<0.000000e+00> : vector<2x128xf32>
    %222 = tpu.matmul %219, %221, %cst_231 {dimension_numbers = #tpu.dot_dimension_numbers<[1], [0], [0], [1], [0, 0, 1, 1], [], []>} : vector<2x128xbf16>, vector<128x128xbf16>, vector<2x128xf32> -> vector<2x128xf32>
    %223 = arith.addf %213, %222 : vector<2x128xf32>
    %c2_i32_232 = arith.constant 2 : i32
    %224 = arith.muli %c2_i32_232, %arg1 : i32
    %c1_i32_233 = arith.constant 1 : i32
    %225 = arith.addi %224, %c1_i32_233 : i32
    %c1_i32_234 = arith.constant 1 : i32
    %226 = arith.addi %225, %c1_i32_234 : i32
    %c0_235 = arith.constant 0 : index
    %c1_236 = arith.constant 1 : index
    %227 = arith.index_cast %226 : i32 to index
    %c0_237 = arith.constant 0 : index
    %c0_238 = arith.constant 0 : index
    %228 = vector.load %arg2[%c0_235, %c1_236, %227, %c0_237, %c0_238] : memref<1x2x7x4x128xbf16, #tpu.memory_space<vmem>>, vector<1x1x1x2x128xbf16>
    %229 = vector.shape_cast %228 : vector<1x1x1x2x128xbf16> to vector<2x128xbf16>
    %c4_239 = arith.constant 4 : index
    %c0_240 = arith.constant 0 : index
    %c0_241 = arith.constant 0 : index
    %230 = vector.load %arg3[%c4_239, %c0_240, %c0_241] : memref<9x128x128xbf16, #tpu.memory_space<vmem>>, vector<1x128x128xbf16>
    %231 = vector.shape_cast %230 : vector<1x128x128xbf16> to vector<128x128xbf16>
    %cst_242 = arith.constant dense<0.000000e+00> : vector<2x128xf32>
    %232 = tpu.matmul %229, %231, %cst_242 {dimension_numbers = #tpu.dot_dimension_numbers<[1], [0], [0], [1], [0, 0, 1, 1], [], []>} : vector<2x128xbf16>, vector<128x128xbf16>, vector<2x128xf32> -> vector<2x128xf32>
    %233 = arith.addf %223, %232 : vector<2x128xf32>
    %c2_i32_243 = arith.constant 2 : i32
    %234 = arith.muli %c2_i32_243, %arg1 : i32
    %c1_i32_244 = arith.constant 1 : i32
    %235 = arith.addi %234, %c1_i32_244 : i32
    %c1_i32_245 = arith.constant 1 : i32
    %236 = arith.addi %235, %c1_i32_245 : i32
    %c0_246 = arith.constant 0 : index
    %c0_247 = arith.constant 0 : index
    %237 = arith.index_cast %236 : i32 to index
    %c1_248 = arith.constant 1 : index
    %c0_249 = arith.constant 0 : index
    %238 = vector.load %arg2[%c0_246, %c0_247, %237, %c1_248, %c0_249] : memref<1x2x7x4x128xbf16, #tpu.memory_space<vmem>>, vector<1x1x1x2x128xbf16>
    %239 = vector.shape_cast %238 : vector<1x1x1x2x128xbf16> to vector<2x128xbf16>
    %c5_250 = arith.constant 5 : index
    %c0_251 = arith.constant 0 : index
    %c0_252 = arith.constant 0 : index
    %240 = vector.load %arg3[%c5_250, %c0_251, %c0_252] : memref<9x128x128xbf16, #tpu.memory_space<vmem>>, vector<1x128x128xbf16>
    %241 = vector.shape_cast %240 : vector<1x128x128xbf16> to vector<128x128xbf16>
    %cst_253 = arith.constant dense<0.000000e+00> : vector<2x128xf32>
    %242 = tpu.matmul %239, %241, %cst_253 {dimension_numbers = #tpu.dot_dimension_numbers<[1], [0], [0], [1], [0, 0, 1, 1], [], []>} : vector<2x128xbf16>, vector<128x128xbf16>, vector<2x128xf32> -> vector<2x128xf32>
    %243 = arith.addf %233, %242 : vector<2x128xf32>
    %c2_i32_254 = arith.constant 2 : i32
    %244 = arith.muli %c2_i32_254, %arg1 : i32
    %c1_i32_255 = arith.constant 1 : i32
    %245 = arith.addi %244, %c1_i32_255 : i32
    %c2_i32_256 = arith.constant 2 : i32
    %246 = arith.addi %245, %c2_i32_256 : i32
    %c0_257 = arith.constant 0 : index
    %c0_258 = arith.constant 0 : index
    %247 = arith.index_cast %246 : i32 to index
    %c0_259 = arith.constant 0 : index
    %c0_260 = arith.constant 0 : index
    %248 = vector.load %arg2[%c0_257, %c0_258, %247, %c0_259, %c0_260] : memref<1x2x7x4x128xbf16, #tpu.memory_space<vmem>>, vector<1x1x1x2x128xbf16>
    %249 = vector.shape_cast %248 : vector<1x1x1x2x128xbf16> to vector<2x128xbf16>
    %c6_261 = arith.constant 6 : index
    %c0_262 = arith.constant 0 : index
    %c0_263 = arith.constant 0 : index
    %250 = vector.load %arg3[%c6_261, %c0_262, %c0_263] : memref<9x128x128xbf16, #tpu.memory_space<vmem>>, vector<1x128x128xbf16>
    %251 = vector.shape_cast %250 : vector<1x128x128xbf16> to vector<128x128xbf16>
    %cst_264 = arith.constant dense<0.000000e+00> : vector<2x128xf32>
    %252 = tpu.matmul %249, %251, %cst_264 {dimension_numbers = #tpu.dot_dimension_numbers<[1], [0], [0], [1], [0, 0, 1, 1], [], []>} : vector<2x128xbf16>, vector<128x128xbf16>, vector<2x128xf32> -> vector<2x128xf32>
    %253 = arith.addf %243, %252 : vector<2x128xf32>
    %c2_i32_265 = arith.constant 2 : i32
    %254 = arith.muli %c2_i32_265, %arg1 : i32
    %c1_i32_266 = arith.constant 1 : i32
    %255 = arith.addi %254, %c1_i32_266 : i32
    %c2_i32_267 = arith.constant 2 : i32
    %256 = arith.addi %255, %c2_i32_267 : i32
    %c0_268 = arith.constant 0 : index
    %c1_269 = arith.constant 1 : index
    %257 = arith.index_cast %256 : i32 to index
    %c0_270 = arith.constant 0 : index
    %c0_271 = arith.constant 0 : index
    %258 = vector.load %arg2[%c0_268, %c1_269, %257, %c0_270, %c0_271] : memref<1x2x7x4x128xbf16, #tpu.memory_space<vmem>>, vector<1x1x1x2x128xbf16>
    %259 = vector.shape_cast %258 : vector<1x1x1x2x128xbf16> to vector<2x128xbf16>
    %c7_272 = arith.constant 7 : index
    %c0_273 = arith.constant 0 : index
    %c0_274 = arith.constant 0 : index
    %260 = vector.load %arg3[%c7_272, %c0_273, %c0_274] : memref<9x128x128xbf16, #tpu.memory_space<vmem>>, vector<1x128x128xbf16>
    %261 = vector.shape_cast %260 : vector<1x128x128xbf16> to vector<128x128xbf16>
    %cst_275 = arith.constant dense<0.000000e+00> : vector<2x128xf32>
    %262 = tpu.matmul %259, %261, %cst_275 {dimension_numbers = #tpu.dot_dimension_numbers<[1], [0], [0], [1], [0, 0, 1, 1], [], []>} : vector<2x128xbf16>, vector<128x128xbf16>, vector<2x128xf32> -> vector<2x128xf32>
    %263 = arith.addf %253, %262 : vector<2x128xf32>
    %c2_i32_276 = arith.constant 2 : i32
    %264 = arith.muli %c2_i32_276, %arg1 : i32
    %c1_i32_277 = arith.constant 1 : i32
    %265 = arith.addi %264, %c1_i32_277 : i32
    %c2_i32_278 = arith.constant 2 : i32
    %266 = arith.addi %265, %c2_i32_278 : i32
    %c0_279 = arith.constant 0 : index
    %c0_280 = arith.constant 0 : index
    %267 = arith.index_cast %266 : i32 to index
    %c1_281 = arith.constant 1 : index
    %c0_282 = arith.constant 0 : index
    %268 = vector.load %arg2[%c0_279, %c0_280, %267, %c1_281, %c0_282] : memref<1x2x7x4x128xbf16, #tpu.memory_space<vmem>>, vector<1x1x1x2x128xbf16>
    %269 = vector.shape_cast %268 : vector<1x1x1x2x128xbf16> to vector<2x128xbf16>
    %c8_283 = arith.constant 8 : index
    %c0_284 = arith.constant 0 : index
    %c0_285 = arith.constant 0 : index
    %270 = vector.load %arg3[%c8_283, %c0_284, %c0_285] : memref<9x128x128xbf16, #tpu.memory_space<vmem>>, vector<1x128x128xbf16>
    %271 = vector.shape_cast %270 : vector<1x128x128xbf16> to vector<128x128xbf16>
    %cst_286 = arith.constant dense<0.000000e+00> : vector<2x128xf32>
    %272 = tpu.matmul %269, %271, %cst_286 {dimension_numbers = #tpu.dot_dimension_numbers<[1], [0], [0], [1], [0, 0, 1, 1], [], []>} : vector<2x128xbf16>, vector<128x128xbf16>, vector<2x128xf32> -> vector<2x128xf32>
    %273 = arith.addf %263, %272 : vector<2x128xf32>
    %274 = arith.maximumf %182, %273 : vector<2x128xf32>
    %cst_287 = arith.constant 0.000000e+00 : f32
    %275 = vector.broadcast %cst_287 : f32 to vector<2x128xf32>
    %c2_i32_288 = arith.constant 2 : i32
    %276 = arith.muli %c2_i32_288, %arg1 : i32
    %c1_i32_289 = arith.constant 1 : i32
    %277 = arith.addi %276, %c1_i32_289 : i32
    %c0_i32_290 = arith.constant 0 : i32
    %278 = arith.addi %277, %c0_i32_290 : i32
    %c0_291 = arith.constant 0 : index
    %c1_292 = arith.constant 1 : index
    %279 = arith.index_cast %278 : i32 to index
    %c0_293 = arith.constant 0 : index
    %c0_294 = arith.constant 0 : index
    %280 = vector.load %arg2[%c0_291, %c1_292, %279, %c0_293, %c0_294] : memref<1x2x7x4x128xbf16, #tpu.memory_space<vmem>>, vector<1x1x1x2x128xbf16>
    %281 = vector.shape_cast %280 : vector<1x1x1x2x128xbf16> to vector<2x128xbf16>
    %c0_295 = arith.constant 0 : index
    %c0_296 = arith.constant 0 : index
    %c0_297 = arith.constant 0 : index
    %282 = vector.load %arg3[%c0_295, %c0_296, %c0_297] : memref<9x128x128xbf16, #tpu.memory_space<vmem>>, vector<1x128x128xbf16>
    %283 = vector.shape_cast %282 : vector<1x128x128xbf16> to vector<128x128xbf16>
    %cst_298 = arith.constant dense<0.000000e+00> : vector<2x128xf32>
    %284 = tpu.matmul %281, %283, %cst_298 {dimension_numbers = #tpu.dot_dimension_numbers<[1], [0], [0], [1], [0, 0, 1, 1], [], []>} : vector<2x128xbf16>, vector<128x128xbf16>, vector<2x128xf32> -> vector<2x128xf32>
    %285 = arith.addf %275, %284 : vector<2x128xf32>
    %c2_i32_299 = arith.constant 2 : i32
    %286 = arith.muli %c2_i32_299, %arg1 : i32
    %c1_i32_300 = arith.constant 1 : i32
    %287 = arith.addi %286, %c1_i32_300 : i32
    %c0_i32_301 = arith.constant 0 : i32
    %288 = arith.addi %287, %c0_i32_301 : i32
    %c0_302 = arith.constant 0 : index
    %c0_303 = arith.constant 0 : index
    %289 = arith.index_cast %288 : i32 to index
    %c1_304 = arith.constant 1 : index
    %c0_305 = arith.constant 0 : index
    %290 = vector.load %arg2[%c0_302, %c0_303, %289, %c1_304, %c0_305] : memref<1x2x7x4x128xbf16, #tpu.memory_space<vmem>>, vector<1x1x1x2x128xbf16>
    %291 = vector.shape_cast %290 : vector<1x1x1x2x128xbf16> to vector<2x128xbf16>
    %c1_306 = arith.constant 1 : index
    %c0_307 = arith.constant 0 : index
    %c0_308 = arith.constant 0 : index
    %292 = vector.load %arg3[%c1_306, %c0_307, %c0_308] : memref<9x128x128xbf16, #tpu.memory_space<vmem>>, vector<1x128x128xbf16>
    %293 = vector.shape_cast %292 : vector<1x128x128xbf16> to vector<128x128xbf16>
    %cst_309 = arith.constant dense<0.000000e+00> : vector<2x128xf32>
    %294 = tpu.matmul %291, %293, %cst_309 {dimension_numbers = #tpu.dot_dimension_numbers<[1], [0], [0], [1], [0, 0, 1, 1], [], []>} : vector<2x128xbf16>, vector<128x128xbf16>, vector<2x128xf32> -> vector<2x128xf32>
    %295 = arith.addf %285, %294 : vector<2x128xf32>
    %c2_i32_310 = arith.constant 2 : i32
    %296 = arith.muli %c2_i32_310, %arg1 : i32
    %c1_i32_311 = arith.constant 1 : i32
    %297 = arith.addi %296, %c1_i32_311 : i32
    %c0_i32_312 = arith.constant 0 : i32
    %298 = arith.addi %297, %c0_i32_312 : i32
    %c0_313 = arith.constant 0 : index
    %c1_314 = arith.constant 1 : index
    %299 = arith.index_cast %298 : i32 to index
    %c1_315 = arith.constant 1 : index
    %c0_316 = arith.constant 0 : index
    %300 = vector.load %arg2[%c0_313, %c1_314, %299, %c1_315, %c0_316] : memref<1x2x7x4x128xbf16, #tpu.memory_space<vmem>>, vector<1x1x1x2x128xbf16>
    %301 = vector.shape_cast %300 : vector<1x1x1x2x128xbf16> to vector<2x128xbf16>
    %c2_317 = arith.constant 2 : index
    %c0_318 = arith.constant 0 : index
    %c0_319 = arith.constant 0 : index
    %302 = vector.load %arg3[%c2_317, %c0_318, %c0_319] : memref<9x128x128xbf16, #tpu.memory_space<vmem>>, vector<1x128x128xbf16>
    %303 = vector.shape_cast %302 : vector<1x128x128xbf16> to vector<128x128xbf16>
    %cst_320 = arith.constant dense<0.000000e+00> : vector<2x128xf32>
    %304 = tpu.matmul %301, %303, %cst_320 {dimension_numbers = #tpu.dot_dimension_numbers<[1], [0], [0], [1], [0, 0, 1, 1], [], []>} : vector<2x128xbf16>, vector<128x128xbf16>, vector<2x128xf32> -> vector<2x128xf32>
    %305 = arith.addf %295, %304 : vector<2x128xf32>
    %c2_i32_321 = arith.constant 2 : i32
    %306 = arith.muli %c2_i32_321, %arg1 : i32
    %c1_i32_322 = arith.constant 1 : i32
    %307 = arith.addi %306, %c1_i32_322 : i32
    %c1_i32_323 = arith.constant 1 : i32
    %308 = arith.addi %307, %c1_i32_323 : i32
    %c0_324 = arith.constant 0 : index
    %c1_325 = arith.constant 1 : index
    %309 = arith.index_cast %308 : i32 to index
    %c0_326 = arith.constant 0 : index
    %c0_327 = arith.constant 0 : index
    %310 = vector.load %arg2[%c0_324, %c1_325, %309, %c0_326, %c0_327] : memref<1x2x7x4x128xbf16, #tpu.memory_space<vmem>>, vector<1x1x1x2x128xbf16>
    %311 = vector.shape_cast %310 : vector<1x1x1x2x128xbf16> to vector<2x128xbf16>
    %c3_328 = arith.constant 3 : index
    %c0_329 = arith.constant 0 : index
    %c0_330 = arith.constant 0 : index
    %312 = vector.load %arg3[%c3_328, %c0_329, %c0_330] : memref<9x128x128xbf16, #tpu.memory_space<vmem>>, vector<1x128x128xbf16>
    %313 = vector.shape_cast %312 : vector<1x128x128xbf16> to vector<128x128xbf16>
    %cst_331 = arith.constant dense<0.000000e+00> : vector<2x128xf32>
    %314 = tpu.matmul %311, %313, %cst_331 {dimension_numbers = #tpu.dot_dimension_numbers<[1], [0], [0], [1], [0, 0, 1, 1], [], []>} : vector<2x128xbf16>, vector<128x128xbf16>, vector<2x128xf32> -> vector<2x128xf32>
    %315 = arith.addf %305, %314 : vector<2x128xf32>
    %c2_i32_332 = arith.constant 2 : i32
    %316 = arith.muli %c2_i32_332, %arg1 : i32
    %c1_i32_333 = arith.constant 1 : i32
    %317 = arith.addi %316, %c1_i32_333 : i32
    %c1_i32_334 = arith.constant 1 : i32
    %318 = arith.addi %317, %c1_i32_334 : i32
    %c0_335 = arith.constant 0 : index
    %c0_336 = arith.constant 0 : index
    %319 = arith.index_cast %318 : i32 to index
    %c1_337 = arith.constant 1 : index
    %c0_338 = arith.constant 0 : index
    %320 = vector.load %arg2[%c0_335, %c0_336, %319, %c1_337, %c0_338] : memref<1x2x7x4x128xbf16, #tpu.memory_space<vmem>>, vector<1x1x1x2x128xbf16>
    %321 = vector.shape_cast %320 : vector<1x1x1x2x128xbf16> to vector<2x128xbf16>
    %c4_339 = arith.constant 4 : index
    %c0_340 = arith.constant 0 : index
    %c0_341 = arith.constant 0 : index
    %322 = vector.load %arg3[%c4_339, %c0_340, %c0_341] : memref<9x128x128xbf16, #tpu.memory_space<vmem>>, vector<1x128x128xbf16>
    %323 = vector.shape_cast %322 : vector<1x128x128xbf16> to vector<128x128xbf16>
    %cst_342 = arith.constant dense<0.000000e+00> : vector<2x128xf32>
    %324 = tpu.matmul %321, %323, %cst_342 {dimension_numbers = #tpu.dot_dimension_numbers<[1], [0], [0], [1], [0, 0, 1, 1], [], []>} : vector<2x128xbf16>, vector<128x128xbf16>, vector<2x128xf32> -> vector<2x128xf32>
    %325 = arith.addf %315, %324 : vector<2x128xf32>
    %c2_i32_343 = arith.constant 2 : i32
    %326 = arith.muli %c2_i32_343, %arg1 : i32
    %c1_i32_344 = arith.constant 1 : i32
    %327 = arith.addi %326, %c1_i32_344 : i32
    %c1_i32_345 = arith.constant 1 : i32
    %328 = arith.addi %327, %c1_i32_345 : i32
    %c0_346 = arith.constant 0 : index
    %c1_347 = arith.constant 1 : index
    %329 = arith.index_cast %328 : i32 to index
    %c1_348 = arith.constant 1 : index
    %c0_349 = arith.constant 0 : index
    %330 = vector.load %arg2[%c0_346, %c1_347, %329, %c1_348, %c0_349] : memref<1x2x7x4x128xbf16, #tpu.memory_space<vmem>>, vector<1x1x1x2x128xbf16>
    %331 = vector.shape_cast %330 : vector<1x1x1x2x128xbf16> to vector<2x128xbf16>
    %c5_350 = arith.constant 5 : index
    %c0_351 = arith.constant 0 : index
    %c0_352 = arith.constant 0 : index
    %332 = vector.load %arg3[%c5_350, %c0_351, %c0_352] : memref<9x128x128xbf16, #tpu.memory_space<vmem>>, vector<1x128x128xbf16>
    %333 = vector.shape_cast %332 : vector<1x128x128xbf16> to vector<128x128xbf16>
    %cst_353 = arith.constant dense<0.000000e+00> : vector<2x128xf32>
    %334 = tpu.matmul %331, %333, %cst_353 {dimension_numbers = #tpu.dot_dimension_numbers<[1], [0], [0], [1], [0, 0, 1, 1], [], []>} : vector<2x128xbf16>, vector<128x128xbf16>, vector<2x128xf32> -> vector<2x128xf32>
    %335 = arith.addf %325, %334 : vector<2x128xf32>
    %c2_i32_354 = arith.constant 2 : i32
    %336 = arith.muli %c2_i32_354, %arg1 : i32
    %c1_i32_355 = arith.constant 1 : i32
    %337 = arith.addi %336, %c1_i32_355 : i32
    %c2_i32_356 = arith.constant 2 : i32
    %338 = arith.addi %337, %c2_i32_356 : i32
    %c0_357 = arith.constant 0 : index
    %c1_358 = arith.constant 1 : index
    %339 = arith.index_cast %338 : i32 to index
    %c0_359 = arith.constant 0 : index
    %c0_360 = arith.constant 0 : index
    %340 = vector.load %arg2[%c0_357, %c1_358, %339, %c0_359, %c0_360] : memref<1x2x7x4x128xbf16, #tpu.memory_space<vmem>>, vector<1x1x1x2x128xbf16>
    %341 = vector.shape_cast %340 : vector<1x1x1x2x128xbf16> to vector<2x128xbf16>
    %c6_361 = arith.constant 6 : index
    %c0_362 = arith.constant 0 : index
    %c0_363 = arith.constant 0 : index
    %342 = vector.load %arg3[%c6_361, %c0_362, %c0_363] : memref<9x128x128xbf16, #tpu.memory_space<vmem>>, vector<1x128x128xbf16>
    %343 = vector.shape_cast %342 : vector<1x128x128xbf16> to vector<128x128xbf16>
    %cst_364 = arith.constant dense<0.000000e+00> : vector<2x128xf32>
    %344 = tpu.matmul %341, %343, %cst_364 {dimension_numbers = #tpu.dot_dimension_numbers<[1], [0], [0], [1], [0, 0, 1, 1], [], []>} : vector<2x128xbf16>, vector<128x128xbf16>, vector<2x128xf32> -> vector<2x128xf32>
    %345 = arith.addf %335, %344 : vector<2x128xf32>
    %c2_i32_365 = arith.constant 2 : i32
    %346 = arith.muli %c2_i32_365, %arg1 : i32
    %c1_i32_366 = arith.constant 1 : i32
    %347 = arith.addi %346, %c1_i32_366 : i32
    %c2_i32_367 = arith.constant 2 : i32
    %348 = arith.addi %347, %c2_i32_367 : i32
    %c0_368 = arith.constant 0 : index
    %c0_369 = arith.constant 0 : index
    %349 = arith.index_cast %348 : i32 to index
    %c1_370 = arith.constant 1 : index
    %c0_371 = arith.constant 0 : index
    %350 = vector.load %arg2[%c0_368, %c0_369, %349, %c1_370, %c0_371] : memref<1x2x7x4x128xbf16, #tpu.memory_space<vmem>>, vector<1x1x1x2x128xbf16>
    %351 = vector.shape_cast %350 : vector<1x1x1x2x128xbf16> to vector<2x128xbf16>
    %c7_372 = arith.constant 7 : index
    %c0_373 = arith.constant 0 : index
    %c0_374 = arith.constant 0 : index
    %352 = vector.load %arg3[%c7_372, %c0_373, %c0_374] : memref<9x128x128xbf16, #tpu.memory_space<vmem>>, vector<1x128x128xbf16>
    %353 = vector.shape_cast %352 : vector<1x128x128xbf16> to vector<128x128xbf16>
    %cst_375 = arith.constant dense<0.000000e+00> : vector<2x128xf32>
    %354 = tpu.matmul %351, %353, %cst_375 {dimension_numbers = #tpu.dot_dimension_numbers<[1], [0], [0], [1], [0, 0, 1, 1], [], []>} : vector<2x128xbf16>, vector<128x128xbf16>, vector<2x128xf32> -> vector<2x128xf32>
    %355 = arith.addf %345, %354 : vector<2x128xf32>
    %c2_i32_376 = arith.constant 2 : i32
    %356 = arith.muli %c2_i32_376, %arg1 : i32
    %c1_i32_377 = arith.constant 1 : i32
    %357 = arith.addi %356, %c1_i32_377 : i32
    %c2_i32_378 = arith.constant 2 : i32
    %358 = arith.addi %357, %c2_i32_378 : i32
    %c0_379 = arith.constant 0 : index
    %c1_380 = arith.constant 1 : index
    %359 = arith.index_cast %358 : i32 to index
    %c1_381 = arith.constant 1 : index
    %c0_382 = arith.constant 0 : index
    %360 = vector.load %arg2[%c0_379, %c1_380, %359, %c1_381, %c0_382] : memref<1x2x7x4x128xbf16, #tpu.memory_space<vmem>>, vector<1x1x1x2x128xbf16>
    %361 = vector.shape_cast %360 : vector<1x1x1x2x128xbf16> to vector<2x128xbf16>
    %c8_383 = arith.constant 8 : index
    %c0_384 = arith.constant 0 : index
    %c0_385 = arith.constant 0 : index
    %362 = vector.load %arg3[%c8_383, %c0_384, %c0_385] : memref<9x128x128xbf16, #tpu.memory_space<vmem>>, vector<1x128x128xbf16>
    %363 = vector.shape_cast %362 : vector<1x128x128xbf16> to vector<128x128xbf16>
    %cst_386 = arith.constant dense<0.000000e+00> : vector<2x128xf32>
    %364 = tpu.matmul %361, %363, %cst_386 {dimension_numbers = #tpu.dot_dimension_numbers<[1], [0], [0], [1], [0, 0, 1, 1], [], []>} : vector<2x128xbf16>, vector<128x128xbf16>, vector<2x128xf32> -> vector<2x128xf32>
    %365 = arith.addf %355, %364 : vector<2x128xf32>
    %366 = arith.maximumf %274, %365 : vector<2x128xf32>
    %c0_387 = arith.constant 0 : index
    %c0_388 = arith.constant 0 : index
    %367 = vector.load %arg4[%c0_387, %c0_388] : memref<1x128xf32, #tpu.memory_space<vmem>>, vector<1x128xf32>
    %368 = vector.broadcast %367 : vector<1x128xf32> to vector<2x128xf32>
    %369 = arith.addf %366, %368 : vector<2x128xf32>
    %cst_389 = arith.constant 0.000000e+00 : f32
    %370 = vector.broadcast %cst_389 : f32 to vector<2x128xf32>
    %371 = arith.maximumf %369, %370 : vector<2x128xf32>
    %372 = arith.truncf %371 : vector<2x128xf32> to vector<2x128xbf16>
    %c0_390 = arith.constant 0 : index
    %c0_391 = arith.constant 0 : index
    %c0_392 = arith.constant 0 : index
    %c0_393 = arith.constant 0 : index
    %373 = vector.load %arg5[%c0_390, %c0_391, %c0_392, %c0_393] : memref<1x1x2x128xbf16, #tpu.memory_space<vmem>>, vector<1x1x2x128xbf16>
    %374 = vector.shape_cast %373 : vector<1x1x2x128xbf16> to vector<2x128xbf16>
    %375 = vector.shape_cast %372 : vector<2x128xbf16> to vector<1x1x2x128xbf16>
    tpu.vector_store %arg5[%c0_390, %c0_391, %c0_392, %c0_393], %375 {strides = array<i32>} : memref<1x1x2x128xbf16, #tpu.memory_space<vmem>>, vector<1x1x2x128xbf16>,
    return
  }
  func.func @transform_0(%arg0: i32, %arg1: i32) -> (i32, i32, i32, i32, i32) {
    %c0_i32 = arith.constant 0 : i32
    %c0_i32_0 = arith.constant 0 : i32
    %c0_i32_1 = arith.constant 0 : i32
    %c0_i32_2 = arith.constant 0 : i32
    %c0_i32_3 = arith.constant 0 : i32
    return %arg0, %c0_i32, %c0_i32_0, %c0_i32_1, %c0_i32_2 : i32, i32, i32, i32, i32
  }
  func.func @transform_1(%arg0: i32, %arg1: i32) -> (i32, i32, i32) {
    %c0_i32 = arith.constant 0 : i32
    %c0_i32_0 = arith.constant 0 : i32
    %c0_i32_1 = arith.constant 0 : i32
    %c0_i32_2 = arith.constant 0 : i32
    return %c0_i32, %c0_i32_0, %c0_i32_1 : i32, i32, i32
  }
  func.func @transform_2(%arg0: i32, %arg1: i32) -> (i32, i32) {
    %c0_i32 = arith.constant 0 : i32
    %c0_i32_0 = arith.constant 0 : i32
    %c0_i32_1 = arith.constant 0 : i32
    return %c0_i32, %c0_i32_0 : i32, i32
  }
  func.func @transform_3(%arg0: i32, %arg1: i32) -> (i32, i32, i32, i32) {
    %c0_i32 = arith.constant 0 : i32
    %c0_i32_0 = arith.constant 0 : i32
    %c0_i32_1 = arith.constant 0 : i32
    return %arg0, %arg1, %c0_i32, %c0_i32_0 : i32, i32, i32, i32
  }
}

module attributes {stable_mosaic.version = 11 : i64} {
  func.func @_fc_fused_kernel(%arg0: memref<2x512xbf16, #tpu.memory_space<vmem>>, %arg1: memref<512x256xbf16, #tpu.memory_space<vmem>>, %arg2: memref<1x256xf32, #tpu.memory_space<vmem>>, %arg3: memref<256x128xbf16, #tpu.memory_space<vmem>>, %arg4: memref<1x128xf32, #tpu.memory_space<vmem>>, %arg5: memref<128x128xbf16, #tpu.memory_space<vmem>>, %arg6: memref<1x128xf32, #tpu.memory_space<vmem>>, %arg7: memref<2x128xf32, #tpu.memory_space<vmem>>) attributes {dimension_semantics = [], scalar_prefetch = 0 : i64, scratch_operands = 0 : i64, tpu.core_type = #tpu.core_type<tc>} {
    %c0 = arith.constant 0 : index
    %c0_0 = arith.constant 0 : index
    %0 = vector.load %arg0[%c0, %c0_0] : memref<2x512xbf16, #tpu.memory_space<vmem>>, vector<2x512xbf16>
    %c0_1 = arith.constant 0 : index
    %c0_2 = arith.constant 0 : index
    %1 = vector.load %arg1[%c0_1, %c0_2] : memref<512x256xbf16, #tpu.memory_space<vmem>>, vector<512x256xbf16>
    %cst = arith.constant dense<0.000000e+00> : vector<2x256xf32>
    %2 = tpu.matmul %0, %1, %cst {dimension_numbers = #tpu.dot_dimension_numbers<[1], [0], [0], [1], [0, 0, 1, 1], [], []>} : vector<2x512xbf16>, vector<512x256xbf16>, vector<2x256xf32> -> vector<2x256xf32>
    %c0_3 = arith.constant 0 : index
    %c0_4 = arith.constant 0 : index
    %3 = vector.load %arg2[%c0_3, %c0_4] : memref<1x256xf32, #tpu.memory_space<vmem>>, vector<1x256xf32>
    %4 = vector.broadcast %3 : vector<1x256xf32> to vector<2x256xf32>
    %5 = arith.addf %2, %4 : vector<2x256xf32>
    %cst_5 = arith.constant 0.000000e+00 : f32
    %6 = vector.broadcast %cst_5 : f32 to vector<2x256xf32>
    %7 = arith.maximumf %5, %6 : vector<2x256xf32>
    %8 = arith.truncf %7 : vector<2x256xf32> to vector<2x256xbf16>
    %c0_6 = arith.constant 0 : index
    %c0_7 = arith.constant 0 : index
    %9 = vector.load %arg3[%c0_6, %c0_7] : memref<256x128xbf16, #tpu.memory_space<vmem>>, vector<256x128xbf16>
    %cst_8 = arith.constant dense<0.000000e+00> : vector<2x128xf32>
    %10 = tpu.matmul %8, %9, %cst_8 {dimension_numbers = #tpu.dot_dimension_numbers<[1], [0], [0], [1], [0, 0, 1, 1], [], []>} : vector<2x256xbf16>, vector<256x128xbf16>, vector<2x128xf32> -> vector<2x128xf32>
    %c0_9 = arith.constant 0 : index
    %c0_10 = arith.constant 0 : index
    %11 = vector.load %arg4[%c0_9, %c0_10] : memref<1x128xf32, #tpu.memory_space<vmem>>, vector<1x128xf32>
    %12 = vector.broadcast %11 : vector<1x128xf32> to vector<2x128xf32>
    %13 = arith.addf %10, %12 : vector<2x128xf32>
    %cst_11 = arith.constant 0.000000e+00 : f32
    %14 = vector.broadcast %cst_11 : f32 to vector<2x128xf32>
    %15 = arith.maximumf %13, %14 : vector<2x128xf32>
    %16 = arith.truncf %15 : vector<2x128xf32> to vector<2x128xbf16>
    %c0_12 = arith.constant 0 : index
    %c0_13 = arith.constant 0 : index
    %17 = vector.load %arg5[%c0_12, %c0_13] : memref<128x128xbf16, #tpu.memory_space<vmem>>, vector<128x128xbf16>
    %cst_14 = arith.constant dense<0.000000e+00> : vector<2x128xf32>
    %18 = tpu.matmul %16, %17, %cst_14 {dimension_numbers = #tpu.dot_dimension_numbers<[1], [0], [0], [1], [0, 0, 1, 1], [], []>} : vector<2x128xbf16>, vector<128x128xbf16>, vector<2x128xf32> -> vector<2x128xf32>
    %c0_15 = arith.constant 0 : index
    %c0_16 = arith.constant 0 : index
    %19 = vector.load %arg6[%c0_15, %c0_16] : memref<1x128xf32, #tpu.memory_space<vmem>>, vector<1x128xf32>
    %20 = vector.broadcast %19 : vector<1x128xf32> to vector<2x128xf32>
    %21 = arith.addf %18, %20 : vector<2x128xf32>
    %c0_17 = arith.constant 0 : index
    %c0_18 = arith.constant 0 : index
    %22 = vector.load %arg7[%c0_17, %c0_18] : memref<2x128xf32, #tpu.memory_space<vmem>>, vector<2x128xf32>
    tpu.vector_store %arg7[%c0_17, %c0_18], %21 {strides = array<i32>} : memref<2x128xf32, #tpu.memory_space<vmem>>, vector<2x128xf32>,
    return
  }
}

</mosaic_0001>

<bundles_post_ra>
// kernel: forward.5
= control target key start
LH: loop header
LB: loop body
LE: loop exit
PB: predicated region body
PF: predicated region fallthrough
CT: control target
= control target key end

     0   :  { %v95_v9 = vlaneseq  ;;  %v1139_v10 = vmov 1966171168   ;;  %s1495_s0 = inlined_call_operand.vmem [shape: bf16[2,512], index: 0, kind: input, shape index: {}]   ;;  %s1496_s1 = inlined_call_operand.vmem [shape: bf16[512,256], index: 1, kind: input, shape index: {}]   ;;  %s1497_s2 = inlined_call_operand.vmem [shape: f32[1,256], index: 2, kind: input, shape index: {}]   ;;  %s1498_s3 = inlined_call_operand.vmem [shape: bf16[256,128], index: 3, kind: input, shape index: {}]   ;;  %s1499_s4 = inlined_call_operand.vmem [shape: f32[1,128], index: 4, kind: input, shape index: {}]   ;;  %s1500_s5 = inlined_call_operand.vmem [shape: bf16[128,128], index: 5, kind: input, shape index: {}]   ;;  %s1501_s6 = inlined_call_operand.vmem [shape: f32[1,128], index: 6, kind: input, shape index: {}]   ;;  %s1502_s7 = inlined_call_operand.hbm [shape: f32[2,128], index: 7, kind: output, shape index: {}]  }
   0x1   :  { %v995_v0 = vld [vmem:[%s1496_s1 + $0x4] ss:$8 sps:$4 sm:$0xff]   ;;  %v997_v1 = vld [vmem:[%s1496_s1] ss:$8 sps:$4 sm:$0xff]   ;;  %v998_v2 = vld [vmem:[%s1496_s1 + $0x14] ss:$8 sps:$4 sm:$0xff]   ;;  %v115_v11 = vunpack.c.l.s4 %v1139_v10 }
   0x2   :  { %454 = vmatprep.subr.bf16.mxu0 %v995_v0  ;;  %v1000_v3 = vld [vmem:[%s1496_s1 + $0x10] ss:$8 sps:$4 sm:$0xff]   ;;  %v1001_v4 = vld [vmem:[%s1496_s1 + $0x24] ss:$8 sps:$4 sm:$0xff]   ;;  %v1003_v5 = vld [vmem:[%s1496_s1 + $0x20] ss:$8 sps:$4 sm:$0xff]  }
   0x3   :  { %455 = vmatpush1.bf16.msra.mxu0 %v997_v1  ;;  %v1004_v6 = vld [vmem:[%s1496_s1 + $0x34] ss:$8 sps:$4 sm:$0xff]   ;;  %v1006_v7 = vld [vmem:[%s1496_s1 + $0x30] ss:$8 sps:$4 sm:$0xff]   ;;  %v1007_v8 = vld [vmem:[%s1496_s1 + $0x44] ss:$8 sps:$4 sm:$0xff]   ;;  %v116_v15 = vunpack.c.0.s8 %v115_v11 }
   0x4   :  { %456 = vmatprep.subr.bf16.mxu0 %v998_v2  ;;  %v1009_v12 = vld [vmem:[%s1496_s1 + $0x40] ss:$8 sps:$4 sm:$0xff]   ;;  %v1010_v13 = vld [vmem:[%s1496_s1 + $0x54] ss:$8 sps:$4 sm:$0xff]   ;;  %v1216_v14 = vshrl.u32 %v95_v9, 7 }
   0x5   :  { %v1012_v16 = vld [vmem:[%s1496_s1 + $0x50] ss:$8 sps:$4 sm:$0xff]   ;;  %v1013_v17 = vld [vmem:[%s1496_s1 + $0x64] ss:$8 sps:$4 sm:$0xff]   ;;  %v1015_v21 = vld [vmem:[%s1496_s1 + $0x60] ss:$8 sps:$4 sm:$0xff]  }
   0x6   :  { %v1225_v18 = vsub.s32 %v116_v15, %v1216_v14  ;;  %v1230_v19 = vld.sshfl [vmem:[%s1495_s0] sm:$0x33 pattern:$0x75316420]  ;;  %v1016_v22 = vld [vmem:[%s1496_s1 + $0x74] ss:$8 sps:$4 sm:$0xff]  }
   0x7   :  { %457 = vmatpush1.bf16.msra.mxu0 %v1000_v3  ;;  %v113_v20 = vcombine.high %v1230_v19, %v1230_v19  ;;  %v1018_v24 = vld [vmem:[%s1496_s1 + $0x70] ss:$8 sps:$4 sm:$0xff]   ;;  %v1019_v25 = vld [vmem:[%s1496_s1 + $0x84] ss:$8 sps:$4 sm:$0xff]   ;;  %v1021_v26 = vld [vmem:[%s1496_s1 + $0x80] ss:$8 sps:$4 sm:$0xff]  }
   0x8   :  { %458 = vmatprep.subr.bf16.mxu0 %v1001_v4  ;;  %v1022_v27 = vld [vmem:[%s1496_s1 + $0x94] ss:$8 sps:$4 sm:$0xff]   ;;  %v1024_v28 = vld [vmem:[%s1496_s1 + $0x90] ss:$8 sps:$4 sm:$0xff]   ;;  %v1025_v29 = vld [vmem:[%s1496_s1 + $0xa4] ss:$8 sps:$4 sm:$0xff]   ;;  %v1336_v54 = vrot.slane %v1230_v19, %v1225_v18 }
   0x9   :  { %v1241_v23 = vrot.slane %v113_v20, %v1225_v18  ;;  %v1027_v30 = vld [vmem:[%s1496_s1 + $0xa0] ss:$8 sps:$4 sm:$0xff]   ;;  %v1028_v31 = vld [vmem:[%s1496_s1 + $0xb4] ss:$8 sps:$4 sm:$0xff]   ;;  %v1030_v32 = vld [vmem:[%s1496_s1 + $0xb0] ss:$8 sps:$4 sm:$0xff]  }
   0xa   :  { %v1031_v33 = vld [vmem:[%s1496_s1 + $0xc4] ss:$8 sps:$4 sm:$0xff]   ;;  %v1033_v35 = vld [vmem:[%s1496_s1 + $0xc0] ss:$8 sps:$4 sm:$0xff]   ;;  %v1034_v37 = vld [vmem:[%s1496_s1 + $0xd4] ss:$8 sps:$4 sm:$0xff]  }
   0xb   :  { %459 = vmatpush1.bf16.msra.mxu0 %v1003_v5  ;;  %486 = vmatprep.mubr.bf16.mxu0 %v1241_v23  ;;  %v1091_v34 = vld [vmem:[%s1498_s3 + $0x40] sm:$0xff]   ;;  %v1093_v38 = vld [vmem:[%s1498_s3 + $0x48] sm:$0xff]   ;;  %v1095_v40 = vld [vmem:[%s1498_s3 + $0x50] sm:$0xff]   ;;  %v129_v55 = vcombine.high %v1241_v23, %v1241_v23 }
   0xc   :  { %460 = vmatprep.subr.bf16.mxu0 %v1004_v6  ;;  %v1092_v36 = vld [vmem:[%s1498_s3] sm:$0xff]   ;;  %934 = vmatprep.subr.bf16.mxu1 %v1091_v34  ;;  %v1094_v39 = vld [vmem:[%s1498_s3 + $0x8] sm:$0xff]   ;;  %v1036_v41 = vld [vmem:[%s1496_s1 + $0xd0] ss:$8 sps:$4 sm:$0xff]  }
   0xd   :  { %935 = vmatpush3.bf16.msra.mxu1 %v1092_v36  ;;  %v1037_v42 = vld [vmem:[%s1496_s1 + $0xe4] ss:$8 sps:$4 sm:$0xff]   ;;  %v1096_v43 = vld [vmem:[%s1498_s3 + $0x10] sm:$0xff]   ;;  %v1097_v44 = vld [vmem:[%s1498_s3 + $0x58] sm:$0xff]  }
   0xe   :  { %936 = vmatprep.subr.bf16.mxu1 %v1093_v38  ;;  %v1039_v45 = vld [vmem:[%s1496_s1 + $0xe0] ss:$8 sps:$4 sm:$0xff]   ;;  %v1040_v46 = vld [vmem:[%s1496_s1 + $0xf4] ss:$8 sps:$4 sm:$0xff]   ;;  %v1042_v49 = vld [vmem:[%s1496_s1 + $0xf0] ss:$8 sps:$4 sm:$0xff]  }
   0xf   :  { %461 = vmatpush1.bf16.msra.mxu0 %v1006_v7  ;;  %v1098_v47 = vld [vmem:[%s1498_s3 + $0x18] sm:$0xff]   ;;  %v1099_v48 = vld [vmem:[%s1498_s3 + $0x60] sm:$0xff]   ;;  %v1101_v52 = vld [vmem:[%s1498_s3 + $0x68] sm:$0xff]  }
  0x10   :  { %462 = vmatprep.subr.bf16.mxu0 %v1007_v8  ;;  %v1100_v50 = vld [vmem:[%s1498_s3 + $0x20] sm:$0xff]  }
  0x11   :  { %937 = vmatpush3.bf16.msra.mxu1 %v1094_v39  ;;  %v1045_v51 = vld [vmem:[%s1496_s1 + $0x104] ss:$8 sps:$4 sm:$0xff]   ;;  %v1043_v53 = vld [vmem:[%s1496_s1 + $0x100] ss:$8 sps:$4 sm:$0xff]  }
  0x12   :  { %938 = vmatprep.subr.bf16.mxu1 %v1095_v40 }
  0x13   :  { %463 = vmatpush1.bf16.msra.mxu0 %v1009_v12 }
  0x14   :  { %464 = vmatprep.subr.bf16.mxu0 %v1010_v13 }
  0x15   :  { %939 = vmatpush3.bf16.msra.mxu1 %v1096_v43 }
  0x16   :  { %940 = vmatprep.subr.bf16.mxu1 %v1097_v44 }
  0x17   :  { %465 = vmatpush1.bf16.msra.mxu0 %v1012_v16 }
  0x18   :  { %466 = vmatprep.subr.bf16.mxu0 %v1013_v17 }
  0x19   :  { %941 = vmatpush3.bf16.msra.mxu1 %v1098_v47 }
  0x1a   :  { %942 = vmatprep.subr.bf16.mxu1 %v1099_v48 }
  0x1b   :  { %467 = vmatpush1.bf16.msra.mxu0 %v1015_v21 }
  0x1c   :  { %468 = vmatprep.subr.bf16.mxu0 %v1016_v22 }
  0x1d   :  { %943 = vmatpush3.bf16.msra.mxu1 %v1100_v50 }
  0x1f   :  { %469 = vmatpush1.bf16.msra.mxu0 %v1018_v24 }
  0x20   :  { %470 = vmatprep.subr.bf16.mxu0 %v1019_v25 }
  0x23   :  { %471 = vmatpush1.bf16.msra.mxu0 %v1021_v26 }
  0x24   :  { %472 = vmatprep.subr.bf16.mxu0 %v1022_v27 }
  0x27   :  { %473 = vmatpush1.bf16.msra.mxu0 %v1024_v28 }
  0x28   :  { %474 = vmatprep.subr.bf16.mxu0 %v1025_v29 }
  0x2b   :  { %475 = vmatpush1.bf16.msra.mxu0 %v1027_v30 }
  0x2c   :  { %476 = vmatprep.subr.bf16.mxu0 %v1028_v31 }
  0x2f   :  { %477 = vmatpush1.bf16.msra.mxu0 %v1030_v32 }
  0x30   :  { %478 = vmatprep.subr.bf16.mxu0 %v1031_v33 }
  0x33   :  { %479 = vmatpush1.bf16.msra.mxu0 %v1033_v35 }
  0x34   :  { %480 = vmatprep.subr.bf16.mxu0 %v1034_v37 }
  0x37   :  { %481 = vmatpush1.bf16.msra.mxu0 %v1036_v41 }
  0x38   :  { %482 = vmatprep.subr.bf16.mxu0 %v1037_v42 }
  0x3b   :  { %483 = vmatpush1.bf16.msra.mxu0 %v1039_v45 }
  0x3c   :  { %484 = vmatprep.subr.bf16.mxu0 %v1040_v46 }
  0x3f   :  { %485 = vmatpush1.bf16.msra.mxu0 %v1042_v49 }
  0x40   :  { %12 = vsyncpa [#allocation3], 0  ;;  %495 = vmatprep.subr.bf16.mxu0 %v1045_v51  ;;  %v1048_v56 = vld [vmem:[%s1496_s1 + $0x114] ss:$8 sps:$4 sm:$0xff]   ;;  %944 = vmatprep.subr.bf16.mxu1 %v1101_v52  ;;  %v1102_v57 = vld [vmem:[%s1498_s3 + $0x28] sm:$0xff]   ;;  %v128_v24 = vcombine.high %v1336_v54, %v1336_v54  ;;  %v1140_v29 = vmov 0.0  }
  0x41   :  { %v1046_v58 = vld [vmem:[%s1496_s1 + $0x110] ss:$8 sps:$4 sm:$0xff]   ;;  %v1051_v59 = vld [vmem:[%s1496_s1 + $0x124] ss:$8 sps:$4 sm:$0xff]   ;;  %945 = vmatpush3.bf16.msra.mxu1 %v1102_v57  ;;  %v1049_v60 = vld [vmem:[%s1496_s1 + $0x120] ss:$8 sps:$4 sm:$0xff]  }
  0x42   :  { %487 = vmatmul.mubr.bf16.vlgmr.msra.gmra.mrb[0].mxu0 %v1336_v54  ;;  %v1054_v61 = vld [vmem:[%s1496_s1 + $0x134] ss:$8 sps:$4 sm:$0xff]   ;;  %v1052_v62 = vld [vmem:[%s1496_s1 + $0x130] ss:$8 sps:$4 sm:$0xff]   ;;  %v1057_v63 = vld [vmem:[%s1496_s1 + $0x144] ss:$8 sps:$4 sm:$0xff]  }
  0x43   :  { %496 = vmatpush1.bf16.msra.mxu0 %v1043_v53  ;;  %527 = vmatprep.mubr.bf16.mxu0 %v129_v55  ;;  %v1055_v0 = vld [vmem:[%s1496_s1 + $0x140] ss:$8 sps:$4 sm:$0xff]   ;;  %v1060_v1 = vld [vmem:[%s1496_s1 + $0x154] ss:$8 sps:$4 sm:$0xff]   ;;  %v1058_v2 = vld [vmem:[%s1496_s1 + $0x150] ss:$8 sps:$4 sm:$0xff]  }
  0x44   :  { %497 = vmatprep.subr.bf16.mxu0 %v1048_v56  ;;  %v1063_v3 = vld [vmem:[%s1496_s1 + $0x164] ss:$8 sps:$4 sm:$0xff]   ;;  %v1061_v4 = vld [vmem:[%s1496_s1 + $0x160] ss:$8 sps:$4 sm:$0xff]   ;;  %v1066_v5 = vld [vmem:[%s1496_s1 + $0x174] ss:$8 sps:$4 sm:$0xff]  }
  0x45   :  { %v1064_v6 = vld [vmem:[%s1496_s1 + $0x170] ss:$8 sps:$4 sm:$0xff]   ;;  %v1069_v7 = vld [vmem:[%s1496_s1 + $0x184] ss:$8 sps:$4 sm:$0xff]   ;;  %v1067_v8 = vld [vmem:[%s1496_s1 + $0x180] ss:$8 sps:$4 sm:$0xff]  }
  0x46   :  { %v1072_v9 = vld [vmem:[%s1496_s1 + $0x194] ss:$8 sps:$4 sm:$0xff]   ;;  %v1070_v10 = vld [vmem:[%s1496_s1 + $0x190] ss:$8 sps:$4 sm:$0xff]   ;;  %v1075_v11 = vld [vmem:[%s1496_s1 + $0x1a4] ss:$8 sps:$4 sm:$0xff]  }
  0x47   :  { %498 = vmatpush1.bf16.msra.mxu0 %v1046_v58  ;;  %v1073_v12 = vld [vmem:[%s1496_s1 + $0x1a0] ss:$8 sps:$4 sm:$0xff]   ;;  %v1078_v13 = vld [vmem:[%s1496_s1 + $0x1b4] ss:$8 sps:$4 sm:$0xff]   ;;  %v1076_v15 = vld [vmem:[%s1496_s1 + $0x1b0] ss:$8 sps:$4 sm:$0xff]  }
  0x48   :  { %499 = vmatprep.subr.bf16.mxu0 %v1051_v59  ;;  %v1081_v16 = vld [vmem:[%s1496_s1 + $0x1c4] ss:$8 sps:$4 sm:$0xff]   ;;  %v1079_v17 = vld [vmem:[%s1496_s1 + $0x1c0] ss:$8 sps:$4 sm:$0xff]   ;;  %v1084_v18 = vld [vmem:[%s1496_s1 + $0x1d4] ss:$8 sps:$4 sm:$0xff]  }
  0x49   :  { %v1082_v19 = vld [vmem:[%s1496_s1 + $0x1d0] ss:$8 sps:$4 sm:$0xff]   ;;  %v1087_v20 = vld [vmem:[%s1496_s1 + $0x1e4] ss:$8 sps:$4 sm:$0xff]   ;;  %v1085_v21 = vld [vmem:[%s1496_s1 + $0x1e0] ss:$8 sps:$4 sm:$0xff]  }
  0x4a   :  { %v1090_v22 = vld [vmem:[%s1496_s1 + $0x1f4] ss:$8 sps:$4 sm:$0xff]   ;;  %v1088_v23 = vld [vmem:[%s1496_s1 + $0x1f0] ss:$8 sps:$4 sm:$0xff]   ;;  %v97_v30 = vsub.s32 0, %v1216_v14  ;;  %v101_v32 = vsub.s32 1, %v1216_v14 }
  0x4b   :  { %500 = vmatpush1.bf16.msra.mxu0 %v1049_v60  ;;  %v1103_v25 = vld [vmem:[%s1498_s3 + $0x70] sm:$0xff]   ;;  %v1105_v27 = vld [vmem:[%s1498_s3 + $0x78] sm:$0xff]   ;;  %v93_v31 = vld [vmem:[%s1497_s2] sm:$0x3]  ;;  %vm1141_vm0 = vmmov 0  }
  0x4c   :  { %501 = vmatprep.subr.bf16.mxu0 %v1054_v61  ;;  %v1104_v26 = vld [vmem:[%s1498_s3 + $0x30] sm:$0xff]   ;;  %946 = vmatprep.subr.bf16.mxu1 %v1103_v25  ;;  %v1106_v28 = vld [vmem:[%s1498_s3 + $0x38] sm:$0xff]   ;;  %v98_v33 = vrot.slane %v93_v31, %v97_v30  ;;  %v102_v34 = vrot.slane %v93_v31, %v101_v32  ;;  %v1107_v44 = vld [vmem:[%s1500_s5] sm:$0xff]  }
  0x4d   :  { %947 = vmatpush3.bf16.msra.mxu1 %v1104_v26  ;;  %v1108_v14 = vld [vmem:[%s1500_s5 + $0x8] sm:$0xff]   ;;  %v1109_v46 = vld [vmem:[%s1500_s5 + $0x10] sm:$0xff]   ;;  %v1110_v47 = vld [vmem:[%s1500_s5 + $0x18] sm:$0xff]  }
  0x4e   :  { %948 = vmatprep.subr.bf16.mxu1 %v1105_v27  ;;  %v1111_v48 = vld [vmem:[%s1500_s5 + $0x20] sm:$0xff]   ;;  %v1112_v49 = vld [vmem:[%s1500_s5 + $0x28] sm:$0xff]   ;;  %v1113_v50 = vld [vmem:[%s1500_s5 + $0x30] sm:$0xff]  }
  0x4f   :  { %502 = vmatpush1.bf16.msra.mxu0 %v1052_v62  ;;  %v1114_v51 = vld [vmem:[%s1500_s5 + $0x38] sm:$0xff]   ;;  %v908_v53 = vld [vmem:[%s1499_s4] ss:$0 sm:$0xff]  ;;  %s1142_s5 = smov [#allocation2]  }
  0x50   :  { %503 = vmatprep.subr.bf16.mxu0 %v1057_v63  ;;  %v925_v61 = vld [vmem:[%s1501_s6] ss:$0 sm:$0xff]  ;;  %s835_s14 = sshll.u32 %s1142_s5, 4  ;;  %s836_s14 = int_to_ptr.vmem [resolvable:$true] %s835_s14 }
  0x51   :  { %949 = vmatpush3.bf16.msra.mxu1 %v1106_v28  ;;  %s1115_s4 = scalar_lea.vmem %s836_s14, 32  ;;  %p1120_p1 = scmp.lt.s32.totalorder %s836_s14, %s836_s14 }
  0x52   :  { %965 = vmatprep.subr.bf16.mxu1 %v1140_v29  ;;  %p1116_p0 = scmp.ne.s32.totalorder %s836_s14, %s1115_s4  ;;  %p1121_p2 = scmp.lt.s32.totalorder %s1115_s4, %s1115_s4 }
  0x53   :  { %504 = vmatpush1.bf16.msra.mxu0 %v1055_v0 }
  0x54   :  { %505 = vmatprep.subr.bf16.mxu0 %v1060_v1  ;;  %p1122_p3 = por %p1121_p2, %p1120_p1 }
  0x56   :  { %p1123_p4 = pnand %p1122_p3, %p1116_p0 }
  0x57   :  { %506 = vmatpush1.bf16.msra.mxu0 %v1058_v2 }
  0x58   :  { %507 = vmatprep.subr.bf16.mxu0 %v1063_v3 }
  0x5b   :  { %508 = vmatpush1.bf16.msra.mxu0 %v1061_v4 }
  0x5c   :  { %509 = vmatprep.subr.bf16.mxu0 %v1066_v5 }
  0x5f   :  { %510 = vmatpush1.bf16.msra.mxu0 %v1064_v6 }
  0x60   :  { %511 = vmatprep.subr.bf16.mxu0 %v1069_v7 }
  0x63   :  { %512 = vmatpush1.bf16.msra.mxu0 %v1067_v8 }
  0x64   :  { %513 = vmatprep.subr.bf16.mxu0 %v1072_v9 }
  0x67   :  { %514 = vmatpush1.bf16.msra.mxu0 %v1070_v10 }
  0x68   :  { %515 = vmatprep.subr.bf16.mxu0 %v1075_v11 }
  0x6b   :  { %516 = vmatpush1.bf16.msra.mxu0 %v1073_v12 }
  0x6c   :  { %517 = vmatprep.subr.bf16.mxu0 %v1078_v13 }
  0x6f   :  { %518 = vmatpush1.bf16.msra.mxu0 %v1076_v15 }
  0x70   :  { %519 = vmatprep.subr.bf16.mxu0 %v1081_v16 }
  0x73   :  { %520 = vmatpush1.bf16.msra.mxu0 %v1079_v17 }
  0x74   :  { %521 = vmatprep.subr.bf16.mxu0 %v1084_v18 }
  0x77   :  { %522 = vmatpush1.bf16.msra.mxu0 %v1082_v19 }
  0x78   :  { %523 = vmatprep.subr.bf16.mxu0 %v1087_v20 }
  0x7b   :  { %524 = vmatpush1.bf16.msra.mxu0 %v1085_v21 }
  0x7c   :  { %525 = vmatprep.subr.bf16.mxu0 %v1090_v22 }
  0x7f   :  { %526 = vmatpush1.bf16.msra.mxu0 %v1088_v23 }
  0x82   :  { %528 = vmatmul.mubr.bf16.vlgmr.msra.gmra.mrb[0].mxu0 %v128_v24 }
 0x155   :  { %v529_v35 = vpop.f32.mrb[0].mxu0 }
 0x156   :  { %v985_v36 = vadd.f32 %v529_v35, %v98_v33  ;;  %v531_v37 = vpop.f32.mrb[1].mxu0 }
 0x157   :  { %v986_v38 = vadd.f32 %v531_v37, %v102_v34  ;;  %v533_v39 = vpop.f32.mrb[2].mxu0 }
 0x158   :  { %v536_v40 = vmax.f32 %v985_v36, 0.0  ;;  %v534_v41 = vpop.f32.mrb[3].mxu0 }
 0x159   :  { %v537_v42 = vmax.f32 %v986_v38, 0.0 }
 0x15a   :  { %v538_v45 = vpack.c.bf16 %v536_v40, %v536_v40 }
 0x15b   :  { %v539_v43 = vpack.c.bf16 %v537_v42, %v537_v42 }
 0x15d   :  { %707 = vmatprep.mubr.bf16.mxu1 %v539_v43 }
 0x15e   :  { %708 = vmatmul.mubr.bf16.vlgmr.msra.gmra.mrb[0].mxu1 %v538_v45 }
 0x15f   :  { %966 = vmatpush3.bf16.msra.mxu1 %v1107_v44  ;;  %981 = vmatprep.mubr.msk.bf16.mxu1 %vm1141_vm0, %v1140_v29 }
 0x160   :  { %967 = vmatprep.subr.bf16.mxu1 %v1140_v29 }
 0x163   :  { %968 = vmatpush3.bf16.msra.mxu1 %v1108_v14 }
 0x164   :  { %969 = vmatprep.subr.bf16.mxu1 %v1140_v29 }
 0x167   :  { %970 = vmatpush3.bf16.msra.mxu1 %v1109_v46 }
 0x168   :  { %971 = vmatprep.subr.bf16.mxu1 %v1140_v29 }
 0x16b   :  { %972 = vmatpush3.bf16.msra.mxu1 %v1110_v47 }
 0x16c   :  { %973 = vmatprep.subr.bf16.mxu1 %v1140_v29 }
 0x16f   :  { %974 = vmatpush3.bf16.msra.mxu1 %v1111_v48 }
 0x170   :  { %975 = vmatprep.subr.bf16.mxu1 %v1140_v29 }
 0x173   :  { %976 = vmatpush3.bf16.msra.mxu1 %v1112_v49 }
 0x174   :  { %977 = vmatprep.subr.bf16.mxu1 %v1140_v29 }
 0x177   :  { %978 = vmatpush3.bf16.msra.mxu1 %v1113_v50 }
 0x178   :  { %979 = vmatprep.subr.bf16.mxu1 %v1140_v29 }
 0x17b   :  { %980 = vmatpush3.bf16.msra.mxu1 %v1114_v51 }
 0x231   :  { %v950_v52 = vpop.f32.mrb[0].mxu1 }
 0x232   :  { %v951_v54 = vpop.f32.mrb[1].mxu1 }
 0x233   :  { %v952_v55 = vadd.f32 %v951_v54, %v950_v52  ;;  %v953_v56 = vpop.f32.mrb[2].mxu1 }
 0x234   :  { %v954_v57 = vpop.f32.mrb[3].mxu1 }
 0x235   :  { %v710_v58 = vadd.f32 %v952_v55, %v908_v53 }
 0x237   :  { %v715_v59 = vmax.f32 %v710_v58, 0.0 }
 0x239   :  { %v716_v60 = vpack.c.bf16 %v715_v59, %v715_v59 }
 0x23b   :  { %982 = vmatmul.mubr.bf16.vlgmr.msra.gmra.mrb[4].mxu1 %v716_v60 }
 0x30e   :  { %v822_v62 = vpop.f32.mrb[4].mxu1 }
 0x30f   :  { %v823_v63 = vadd.f32 %v925_v61, %v822_v62  ;;  %v983_v0 = vpop.f32.mrb[5].mxu1 }
 0x310   :  { %v825_v1 = vpop.f32.mrb[6].mxu1 }
 0x311   :  { %828 = vst [vmem:[#allocation2] sm:$0x3] %v823_v63  ;;  %v984_v2 = vpop.f32.mrb[7].mxu1 }
 0x312   :  { %1126 = shalt.err (!%p1123_p4)
}
 0x313   :  { %s1127_s6 = scalar_lea.hbm %s1502_s7, 32 }
 0x314   :  { %p1128_p5 = scmp.ne.s32.totalorder %s1502_s7, %s1127_s6  ;;  %p1131_p6 = scmp.lt.u32.totalorder %s1127_s6, %s1502_s7 }
 0x316   :  { %p1133_p7 = pnand %p1131_p6, %p1128_p5 }
 0x318   :  { %1136 = shalt.err (!%p1133_p7)
}
 0x319   :  { %838 = dma.vmem_to_hbm [thread:$0]  %s836_s14, 32, %s1502_s7, [#allocation3]  }
 0x31a   :  { %1137 = dma.done.wait [#allocation3], 32  }
 0x31b   :  { %1138 = vsyncadd [#allocation3], 4294967264 }
 0x31c   :  { %842 = vsyncpa [#allocation3], 1 }

// kernel: forward.3
= control target key start
LH: loop header
LB: loop body
LE: loop exit
PB: predicated region body
PF: predicated region fallthrough
CT: control target
= control target key end

     0   :  { %s2624_s12 = smov 0   ;;  %s2626_s13 = smov 0   ;;  %s2971_s0 = inlined_call_operand.vmem [shape: bf16[2,2,16,8,3], index: 0, kind: input, shape index: {}]   ;;  %s2972_s1 = inlined_call_operand.vmem [shape: bf16[9,3,128], index: 1, kind: input, shape index: {}]   ;;  %s2973_s2 = inlined_call_operand.vmem [shape: f32[1,128], index: 2, kind: input, shape index: {}]   ;;  %s2974_s3 = inlined_call_operand.vmem [shape: bf16[2,7,7,128], index: 3, kind: output, shape index: {}]  }
   0x1   :  { %s2628_s14 = smov 0   ;;  %s2630_s15 = smov 0  }
   0x2   :  { %s2632_s16 = smov 0  }
   0x3 LB: > { %s22_s17 = sadd.s32 1, %s2591_s14  ;;  %s25_s18 = sadd.s32 1, %s2595_s15  ;;  %s2599_s16 = sphi %s2632_s16, %s13_s16   ;;  %s2595_s15 = sphi %s2630_s15, %s2978_s15   ;;  %s2591_s14 = sphi %s2628_s14, %s2977_s14   ;;  %s2587_s13 = sphi %s2626_s13, %s2976_s13   ;;  %s2583_s12 = sphi %s2624_s12, %s2975_s12  }
   0x4   : > { %p23_p0 = scmp.ge.s32.totalorder %s22_s17, 7  ;;  %p2002_p1 = scmp.ge.s32.totalorder %s2599_s16, 1 }
   0x5   : > { %p151_p2 = scmp.lt.s32.totalorder %s2599_s16, 15 }
   0x6   : > { %s2980_s17 = smov (%p23_p0, %s22_s17), 0  ;;  %s2982_s18 = smov (!%p23_p0, %s25_s18), %s2595_s15 }
   0x7   : > { %p152_p3 = pnand %p2002_p1, %p151_p2  ;;  %p27_p4 = scmp.ge.s32.totalorder %s2982_s18, 2 }
   0x8   : > { %v2011_v0 = vld [vmem:[%s2972_s1 + $0x2] sm:$0x3] (!%p152_p3)  ;;  %vm207_vm0 = vcmask (!%p152_p3), 1040384   ;;  %vm208_vm1 = vcmask (!%p152_p3), 1041408   ;;  %v2601_v1 = vmov (!%p152_p3), 0.0   ;;  %v2602_v2 = vmov (!%p152_p3), 65535  }
   0x9   : > { %s2984_s18 = smov (%p27_p4, %s2982_s18), 0  ;;  %155 = sbr.rel (%p152_p3) target bundleno = 452 (0x1c4), region = 32 }
   0xa   : > { %2165 = vmatprep.subr.bf16.mxu0 (!%p152_p3), %v2601_v1  ;;  %v209_v3 = vsel (!%p152_p3), %vm207_vm0, 4294967295, %v2602_v2  ;;  %p178_p5 = scmp.lt.s32.totalorder (!%p152_p3), %s2587_s13, 1  ;;  %2219 = vmatprep.subr.bf16.mxu1 (!%p152_p3), %v2601_v1  ;;  %vm2603_vm2 = vmmov (!%p152_p3), 0   ;;  %v196_v6 = vld [vmem:[%s2972_s1] sm:$0x3] (!%p152_p3)  ;;  %s2085_s23 = sshll.u32 (!%p152_p3), %s2583_s12, 3 }
   0xb   : > { %v2661_v4 = vsel (!%p152_p3), %vm208_vm1, %v209_v3, 0  ;;  %2167 = vmatprep.mubr.msk.bf16.mxu0 (!%p152_p3), %vm2603_vm2, %v2601_v1  ;;  %2221 = vmatprep.mubr.msk.bf16.mxu1 (!%p152_p3), %vm2603_vm2, %v2601_v1  ;;  %vm203_vm3 = vcmask (!%p152_p3), 23552   ;;  %v2014_v15 = vld [vmem:[%s2972_s1 + $0x4] sm:$0x3] (!%p152_p3)  ;;  %v2020_v18 = vld [vmem:[%s2972_s1 + $0x6] sm:$0x3] (!%p152_p3) }
   0xc   : > { %v2668_v5 = vand.u32 (!%p152_p3), %v2011_v0, %v2661_v4  ;;  %v2684_v7 = vand.u32 (!%p152_p3), %v2661_v4, %v196_v6  ;;  %v2702_v16 = vand.u32 (!%p152_p3), %v2014_v15, %v2661_v4  ;;  %v2718_v20 = vand.u32 (!%p152_p3), %v2020_v18, %v2661_v4  ;;  %v2025_v24 = vld [vmem:[%s2972_s1 + $0x8] sm:$0x3] (!%p152_p3)  ;;  %v2027_v29 = vld [vmem:[%s2972_s1 + $0xa] sm:$0x3] (!%p152_p3)  ;;  %v2033_v36 = vld [vmem:[%s2972_s1 + $0xc] sm:$0x3] (!%p152_p3) }
   0xd   : > { %v2737_v26 = vand.u32 (!%p152_p3), %v2025_v24, %v2661_v4  ;;  %v2760_v31 = vand.u32 (!%p152_p3), %v2027_v29, %v2661_v4  ;;  %v2782_v38 = vand.u32 (!%p152_p3), %v2033_v36, %v2661_v4  ;;  %v2038_v42 = vld [vmem:[%s2972_s1 + $0xe] sm:$0x3] (!%p152_p3)  ;;  %v2040_v47 = vld [vmem:[%s2972_s1 + $0x10] sm:$0x3] (!%p152_p3)  ;;  %p185_p6 = scmp.lt.s32.totalorder (!%p152_p3), %s2583_s12, 6  ;;  %vm1882_vm4 = vcmask (!%p152_p3), 1043456  }
   0xe   : > { %2166 = vmatpush3.bf16.msra.mxu0 (!%p152_p3), %v2668_v5  ;;  %2220 = vmatpush3.bf16.msra.mxu1 (!%p152_p3), %v2668_v5  ;;  %v2805_v44 = vand.u32 (!%p152_p3), %v2038_v42, %v2661_v4  ;;  %v2828_v49 = vand.u32 (!%p152_p3), %v2040_v47, %v2661_v4  ;;  %vm1883_vm5 = vsmask.f32 (!%p152_p3), 3328 }
   0xf   : > { %2171 = vmatprep.subr.bf16.mxu0 (!%p152_p3), %v2601_v1  ;;  %2225 = vmatprep.subr.bf16.mxu1 (!%p152_p3), %v2601_v1  ;;  %vm1884_vm6 = vmand (!%p152_p3), %vm1882_vm4, %vm1883_vm5 }
  0x10   : > { %s2986_s13 = smov (!%p178_p5, %s2587_s13), 1  ;;  %s2988_s12 = smov (!%p185_p6, %s2583_s12), 6 }
  0x11   : > { %s2084_s24 = sshll.u32 %s2986_s13, 7 }
  0x12   : > { %s182_s27 = scalar_lea.vmem %s2971_s0, %s2084_s24 }
  0x13   : > { %s2687_s28 = scalar_lea.vmem %s182_s27, %s2085_s23  ;;  %s2509_s23 = smul.u32 7, %s2986_s13 }
  0x14   : > { %v2010_v8 = vld [vmem:[%s2687_s28 + $0x40] sm:$0xf]  ;;  %v2734_v25 = vld [vmem:[%s2687_s28 + $0x4] sm:$0xf]  ;;  %v2802_v43 = vld [vmem:[%s2687_s28 + $0x8] sm:$0xf] }
  0x15   : > { %v195_v9 = vld [vmem:[%s2687_s28] sm:$0xf]  ;;  %2168 = vmatmul.mubr.msk.bf16.vlgmr.msra.gmra.mrb[0].mxu0 %vm203_vm3, %v2010_v8  ;;  %v2045_v17 = vcombine.low %v2010_v8, %v2010_v8  ;;  %v2028_v27 = vcombine.low %v2734_v25, %v2734_v25  ;;  %v2751_v28 = vld [vmem:[%s2687_s28 + $0x44] sm:$0xf]  ;;  %v2041_v45 = vcombine.low %v2802_v43, %v2802_v43  ;;  %v2819_v46 = vld [vmem:[%s2687_s28 + $0x48] sm:$0xf]  ;;  %s188_s24 = sadd.s32 %s2509_s23, %s2988_s12 }
  0x16   : > { %v2015_v10 = vcombine.low %v195_v9, %v195_v9  ;;  %2172 = vmatpush3.bf16.msra.mxu0 %v2684_v7  ;;  %2173 = vmatprep.mubr.msk.bf16.mxu0 %vm2603_vm2, %v2601_v1  ;;  %v2049_v34 = vcombine.low %v2751_v28, %v2751_v28  ;;  %v2053_v52 = vcombine.low %v2819_v46, %v2819_v46  ;;  %v2063_v58 = vld [vmem:[%s2687_s28 + $0xc] sm:$0xf]  ;;  %s2005_s25 = sshll.u32 %s188_s24, 2 }
  0x17   : > { %2177 = vmatprep.subr.bf16.mxu0 %v2601_v1  ;;  %v775_v19 = vshll.u32 %v2045_v17, 16  ;;  %v773_v21 = vshrl.u32 %v2045_v17, 16  ;;  %v473_v30 = vshll.u32 %v2028_v27, 16  ;;  %v471_v32 = vshrl.u32 %v2028_v27, 16  ;;  %v2067_v60 = vld [vmem:[%s2687_s28 + $0x4c] sm:$0xf]  ;;  %s190_s30 = scalar_lea.vmem %s2974_s3, %s2005_s25 }
  0x18   : > { %v306_v11 = vshrl.u32 %v2015_v10, 16  ;;  %v308_v12 = vshll.u32 %v2015_v10, 16  ;;  %v911_v37 = vshll.u32 %v2049_v34, 16  ;;  %v909_v39 = vshrl.u32 %v2049_v34, 16 }
  0x19   : > { %v777_v22 = vrot.slane %v775_v19, 1  ;;  %v475_v33 = vrot.slane %v473_v30, 1  ;;  %v638_v48 = vshll.u32 %v2041_v45, 16  ;;  %v636_v50 = vshrl.u32 %v2041_v45, 16 }
  0x1a   : > { %v310_v13 = vrot.slane %v308_v12, 1  ;;  %v913_v40 = vrot.slane %v911_v37, 1  ;;  %v1047_v54 = vshll.u32 %v2053_v52, 16  ;;  %v1045_v55 = vshrl.u32 %v2053_v52, 16 }
  0x1b   : > { %v778_v23 = vor.u32 %v777_v22, %v773_v21  ;;  %v2773_v35 = vor.u32 %v475_v33, %v471_v32  ;;  %v640_v51 = vrot.slane %v638_v48, 1  ;;  %v2069_v59 = vcombine.low %v2063_v58, %v2063_v58  ;;  %v2081_v21 = vld [vmem:[%s2973_s2] ss:$0 sm:$0xff] }
  0x1c   : > { %v311_v14 = vor.u32 %v310_v13, %v306_v11  ;;  %v2793_v41 = vor.u32 %v913_v40, %v909_v39  ;;  %v1049_v56 = vrot.slane %v1047_v54, 1  ;;  %v2079_v2 = vcombine.low %v2067_v60, %v2067_v60 }
  0x1d   : > { %v641_v53 = vor.u32 %v640_v51, %v636_v50  ;;  %v1442_v61 = vshll.u32 %v2069_v59, 16  ;;  %v1440_v62 = vshrl.u32 %v2069_v59, 16 }
  0x1e   : > { %2222 = vmatmul.mubr.msk.bf16.vlgmr.msra.gmra.mrb[0].mxu1 %vm203_vm3, %v311_v14  ;;  %v1050_v57 = vor.u32 %v1049_v56, %v1045_v55  ;;  %v1823_v3 = vshll.u32 %v2079_v2, 16  ;;  %v1821_v4 = vshrl.u32 %v2079_v2, 16 }
  0x1f   : > { %2226 = vmatpush3.bf16.msra.mxu1 %v2684_v7  ;;  %2227 = vmatprep.mubr.msk.bf16.mxu1 %vm2603_vm2, %v2601_v1  ;;  %v1444_v63 = vrot.slane %v1442_v61, 1 }
  0x20   : > { %2231 = vmatprep.subr.bf16.mxu1 %v2601_v1 }
  0x21   : > { %2174 = vmatmul.mubr.msk.bf16.vlgmr.msra.gmra.mrb[0].mxu0 %vm203_vm3, %v195_v9  ;;  %v1445_v0 = vor.u32 %v1444_v63, %v1440_v62 }
  0x22   : > { %2178 = vmatpush3.bf16.msra.mxu0 %v2702_v16  ;;  %2179 = vmatprep.mubr.msk.bf16.mxu0 %vm2603_vm2, %v2601_v1 }
  0x23   : > { %2183 = vmatprep.subr.bf16.mxu0 %v2601_v1 }
  0x2a   : > { %2228 = vmatmul.mubr.msk.bf16.vlgmr.msra.gmra.mrb[0].mxu1 %vm203_vm3, %v2010_v8 }
  0x2b   : > { %2232 = vmatpush3.bf16.msra.mxu1 %v2702_v16  ;;  %2233 = vmatprep.mubr.msk.bf16.mxu1 %vm2603_vm2, %v2601_v1 }
  0x2c   : > { %2237 = vmatprep.subr.bf16.mxu1 %v2601_v1 }
  0x2d   : > { %2180 = vmatmul.mubr.msk.bf16.vlgmr.msra.gmra.mrb[0].mxu0 %vm203_vm3, %v311_v14 }
  0x2e   : > { %2184 = vmatpush3.bf16.msra.mxu0 %v2718_v20  ;;  %2185 = vmatprep.mubr.msk.bf16.mxu0 %vm2603_vm2, %v2601_v1 }
  0x2f   : > { %2189 = vmatprep.subr.bf16.mxu0 %v2601_v1 }
  0x36   : > { %2234 = vmatmul.mubr.msk.bf16.vlgmr.msra.gmra.mrb[0].mxu1 %vm203_vm3, %v778_v23 }
  0x37   : > { %2238 = vmatpush3.bf16.msra.mxu1 %v2718_v20  ;;  %2239 = vmatprep.mubr.msk.bf16.mxu1 %vm2603_vm2, %v2601_v1 }
  0x38   : > { %2243 = vmatprep.subr.bf16.mxu1 %v2601_v1 }
  0x39   : > { %2186 = vmatmul.mubr.msk.bf16.vlgmr.msra.gmra.mrb[0].mxu0 %vm203_vm3, %v2734_v25 }
  0x3a   : > { %2190 = vmatpush3.bf16.msra.mxu0 %v2737_v26  ;;  %2191 = vmatprep.mubr.msk.bf16.mxu0 %vm2603_vm2, %v2601_v1 }
  0x3b   : > { %2195 = vmatprep.subr.bf16.mxu0 %v2601_v1 }
  0x42   : > { %2240 = vmatmul.mubr.msk.bf16.vlgmr.msra.gmra.mrb[0].mxu1 %vm203_vm3, %v2751_v28 }
  0x43   : > { %2244 = vmatpush3.bf16.msra.mxu1 %v2737_v26  ;;  %2245 = vmatprep.mubr.msk.bf16.mxu1 %vm2603_vm2, %v2601_v1 }
  0x44   : > { %2249 = vmatprep.subr.bf16.mxu1 %v2601_v1 }
  0x45   : > { %2192 = vmatmul.mubr.msk.bf16.vlgmr.msra.gmra.mrb[0].mxu0 %vm203_vm3, %v2751_v28 }
  0x46   : > { %2196 = vmatpush3.bf16.msra.mxu0 %v2760_v31  ;;  %2197 = vmatprep.mubr.msk.bf16.mxu0 %vm2603_vm2, %v2601_v1 }
  0x47   : > { %2201 = vmatprep.subr.bf16.mxu0 %v2601_v1 }
  0x4e   : > { %2246 = vmatmul.mubr.msk.bf16.vlgmr.msra.gmra.mrb[0].mxu1 %vm203_vm3, %v2773_v35 }
  0x4f   : > { %2250 = vmatpush3.bf16.msra.mxu1 %v2760_v31  ;;  %2251 = vmatprep.mubr.msk.bf16.mxu1 %vm2603_vm2, %v2601_v1 }
  0x50   : > { %2255 = vmatprep.subr.bf16.mxu1 %v2601_v1 }
  0x51   : > { %2198 = vmatmul.mubr.msk.bf16.vlgmr.msra.gmra.mrb[0].mxu0 %vm203_vm3, %v2773_v35 }
  0x52   : > { %2202 = vmatpush3.bf16.msra.mxu0 %v2782_v38  ;;  %2203 = vmatprep.mubr.msk.bf16.mxu0 %vm2603_vm2, %v2601_v1 }
  0x53   : > { %2207 = vmatprep.subr.bf16.mxu0 %v2601_v1 }
  0x5a   : > { %2252 = vmatmul.mubr.msk.bf16.vlgmr.msra.gmra.mrb[0].mxu1 %vm203_vm3, %v2793_v41 }
  0x5b   : > { %2256 = vmatpush3.bf16.msra.mxu1 %v2782_v38  ;;  %2257 = vmatprep.mubr.msk.bf16.mxu1 %vm2603_vm2, %v2601_v1 }
  0x5c   : > { %2261 = vmatprep.subr.bf16.mxu1 %v2601_v1 }
  0x5d   : > { %2204 = vmatmul.mubr.msk.bf16.vlgmr.msra.gmra.mrb[0].mxu0 %vm203_vm3, %v2802_v43 }
  0x5e   : > { %2208 = vmatpush3.bf16.msra.mxu0 %v2805_v44  ;;  %2209 = vmatprep.mubr.msk.bf16.mxu0 %vm2603_vm2, %v2601_v1 }
  0x5f   : > { %2213 = vmatprep.subr.bf16.mxu0 %v2601_v1 }
  0x66   : > { %2258 = vmatmul.mubr.msk.bf16.vlgmr.msra.gmra.mrb[0].mxu1 %vm203_vm3, %v2819_v46 }
  0x67   : > { %2262 = vmatpush3.bf16.msra.mxu1 %v2805_v44  ;;  %2263 = vmatprep.mubr.msk.bf16.mxu1 %vm2603_vm2, %v2601_v1 }
  0x68   : > { %2267 = vmatprep.subr.bf16.mxu1 %v2601_v1 }
  0x69   : > { %2210 = vmatmul.mubr.msk.bf16.vlgmr.msra.gmra.mrb[0].mxu0 %vm203_vm3, %v2819_v46 }
  0x6a   : > { %2214 = vmatpush3.bf16.msra.mxu0 %v2828_v49  ;;  %2215 = vmatprep.mubr.msk.bf16.mxu0 %vm2603_vm2, %v2601_v1 }
  0x6b   : > { %2273 = vmatprep.subr.bf16.mxu0 %v2601_v1 }
  0x72   : > { %2264 = vmatmul.mubr.msk.bf16.vlgmr.msra.gmra.mrb[0].mxu1 %vm203_vm3, %v641_v53 }
  0x73   : > { %2268 = vmatpush3.bf16.msra.mxu1 %v2828_v49  ;;  %2269 = vmatprep.mubr.msk.bf16.mxu1 %vm2603_vm2, %v2601_v1 }
  0x74   : > { %2327 = vmatprep.subr.bf16.mxu1 %v2601_v1 }
  0x75   : > { %2216 = vmatmul.mubr.msk.bf16.vlgmr.msra.gmra.mrb[0].mxu0 %vm203_vm3, %v641_v53 }
  0x76   : > { %2274 = vmatpush3.bf16.msra.mxu0 %v2668_v5  ;;  %2275 = vmatprep.mubr.msk.bf16.mxu0 %vm2603_vm2, %v2601_v1 }
  0x77   : > { %2279 = vmatprep.subr.bf16.mxu0 %v2601_v1 }
  0x7d   : > { %2276 = vmatmul.mubr.msk.bf16.vlgmr.msra.gmra.mrb[4].mxu0 %vm203_vm3, %v2751_v28 }
  0x7e   : > { %2270 = vmatmul.mubr.msk.bf16.vlgmr.msra.gmra.mrb[0].mxu1 %vm203_vm3, %v1050_v57  ;;  %2280 = vmatpush3.bf16.msra.mxu0 %v2684_v7 }
  0x7f   : > { %2328 = vmatpush3.bf16.msra.mxu1 %v2668_v5  ;;  %2329 = vmatprep.mubr.msk.bf16.mxu1 %vm2603_vm2, %v2601_v1  ;;  %v1825_v5 = vrot.slane %v1823_v3, 1 }
  0x80   : > { %2333 = vmatprep.subr.bf16.mxu1 %v2601_v1  ;;  %2281 = vmatprep.mubr.msk.bf16.mxu0 %vm2603_vm2, %v2601_v1 }
  0x81   : > { %2285 = vmatprep.subr.bf16.mxu0 %v2601_v1  ;;  %v1826_v6 = vor.u32 %v1825_v5, %v1821_v4 }
  0x86   : > { %2330 = vmatmul.mubr.msk.bf16.vlgmr.msra.gmra.mrb[4].mxu1 %vm203_vm3, %v2773_v35 }
  0x87   : > { %2334 = vmatpush3.bf16.msra.mxu1 %v2684_v7  ;;  %2335 = vmatprep.mubr.msk.bf16.mxu1 %vm2603_vm2, %v2601_v1 }
  0x88   : > { %2339 = vmatprep.subr.bf16.mxu1 %v2601_v1 }
  0x89   : > { %2282 = vmatmul.mubr.msk.bf16.vlgmr.msra.gmra.mrb[4].mxu0 %vm203_vm3, %v2734_v25 }
  0x8a   : > { %2286 = vmatpush3.bf16.msra.mxu0 %v2702_v16  ;;  %2287 = vmatprep.mubr.msk.bf16.mxu0 %vm2603_vm2, %v2601_v1 }
  0x8b   : > { %2291 = vmatprep.subr.bf16.mxu0 %v2601_v1 }
  0x92   : > { %2336 = vmatmul.mubr.msk.bf16.vlgmr.msra.gmra.mrb[4].mxu1 %vm203_vm3, %v2751_v28  ;;  %v1885_v28 = vld [vmem:[%s190_s30] sm:$0xf] }
  0x93   : > { %2340 = vmatpush3.bf16.msra.mxu1 %v2702_v16  ;;  %2341 = vmatprep.mubr.msk.bf16.mxu1 %vm2603_vm2, %v2601_v1 }
  0x94   : > { %2345 = vmatprep.subr.bf16.mxu1 %v2601_v1 }
  0x95   : > { %2288 = vmatmul.mubr.msk.bf16.vlgmr.msra.gmra.mrb[4].mxu0 %vm203_vm3, %v2773_v35 }
  0x96   : > { %2292 = vmatpush3.bf16.msra.mxu0 %v2718_v20  ;;  %2293 = vmatprep.mubr.msk.bf16.mxu0 %vm2603_vm2, %v2601_v1 }
  0x97   : > { %2297 = vmatprep.subr.bf16.mxu0 %v2601_v1 }
  0x9e   : > { %2342 = vmatmul.mubr.msk.bf16.vlgmr.msra.gmra.mrb[4].mxu1 %vm203_vm3, %v2793_v41 }
  0x9f   : > { %2346 = vmatpush3.bf16.msra.mxu1 %v2718_v20  ;;  %2347 = vmatprep.mubr.msk.bf16.mxu1 %vm2603_vm2, %v2601_v1 }
  0xa0   : > { %2351 = vmatprep.subr.bf16.mxu1 %v2601_v1 }
  0xa1   : > { %2294 = vmatmul.mubr.msk.bf16.vlgmr.msra.gmra.mrb[4].mxu0 %vm203_vm3, %v2802_v43 }
  0xa2   : > { %2298 = vmatpush3.bf16.msra.mxu0 %v2737_v26  ;;  %2299 = vmatprep.mubr.msk.bf16.mxu0 %vm2603_vm2, %v2601_v1 }
  0xa3   : > { %2303 = vmatprep.subr.bf16.mxu0 %v2601_v1 }
  0xaa   : > { %2348 = vmatmul.mubr.msk.bf16.vlgmr.msra.gmra.mrb[4].mxu1 %vm203_vm3, %v2819_v46 }
  0xab   : > { %2352 = vmatpush3.bf16.msra.mxu1 %v2737_v26  ;;  %2353 = vmatprep.mubr.msk.bf16.mxu1 %vm2603_vm2, %v2601_v1 }
  0xac   : > { %2357 = vmatprep.subr.bf16.mxu1 %v2601_v1 }
  0xad   : > { %2300 = vmatmul.mubr.msk.bf16.vlgmr.msra.gmra.mrb[4].mxu0 %vm203_vm3, %v2819_v46 }
  0xae   : > { %2304 = vmatpush3.bf16.msra.mxu0 %v2760_v31  ;;  %2305 = vmatprep.mubr.msk.bf16.mxu0 %vm2603_vm2, %v2601_v1 }
  0xaf   : > { %2309 = vmatprep.subr.bf16.mxu0 %v2601_v1 }
  0xb6   : > { %2354 = vmatmul.mubr.msk.bf16.vlgmr.msra.gmra.mrb[4].mxu1 %vm203_vm3, %v641_v53 }
  0xb7   : > { %2358 = vmatpush3.bf16.msra.mxu1 %v2760_v31  ;;  %2359 = vmatprep.mubr.msk.bf16.mxu1 %vm2603_vm2, %v2601_v1 }
  0xb8   : > { %2363 = vmatprep.subr.bf16.mxu1 %v2601_v1 }
  0xb9   : > { %2306 = vmatmul.mubr.msk.bf16.vlgmr.msra.gmra.mrb[4].mxu0 %vm203_vm3, %v641_v53 }
  0xba   : > { %2310 = vmatpush3.bf16.msra.mxu0 %v2782_v38  ;;  %2311 = vmatprep.mubr.msk.bf16.mxu0 %vm2603_vm2, %v2601_v1 }
  0xbb   : > { %2315 = vmatprep.subr.bf16.mxu0 %v2601_v1 }
  0xc2   : > { %2360 = vmatmul.mubr.msk.bf16.vlgmr.msra.gmra.mrb[4].mxu1 %vm203_vm3, %v1050_v57 }
  0xc3   : > { %2364 = vmatpush3.bf16.msra.mxu1 %v2782_v38  ;;  %2365 = vmatprep.mubr.msk.bf16.mxu1 %vm2603_vm2, %v2601_v1 }
  0xc4   : > { %2369 = vmatprep.subr.bf16.mxu1 %v2601_v1 }
  0xc5   : > { %2312 = vmatmul.mubr.msk.bf16.vlgmr.msra.gmra.mrb[4].mxu0 %vm203_vm3, %v2063_v58 }
  0xc6   : > { %2316 = vmatpush3.bf16.msra.mxu0 %v2805_v44  ;;  %2317 = vmatprep.mubr.msk.bf16.mxu0 %vm2603_vm2, %v2601_v1 }
  0xc7   : > { %2321 = vmatprep.subr.bf16.mxu0 %v2601_v1 }
  0xce   : > { %2366 = vmatmul.mubr.msk.bf16.vlgmr.msra.gmra.mrb[4].mxu1 %vm203_vm3, %v2067_v60 }
  0xcf   : > { %2370 = vmatpush3.bf16.msra.mxu1 %v2805_v44  ;;  %2371 = vmatprep.mubr.msk.bf16.mxu1 %vm2603_vm2, %v2601_v1 }
  0xd0   : > { %2375 = vmatprep.subr.bf16.mxu1 %v2601_v1 }
  0xd1   : > { %2318 = vmatmul.mubr.msk.bf16.vlgmr.msra.gmra.mrb[4].mxu0 %vm203_vm3, %v2067_v60 }
  0xd2   : > { %2322 = vmatpush3.bf16.msra.mxu0 %v2828_v49  ;;  %2323 = vmatprep.mubr.msk.bf16.mxu0 %vm2603_vm2, %v2601_v1 }
  0xda   : > { %2372 = vmatmul.mubr.msk.bf16.vlgmr.msra.gmra.mrb[4].mxu1 %vm203_vm3, %v1445_v0 }
  0xdb   : > { %2376 = vmatpush3.bf16.msra.mxu1 %v2828_v49  ;;  %2377 = vmatprep.mubr.msk.bf16.mxu1 %vm2603_vm2, %v2601_v1 }
  0xdd   : > { %2324 = vmatmul.mubr.msk.bf16.vlgmr.msra.gmra.mrb[4].mxu0 %vm203_vm3, %v1445_v0 }
  0xe6   : > { %2378 = vmatmul.mubr.msk.bf16.vlgmr.msra.gmra.mrb[4].mxu1 %vm203_vm3, %v1826_v6 }
 0x148   : > { %v682_v7 = vpop.f32.mrb[0].mxu0 }
 0x149   : > { %v2217_v8 = vpop.f32.mrb[1].mxu0 }
 0x14a   : > { %v685_v9 = vpop.f32.mrb[2].mxu0 }
 0x14b   : > { %v2218_v10 = vpop.f32.mrb[3].mxu0 }
 0x151   : > { %v1088_v11 = vpop.f32.mrb[0].mxu1 }
 0x152   : > { %v1095_v12 = vmax.f32 %v682_v7, %v1088_v11  ;;  %v2271_v13 = vpop.f32.mrb[1].mxu1 }
 0x153   : > { %v1091_v14 = vpop.f32.mrb[2].mxu1 }
 0x154   : > { %v2272_v15 = vpop.f32.mrb[3].mxu1 }
 0x1b0   : > { %v1483_v1 = vpop.f32.mrb[4].mxu0 }
 0x1b1   : > { %v1490_v16 = vmax.f32 %v1095_v12, %v1483_v1  ;;  %v2325_v17 = vpop.f32.mrb[5].mxu0 }
 0x1b2   : > { %v1486_v18 = vpop.f32.mrb[6].mxu0 }
 0x1b3   : > { %v2326_v19 = vpop.f32.mrb[7].mxu0 }
 0x1b9   : > { %v1864_v20 = vpop.f32.mrb[4].mxu1 }
 0x1ba   : > { %v1871_v22 = vmax.f32 %v1490_v16, %v1864_v20  ;;  %v2379_v23 = vpop.f32.mrb[5].mxu1 }
 0x1bb   : > { %v1867_v24 = vpop.f32.mrb[6].mxu1 }
 0x1bc   : > { %v1879_v25 = vadd.f32 %v2081_v21, %v1871_v22  ;;  %v2380_v26 = vpop.f32.mrb[7].mxu1 }
 0x1be   : > { %v1880_v27 = vmax.f32 %v1879_v25, 0.0 }
 0x1c0   : > { %v1881_v29 = vpack.c.bf16 %v1880_v27, %v1880_v27 }
 0x1c2   : > { %v1886_v30 = vsel %vm1884_vm6, %v1881_v29, %v1885_v28 }
 0x1c3   : > { %1887 = vst [vmem:[%s190_s30] sm:$0xf] %v1886_v30 }
 0x1c4 PF: > { %s13_s16 = sadd.s32 1, %s2599_s16   ;;  %s2975_s12 = smov %s2591_s14 }
 0x1c5   : > { %p10_p7 = scmp.ge.s32.totalorder %s13_s16, 16   ;;  %s2976_s13 = smov %s2595_s15 }
 0x1c6   : > { %s2977_s14 = smov %s2980_s17  ;;  %s2978_s15 = smov %s2984_s18 }
 0x1c7   :  { %12 = sbr.rel (!%p10_p7) target bundleno = 3 (0x3), region = 78 }

// kernel: forward.4
= control target key start
LH: loop header
LB: loop body
LE: loop exit
PB: predicated region body
PF: predicated region fallthrough
CT: control target
= control target key end

     0   :  { %s4142_s12 = smov 0   ;;  %s4144_s13 = smov 0   ;;  %s5257_s0 = inlined_call_operand.vmem [shape: bf16[2,2,7,4,128], index: 0, kind: input, shape index: {}]   ;;  %s5258_s1 = inlined_call_operand.vmem [shape: bf16[9,128,128], index: 1, kind: input, shape index: {}]   ;;  %s5259_s2 = inlined_call_operand.vmem [shape: f32[1,128], index: 2, kind: input, shape index: {}]   ;;  %s5260_s3 = inlined_call_operand.vmem [shape: bf16[2,2,2,128], index: 3, kind: output, shape index: {}]  }
   0x1   :  { %s4146_s14 = smov 0   ;;  %s4148_s15 = smov 0  }
   0x2   :  { %s4150_s16 = smov 0  }
   0x3 LB: > { %s22_s17 = sadd.s32 1, %s4110_s14  ;;  %s25_s18 = sadd.s32 1, %s4114_s15  ;;  %s4118_s16 = sphi %s4150_s16, %s13_s16   ;;  %s4114_s15 = sphi %s4148_s15, %s5312_s15   ;;  %s4110_s14 = sphi %s4146_s14, %s5311_s14   ;;  %s4106_s13 = sphi %s4144_s13, %s5310_s13   ;;  %s4102_s12 = sphi %s4142_s12, %s5309_s12  }
   0x4   : > { %p23_p0 = scmp.ge.s32.totalorder %s22_s17, 2  ;;  %p2532_p1 = scmp.ge.s32.totalorder %s4118_s16, 1 }
   0x5   : > { %p151_p2 = scmp.lt.s32.totalorder %s4118_s16, 5 }
   0x6   : > { %s5314_s17 = smov (%p23_p0, %s22_s17), 0  ;;  %s5316_s18 = smov (!%p23_p0, %s25_s18), %s4114_s15 }
   0x7   : > { %p152_p3 = pnand %p2532_p1, %p151_p2  ;;  %p27_p4 = scmp.ge.s32.totalorder %s5316_s18, 2 }
   0x9   : > { %s5318_s18 = smov (%p27_p4, %s5316_s18), 0  ;;  %155 = sbr.rel (%p152_p3) target bundleno = 816 (0x330), region = 32 }
  0x10   : > { %v3999_v0 = vld [vmem:[%s5258_s1 + $0x40] sm:$0xff]   ;;  %v4120_v1 = vmov 0.0   ;;  %v4000_v2 = vld [vmem:[%s5258_s1 + $0x48] sm:$0xff]   ;;  %p177_p5 = scmp.lt.s32.totalorder %s4106_s13, 1  ;;  %vm4121_vm0 = vmmov 0   ;;  %v4001_v3 = vld [vmem:[%s5258_s1 + $0x50] sm:$0xff]  }
  0x11   : > { %3108 = vmatprep.subr.bf16.mxu0 %v4120_v1  ;;  %3288 = vmatprep.subr.bf16.mxu1 %v4120_v1  ;;  %v4002_v4 = vld [vmem:[%s5258_s1 + $0x58] sm:$0xff]   ;;  %s2776_s4 = sshll.u32 %s4102_s12, 2  ;;  %v4003_v5 = vld [vmem:[%s5258_s1 + $0x60] sm:$0xff]   ;;  %v4004_v7 = vld [vmem:[%s5258_s1 + $0x68] sm:$0xff]   ;;  %p184_p6 = scmp.lt.s32.totalorder %s4102_s12, 1 }
  0x12   : > { %3109 = vmatpush3.bf16.msra.mxu0 %v3999_v0  ;;  %3289 = vmatpush3.bf16.msra.mxu1 %v3999_v0  ;;  %s5320_s13 = smov (!%p177_p5, %s4106_s13), 1  ;;  %v4005_v9 = vld [vmem:[%s5258_s1 + $0x70] sm:$0xff]   ;;  %v4006_v12 = vld [vmem:[%s5258_s1 + $0x78] sm:$0xff]   ;;  %v4007_v13 = vld [vmem:[%s5258_s1] sm:$0xff]  }
  0x13   : > { %3110 = vmatprep.subr.bf16.mxu0 %v4120_v1  ;;  %3290 = vmatprep.subr.bf16.mxu1 %v4120_v1  ;;  %s3956_s25 = smul.u32 28, %s5320_s13  ;;  %v4240_v16 = vld [vmem:[%s5258_s1 + $0x8] sm:$0xff]   ;;  %v4253_v17 = vld [vmem:[%s5258_s1 + $0x10] sm:$0xff]   ;;  %v4262_v18 = vld [vmem:[%s5258_s1 + $0x18] sm:$0xff]   ;;  %s5322_s12 = smov (!%p184_p6, %s4102_s12), 1 }
  0x14   : > { %3124 = vmatprep.mubr.msk.bf16.mxu0 %vm4121_vm0, %v4120_v1  ;;  %3304 = vmatprep.mubr.msk.bf16.mxu1 %vm4121_vm0, %v4120_v1  ;;  %v4269_v19 = vld [vmem:[%s5258_s1 + $0x20] sm:$0xff]   ;;  %v4278_v20 = vld [vmem:[%s5258_s1 + $0x28] sm:$0xff]   ;;  %v4287_v21 = vld [vmem:[%s5258_s1 + $0x30] sm:$0xff]  }
  0x15   : > { %s181_s30 = scalar_lea.vmem %s5257_s0, %s3956_s25  ;;  %v4296_v22 = vld [vmem:[%s5258_s1 + $0x38] sm:$0xff]   ;;  %v4308_v24 = vld [vmem:[%s5258_s1 + $0x80] sm:$0xff]   ;;  %v4315_v25 = vld [vmem:[%s5258_s1 + $0x88] sm:$0xff]  }
  0x16   : > { %3111 = vmatpush3.bf16.msra.mxu0 %v4000_v2  ;;  %3291 = vmatpush3.bf16.msra.mxu1 %v4000_v2  ;;  %s4208_s7 = scalar_lea.vmem %s181_s30, %s2776_s4  ;;  %v4330_v26 = vld [vmem:[%s5258_s1 + $0x90] sm:$0xff]   ;;  %v4339_v27 = vld [vmem:[%s5258_s1 + $0x98] sm:$0xff]   ;;  %v4348_v28 = vld [vmem:[%s5258_s1 + $0xa0] sm:$0xff]  }
  0x17   : > { %3112 = vmatprep.subr.bf16.mxu0 %v4120_v1  ;;  %3292 = vmatprep.subr.bf16.mxu1 %v4120_v1  ;;  %v2588_v6 = vld.sshfl [vmem:[%s4208_s7] sm:$0x3 pattern:$0x76325410]  ;;  %v2539_v15 = vld [vmem:[%s4208_s7 + $0xe] sm:$0x1] }
  0x18   : > { %v436_v8 = vshll.u32 %v2588_v6, 16  ;;  %v434_v10 = vshrl.u32 %v2588_v6, 16  ;;  %v193_v23 = vld [vmem:[%s4208_s7] sm:$0x1]  ;;  %v4357_v29 = vld [vmem:[%s5258_s1 + $0xa8] sm:$0xff]   ;;  %v4367_v32 = vld [vmem:[%s5258_s1 + $0xb0] sm:$0xff]  }
  0x19   : > { %v2758_v30 = vld.sshfl [vmem:[%s4208_s7 + $0xe] sm:$0x3 pattern:$0x76325410]  ;;  %v4376_v35 = vld [vmem:[%s5258_s1 + $0xb8] sm:$0xff]   ;;  %v4385_v37 = vld [vmem:[%s5258_s1 + $0xc0] sm:$0xff]  }
  0x1a   : > { %3113 = vmatpush3.bf16.msra.mxu0 %v4001_v3  ;;  %3293 = vmatpush3.bf16.msra.mxu1 %v4001_v3  ;;  %v438_v11 = vrot.slane %v436_v8, 1  ;;  %v1308_v31 = vshll.u32 %v2758_v30, 16  ;;  %v1306_v33 = vshrl.u32 %v2758_v30, 16  ;;  %v4395_v38 = vld [vmem:[%s5258_s1 + $0xc8] sm:$0xff]   ;;  %v4408_v39 = vld [vmem:[%s5258_s1 + $0xd0] sm:$0xff]   ;;  %v4417_v40 = vld [vmem:[%s5258_s1 + $0xd8] sm:$0xff]  }
  0x1b   : > { %3114 = vmatprep.subr.bf16.mxu0 %v4120_v1  ;;  %3294 = vmatprep.subr.bf16.mxu1 %v4120_v1  ;;  %v4426_v41 = vld [vmem:[%s5258_s1 + $0xe0] sm:$0xff]   ;;  %v4435_v42 = vld [vmem:[%s5258_s1 + $0xe8] sm:$0xff]   ;;  %v4444_v43 = vld [vmem:[%s5258_s1 + $0xf0] sm:$0xff]  }
  0x1c   : > { %v4231_v14 = vor.u32 %v438_v11, %v434_v10  ;;  %v1310_v34 = vrot.slane %v1308_v31, 1  ;;  %v4453_v44 = vld [vmem:[%s5258_s1 + $0xf8] sm:$0xff]   ;;  %v4460_v45 = vld [vmem:[%s4208_s7 + $0x2] sm:$0x1]  ;;  %v4468_v47 = vld [vmem:[%s4208_s7 + $0x10] sm:$0x1] }
  0x1d   : > { %v4465_v46 = vld [vmem:[%s5258_s1 + $0x100] sm:$0xff]   ;;  %v4479_v48 = vld [vmem:[%s5258_s1 + $0x108] sm:$0xff]   ;;  %v4492_v49 = vld [vmem:[%s5258_s1 + $0x110] sm:$0xff]  }
  0x1e   : > { %3115 = vmatpush3.bf16.msra.mxu0 %v4002_v4  ;;  %3295 = vmatpush3.bf16.msra.mxu1 %v4002_v4  ;;  %v1311_v36 = vor.u32 %v1310_v34, %v1306_v33  ;;  %v4501_v50 = vld [vmem:[%s5258_s1 + $0x118] sm:$0xff]   ;;  %v4510_v51 = vld [vmem:[%s5258_s1 + $0x120] sm:$0xff]   ;;  %v4519_v52 = vld [vmem:[%s5258_s1 + $0x128] sm:$0xff]  }
  0x1f   : > { %3116 = vmatprep.subr.bf16.mxu0 %v4120_v1  ;;  %3296 = vmatprep.subr.bf16.mxu1 %v4120_v1  ;;  %v2668_v53 = vld.sshfl [vmem:[%s4208_s7 + $0x2] sm:$0x3 pattern:$0x76325410]  ;;  %v4529_v55 = vld [vmem:[%s5258_s1 + $0x130] sm:$0xff]   ;;  %v4538_v58 = vld [vmem:[%s5258_s1 + $0x138] sm:$0xff]  }
  0x20   : > { %v779_v54 = vshll.u32 %v2668_v53, 16  ;;  %v777_v56 = vshrl.u32 %v2668_v53, 16  ;;  %v4549_v60 = vld [vmem:[%s5258_s1 + $0x140] sm:$0xff]   ;;  %v4560_v61 = vld [vmem:[%s5258_s1 + $0x148] sm:$0xff]   ;;  %v4573_v62 = vld [vmem:[%s5258_s1 + $0x150] sm:$0xff]  }
  0x21   : > { %v4582_v63 = vld [vmem:[%s5258_s1 + $0x158] sm:$0xff]   ;;  %v4591_v0 = vld [vmem:[%s5258_s1 + $0x160] sm:$0xff]   ;;  %v4600_v2 = vld [vmem:[%s5258_s1 + $0x168] sm:$0xff]  }
  0x22   : > { %3117 = vmatpush3.bf16.msra.mxu0 %v4003_v5  ;;  %3297 = vmatpush3.bf16.msra.mxu1 %v4003_v5  ;;  %v781_v57 = vrot.slane %v779_v54, 1  ;;  %v2760_v3 = vld.sshfl [vmem:[%s4208_s7 + $0x10] sm:$0x3 pattern:$0x76325410]  ;;  %v4619_v8 = vld [vmem:[%s5258_s1 + $0x178] sm:$0xff]  }
  0x23   : > { %3118 = vmatprep.subr.bf16.mxu0 %v4120_v1  ;;  %3298 = vmatprep.subr.bf16.mxu1 %v4120_v1  ;;  %v1448_v4 = vshll.u32 %v2760_v3, 16  ;;  %v4610_v5 = vld [vmem:[%s5258_s1 + $0x170] sm:$0xff]   ;;  %v1446_v6 = vshrl.u32 %v2760_v3, 16  ;;  %v4630_v10 = vld [vmem:[%s5258_s1 + $0x180] sm:$0xff]   ;;  %v4641_v11 = vld [vmem:[%s5258_s1 + $0x188] sm:$0xff]  }
  0x24   : > { %v4542_v59 = vor.u32 %v781_v57, %v777_v56  ;;  %v4699_v30 = vld [vmem:[%s5258_s1 + $0x1b8] sm:$0xff]   ;;  %v4706_v31 = vld [vmem:[%s4208_s7 + $0x4] sm:$0x1]  ;;  %v4714_v34 = vld [vmem:[%s4208_s7 + $0x12] sm:$0x1] }
  0x25   : > { %v4711_v33 = vld [vmem:[%s5258_s1 + $0x1c0] sm:$0xff]   ;;  %v4738_v53 = vld [vmem:[%s5258_s1 + $0x1d0] sm:$0xff]   ;;  %v4747_v54 = vld [vmem:[%s5258_s1 + $0x1d8] sm:$0xff]  }
  0x26   : > { %3119 = vmatpush3.bf16.msra.mxu0 %v4004_v7  ;;  %3299 = vmatpush3.bf16.msra.mxu1 %v4004_v7  ;;  %v1450_v7 = vrot.slane %v1448_v4, 1  ;;  %5285 = vst [vmem:[#allocation2_spill] sm:$0xff] %v4738_v53  ;;  %5286 = vst [vmem:[#allocation3_spill] sm:$0xff] %v4747_v54  ;;  %v4756_v56 = vld [vmem:[%s5258_s1 + $0x1e0] sm:$0xff]   ;;  %v4765_v57 = vld [vmem:[%s5258_s1 + $0x1e8] sm:$0xff]  }
  0x27   : > { %3120 = vmatprep.subr.bf16.mxu0 %v4120_v1  ;;  %3300 = vmatprep.subr.bf16.mxu1 %v4120_v1  ;;  %5287 = vst [vmem:[#allocation4_spill] sm:$0xff] %v4756_v56  ;;  %5288 = vst [vmem:[#allocation5_spill] sm:$0xff] %v4765_v57  ;;  %v2748_v3 = vld.sshfl [vmem:[%s4208_s7 + $0x4] sm:$0x3 pattern:$0x76325410] }
  0x28   : > { %v1122_v4 = vshll.u32 %v2748_v3, 16 }
  0x2a   : > { %3121 = vmatpush3.bf16.msra.mxu0 %v4005_v9  ;;  %3301 = vmatpush3.bf16.msra.mxu1 %v4005_v9  ;;  %v4623_v9 = vor.u32 %v1450_v7, %v1446_v6  ;;  %v4775_v6 = vld [vmem:[%s5258_s1 + $0x1f0] sm:$0xff]   ;;  %v1120_v7 = vshrl.u32 %v2748_v3, 16  ;;  %v4795_v3 = vld [vmem:[%s5258_s1 + $0x200] sm:$0xff]  }
  0x2b   : > { %3122 = vmatprep.subr.bf16.mxu0 %v4120_v1  ;;  %3302 = vmatprep.subr.bf16.mxu1 %v4120_v1  ;;  %5289 = vst [vmem:[#allocation6_spill] sm:$0xff] %v4775_v6  ;;  %5291 = vst [vmem:[#allocation8_spill] sm:$0xff] %v4795_v3 }
  0x2e   : > { %3123 = vmatpush3.bf16.msra.mxu0 %v4006_v12  ;;  %3303 = vmatpush3.bf16.msra.mxu1 %v4006_v12  ;;  %v4654_v12 = vld [vmem:[%s5258_s1 + $0x190] sm:$0xff]  }
  0x2f   : > { %3128 = vmatprep.subr.bf16.mxu0 %v4120_v1  ;;  %3308 = vmatprep.subr.bf16.mxu1 %v4120_v1 }
  0x31   : > { %3125 = vmatmul.mubr.bf16.vlgmr.msra.gmra.mrb[0].mxu0 %v2539_v15  ;;  %3305 = vmatmul.mubr.bf16.vlgmr.msra.gmra.mrb[0].mxu1 %v4231_v14 }
  0x32   : > { %3129 = vmatpush3.bf16.msra.mxu0 %v4007_v13  ;;  %3309 = vmatpush3.bf16.msra.mxu1 %v4007_v13  ;;  %v4663_v13 = vld [vmem:[%s5258_s1 + $0x198] sm:$0xff]  }
  0x33   : > { %3130 = vmatprep.subr.bf16.mxu0 %v4120_v1  ;;  %3310 = vmatprep.subr.bf16.mxu1 %v4120_v1 }
  0x34   : > { %3144 = vmatprep.mubr.msk.bf16.mxu0 %vm4121_vm0, %v4120_v1  ;;  %3324 = vmatprep.mubr.msk.bf16.mxu1 %vm4121_vm0, %v4120_v1 }
  0x36   : > { %3131 = vmatpush3.bf16.msra.mxu0 %v4240_v16  ;;  %3311 = vmatpush3.bf16.msra.mxu1 %v4240_v16 }
  0x37   : > { %3132 = vmatprep.subr.bf16.mxu0 %v4120_v1  ;;  %3312 = vmatprep.subr.bf16.mxu1 %v4120_v1 }
  0x3a   : > { %3133 = vmatpush3.bf16.msra.mxu0 %v4253_v17  ;;  %3313 = vmatpush3.bf16.msra.mxu1 %v4253_v17 }
  0x3b   : > { %3134 = vmatprep.subr.bf16.mxu0 %v4120_v1  ;;  %3314 = vmatprep.subr.bf16.mxu1 %v4120_v1 }
  0x3e   : > { %3135 = vmatpush3.bf16.msra.mxu0 %v4262_v18  ;;  %3315 = vmatpush3.bf16.msra.mxu1 %v4262_v18 }
  0x3f   : > { %3136 = vmatprep.subr.bf16.mxu0 %v4120_v1  ;;  %3316 = vmatprep.subr.bf16.mxu1 %v4120_v1 }
  0x42   : > { %3137 = vmatpush3.bf16.msra.mxu0 %v4269_v19  ;;  %3317 = vmatpush3.bf16.msra.mxu1 %v4269_v19 }
  0x43   : > { %3138 = vmatprep.subr.bf16.mxu0 %v4120_v1  ;;  %3318 = vmatprep.subr.bf16.mxu1 %v4120_v1 }
  0x46   : > { %3139 = vmatpush3.bf16.msra.mxu0 %v4278_v20  ;;  %3319 = vmatpush3.bf16.msra.mxu1 %v4278_v20 }
  0x47   : > { %3140 = vmatprep.subr.bf16.mxu0 %v4120_v1  ;;  %3320 = vmatprep.subr.bf16.mxu1 %v4120_v1 }
  0x4a   : > { %3141 = vmatpush3.bf16.msra.mxu0 %v4287_v21  ;;  %3321 = vmatpush3.bf16.msra.mxu1 %v4287_v21 }
  0x4b   : > { %3142 = vmatprep.subr.bf16.mxu0 %v4120_v1  ;;  %3322 = vmatprep.subr.bf16.mxu1 %v4120_v1 }
  0x4e   : > { %3143 = vmatpush3.bf16.msra.mxu0 %v4296_v22  ;;  %3323 = vmatpush3.bf16.msra.mxu1 %v4296_v22 }
  0x4f   : > { %3148 = vmatprep.subr.bf16.mxu0 %v4120_v1  ;;  %3328 = vmatprep.subr.bf16.mxu1 %v4120_v1 }
  0x51   : > { %3145 = vmatmul.mubr.bf16.vlgmr.msra.gmra.mrb[0].mxu0 %v193_v23  ;;  %3325 = vmatmul.mubr.bf16.vlgmr.msra.gmra.mrb[0].mxu1 %v2539_v15  ;;  %v4681_v15 = vld [vmem:[%s5258_s1 + $0x1a8] sm:$0xff]   ;;  %v4690_v23 = vld [vmem:[%s5258_s1 + $0x1b0] sm:$0xff]  }
  0x52   : > { %3149 = vmatpush3.bf16.msra.mxu0 %v4308_v24  ;;  %3329 = vmatpush3.bf16.msra.mxu1 %v4308_v24 }
  0x53   : > { %3150 = vmatprep.subr.bf16.mxu0 %v4120_v1  ;;  %3330 = vmatprep.subr.bf16.mxu1 %v4120_v1 }
  0x54   : > { %3164 = vmatprep.mubr.msk.bf16.mxu0 %vm4121_vm0, %v4120_v1  ;;  %3344 = vmatprep.mubr.msk.bf16.mxu1 %vm4121_vm0, %v4120_v1 }
  0x56   : > { %3151 = vmatpush3.bf16.msra.mxu0 %v4315_v25  ;;  %3331 = vmatpush3.bf16.msra.mxu1 %v4315_v25 }
  0x57   : > { %3152 = vmatprep.subr.bf16.mxu0 %v4120_v1  ;;  %3332 = vmatprep.subr.bf16.mxu1 %v4120_v1 }
  0x5a   : > { %3153 = vmatpush3.bf16.msra.mxu0 %v4330_v26  ;;  %3333 = vmatpush3.bf16.msra.mxu1 %v4330_v26 }
  0x5b   : > { %3154 = vmatprep.subr.bf16.mxu0 %v4120_v1  ;;  %3334 = vmatprep.subr.bf16.mxu1 %v4120_v1 }
  0x5e   : > { %3155 = vmatpush3.bf16.msra.mxu0 %v4339_v27  ;;  %3335 = vmatpush3.bf16.msra.mxu1 %v4339_v27 }
  0x5f   : > { %3156 = vmatprep.subr.bf16.mxu0 %v4120_v1  ;;  %3336 = vmatprep.subr.bf16.mxu1 %v4120_v1 }
  0x62   : > { %3157 = vmatpush3.bf16.msra.mxu0 %v4348_v28  ;;  %3337 = vmatpush3.bf16.msra.mxu1 %v4348_v28 }
  0x63   : > { %3158 = vmatprep.subr.bf16.mxu0 %v4120_v1  ;;  %3338 = vmatprep.subr.bf16.mxu1 %v4120_v1 }
  0x66   : > { %3159 = vmatpush3.bf16.msra.mxu0 %v4357_v29  ;;  %3339 = vmatpush3.bf16.msra.mxu1 %v4357_v29 }
  0x67   : > { %3160 = vmatprep.subr.bf16.mxu0 %v4120_v1  ;;  %3340 = vmatprep.subr.bf16.mxu1 %v4120_v1 }
  0x6a   : > { %3161 = vmatpush3.bf16.msra.mxu0 %v4367_v32  ;;  %3341 = vmatpush3.bf16.msra.mxu1 %v4367_v32 }
  0x6b   : > { %3162 = vmatprep.subr.bf16.mxu0 %v4120_v1  ;;  %3342 = vmatprep.subr.bf16.mxu1 %v4120_v1 }
  0x6e   : > { %3163 = vmatpush3.bf16.msra.mxu0 %v4376_v35  ;;  %3343 = vmatpush3.bf16.msra.mxu1 %v4376_v35 }
  0x6f   : > { %3168 = vmatprep.subr.bf16.mxu0 %v4120_v1  ;;  %3348 = vmatprep.subr.bf16.mxu1 %v4120_v1 }
  0x71   : > { %3165 = vmatmul.mubr.bf16.vlgmr.msra.gmra.mrb[0].mxu0 %v4231_v14  ;;  %3345 = vmatmul.mubr.bf16.vlgmr.msra.gmra.mrb[0].mxu1 %v1311_v36  ;;  %v4672_v14 = vld [vmem:[%s5258_s1 + $0x1a0] sm:$0xff]   ;;  %v4725_v36 = vld [vmem:[%s5258_s1 + $0x1c8] sm:$0xff]  }
  0x72   : > { %3169 = vmatpush3.bf16.msra.mxu0 %v4385_v37  ;;  %3349 = vmatpush3.bf16.msra.mxu1 %v4385_v37 }
  0x73   : > { %3170 = vmatprep.subr.bf16.mxu0 %v4120_v1  ;;  %3350 = vmatprep.subr.bf16.mxu1 %v4120_v1 }
  0x74   : > { %3184 = vmatprep.mubr.msk.bf16.mxu0 %vm4121_vm0, %v4120_v1  ;;  %3364 = vmatprep.mubr.msk.bf16.mxu1 %vm4121_vm0, %v4120_v1 }
  0x76   : > { %3171 = vmatpush3.bf16.msra.mxu0 %v4395_v38  ;;  %3351 = vmatpush3.bf16.msra.mxu1 %v4395_v38 }
  0x77   : > { %3172 = vmatprep.subr.bf16.mxu0 %v4120_v1  ;;  %3352 = vmatprep.subr.bf16.mxu1 %v4120_v1 }
  0x7a   : > { %3173 = vmatpush3.bf16.msra.mxu0 %v4408_v39  ;;  %3353 = vmatpush3.bf16.msra.mxu1 %v4408_v39 }
  0x7b   : > { %3174 = vmatprep.subr.bf16.mxu0 %v4120_v1  ;;  %3354 = vmatprep.subr.bf16.mxu1 %v4120_v1 }
  0x7e   : > { %3175 = vmatpush3.bf16.msra.mxu0 %v4417_v40  ;;  %3355 = vmatpush3.bf16.msra.mxu1 %v4417_v40 }
  0x7f   : > { %3176 = vmatprep.subr.bf16.mxu0 %v4120_v1  ;;  %3356 = vmatprep.subr.bf16.mxu1 %v4120_v1 }
  0x82   : > { %3177 = vmatpush3.bf16.msra.mxu0 %v4426_v41  ;;  %3357 = vmatpush3.bf16.msra.mxu1 %v4426_v41 }
  0x83   : > { %3178 = vmatprep.subr.bf16.mxu0 %v4120_v1  ;;  %3358 = vmatprep.subr.bf16.mxu1 %v4120_v1 }
  0x86   : > { %3179 = vmatpush3.bf16.msra.mxu0 %v4435_v42  ;;  %3359 = vmatpush3.bf16.msra.mxu1 %v4435_v42 }
  0x87   : > { %3180 = vmatprep.subr.bf16.mxu0 %v4120_v1  ;;  %3360 = vmatprep.subr.bf16.mxu1 %v4120_v1 }
  0x8a   : > { %3181 = vmatpush3.bf16.msra.mxu0 %v4444_v43  ;;  %3361 = vmatpush3.bf16.msra.mxu1 %v4444_v43 }
  0x8b   : > { %3182 = vmatprep.subr.bf16.mxu0 %v4120_v1  ;;  %3362 = vmatprep.subr.bf16.mxu1 %v4120_v1 }
  0x8e   : > { %3183 = vmatpush3.bf16.msra.mxu0 %v4453_v44  ;;  %3363 = vmatpush3.bf16.msra.mxu1 %v4453_v44 }
  0x8f   : > { %3188 = vmatprep.subr.bf16.mxu0 %v4120_v1  ;;  %3368 = vmatprep.subr.bf16.mxu1 %v4120_v1 }
  0x91   : > { %3185 = vmatmul.mubr.bf16.vlgmr.msra.gmra.mrb[0].mxu0 %v4460_v45  ;;  %3365 = vmatmul.mubr.bf16.vlgmr.msra.gmra.mrb[0].mxu1 %v4468_v47 }
  0x92   : > { %3189 = vmatpush3.bf16.msra.mxu0 %v4465_v46  ;;  %3369 = vmatpush3.bf16.msra.mxu1 %v4465_v46 }
  0x93   : > { %3190 = vmatprep.subr.bf16.mxu0 %v4120_v1  ;;  %3370 = vmatprep.subr.bf16.mxu1 %v4120_v1 }
  0x94   : > { %3204 = vmatprep.mubr.msk.bf16.mxu0 %vm4121_vm0, %v4120_v1  ;;  %3384 = vmatprep.mubr.msk.bf16.mxu1 %vm4121_vm0, %v4120_v1 }
  0x96   : > { %3191 = vmatpush3.bf16.msra.mxu0 %v4479_v48  ;;  %3371 = vmatpush3.bf16.msra.mxu1 %v4479_v48 }
  0x97   : > { %3192 = vmatprep.subr.bf16.mxu0 %v4120_v1  ;;  %3372 = vmatprep.subr.bf16.mxu1 %v4120_v1 }
  0x9a   : > { %3193 = vmatpush3.bf16.msra.mxu0 %v4492_v49  ;;  %3373 = vmatpush3.bf16.msra.mxu1 %v4492_v49 }
  0x9b   : > { %3194 = vmatprep.subr.bf16.mxu0 %v4120_v1  ;;  %3374 = vmatprep.subr.bf16.mxu1 %v4120_v1 }
  0x9e   : > { %3195 = vmatpush3.bf16.msra.mxu0 %v4501_v50  ;;  %3375 = vmatpush3.bf16.msra.mxu1 %v4501_v50 }
  0x9f   : > { %3196 = vmatprep.subr.bf16.mxu0 %v4120_v1  ;;  %3376 = vmatprep.subr.bf16.mxu1 %v4120_v1 }
  0xa2   : > { %3197 = vmatpush3.bf16.msra.mxu0 %v4510_v51  ;;  %3377 = vmatpush3.bf16.msra.mxu1 %v4510_v51 }
  0xa3   : > { %3198 = vmatprep.subr.bf16.mxu0 %v4120_v1  ;;  %3378 = vmatprep.subr.bf16.mxu1 %v4120_v1 }
  0xa6   : > { %3199 = vmatpush3.bf16.msra.mxu0 %v4519_v52  ;;  %3379 = vmatpush3.bf16.msra.mxu1 %v4519_v52 }
  0xa7   : > { %3200 = vmatprep.subr.bf16.mxu0 %v4120_v1  ;;  %3380 = vmatprep.subr.bf16.mxu1 %v4120_v1 }
  0xaa   : > { %3201 = vmatpush3.bf16.msra.mxu0 %v4529_v55  ;;  %3381 = vmatpush3.bf16.msra.mxu1 %v4529_v55 }
  0xab   : > { %3202 = vmatprep.subr.bf16.mxu0 %v4120_v1  ;;  %3382 = vmatprep.subr.bf16.mxu1 %v4120_v1 }
  0xae   : > { %3203 = vmatpush3.bf16.msra.mxu0 %v4538_v58  ;;  %3383 = vmatpush3.bf16.msra.mxu1 %v4538_v58 }
  0xaf   : > { %3208 = vmatprep.subr.bf16.mxu0 %v4120_v1  ;;  %3388 = vmatprep.subr.bf16.mxu1 %v4120_v1 }
  0xb1   : > { %3205 = vmatmul.mubr.bf16.vlgmr.msra.gmra.mrb[0].mxu0 %v4468_v47  ;;  %3385 = vmatmul.mubr.bf16.vlgmr.msra.gmra.mrb[0].mxu1 %v4542_v59 }
  0xb2   : > { %3209 = vmatpush3.bf16.msra.mxu0 %v4549_v60  ;;  %3389 = vmatpush3.bf16.msra.mxu1 %v4549_v60 }
  0xb3   : > { %3210 = vmatprep.subr.bf16.mxu0 %v4120_v1  ;;  %3390 = vmatprep.subr.bf16.mxu1 %v4120_v1 }
  0xb4   : > { %3224 = vmatprep.mubr.msk.bf16.mxu0 %vm4121_vm0, %v4120_v1  ;;  %3404 = vmatprep.mubr.msk.bf16.mxu1 %vm4121_vm0, %v4120_v1 }
  0xb6   : > { %3211 = vmatpush3.bf16.msra.mxu0 %v4560_v61  ;;  %3391 = vmatpush3.bf16.msra.mxu1 %v4560_v61 }
  0xb7   : > { %3212 = vmatprep.subr.bf16.mxu0 %v4120_v1  ;;  %3392 = vmatprep.subr.bf16.mxu1 %v4120_v1 }
  0xba   : > { %3213 = vmatpush3.bf16.msra.mxu0 %v4573_v62  ;;  %3393 = vmatpush3.bf16.msra.mxu1 %v4573_v62 }
  0xbb   : > { %3214 = vmatprep.subr.bf16.mxu0 %v4120_v1  ;;  %3394 = vmatprep.subr.bf16.mxu1 %v4120_v1 }
  0xbe   : > { %3215 = vmatpush3.bf16.msra.mxu0 %v4582_v63  ;;  %3395 = vmatpush3.bf16.msra.mxu1 %v4582_v63 }
  0xbf   : > { %3216 = vmatprep.subr.bf16.mxu0 %v4120_v1  ;;  %3396 = vmatprep.subr.bf16.mxu1 %v4120_v1 }
  0xc2   : > { %3217 = vmatpush3.bf16.msra.mxu0 %v4591_v0  ;;  %3397 = vmatpush3.bf16.msra.mxu1 %v4591_v0 }
  0xc3   : > { %3218 = vmatprep.subr.bf16.mxu0 %v4120_v1  ;;  %3398 = vmatprep.subr.bf16.mxu1 %v4120_v1 }
  0xc6   : > { %3219 = vmatpush3.bf16.msra.mxu0 %v4600_v2  ;;  %3399 = vmatpush3.bf16.msra.mxu1 %v4600_v2 }
  0xc7   : > { %3220 = vmatprep.subr.bf16.mxu0 %v4120_v1  ;;  %3400 = vmatprep.subr.bf16.mxu1 %v4120_v1 }
  0xca   : > { %3221 = vmatpush3.bf16.msra.mxu0 %v4610_v5  ;;  %3401 = vmatpush3.bf16.msra.mxu1 %v4610_v5 }
  0xcb   : > { %3222 = vmatprep.subr.bf16.mxu0 %v4120_v1  ;;  %3402 = vmatprep.subr.bf16.mxu1 %v4120_v1 }
  0xce   : > { %3223 = vmatpush3.bf16.msra.mxu0 %v4619_v8  ;;  %3403 = vmatpush3.bf16.msra.mxu1 %v4619_v8 }
  0xcf   : > { %3228 = vmatprep.subr.bf16.mxu0 %v4120_v1  ;;  %3408 = vmatprep.subr.bf16.mxu1 %v4120_v1 }
  0xd1   : > { %3225 = vmatmul.mubr.bf16.vlgmr.msra.gmra.mrb[0].mxu0 %v4542_v59  ;;  %3405 = vmatmul.mubr.bf16.vlgmr.msra.gmra.mrb[0].mxu1 %v4623_v9 }
  0xd2   : > { %3229 = vmatpush3.bf16.msra.mxu0 %v4630_v10  ;;  %3409 = vmatpush3.bf16.msra.mxu1 %v4630_v10 }
  0xd3   : > { %3230 = vmatprep.subr.bf16.mxu0 %v4120_v1  ;;  %3410 = vmatprep.subr.bf16.mxu1 %v4120_v1 }
  0xd4   : > { %3244 = vmatprep.mubr.msk.bf16.mxu0 %vm4121_vm0, %v4120_v1  ;;  %3424 = vmatprep.mubr.msk.bf16.mxu1 %vm4121_vm0, %v4120_v1 }
  0xd6   : > { %3231 = vmatpush3.bf16.msra.mxu0 %v4641_v11  ;;  %3411 = vmatpush3.bf16.msra.mxu1 %v4641_v11 }
  0xd7   : > { %3232 = vmatprep.subr.bf16.mxu0 %v4120_v1  ;;  %3412 = vmatprep.subr.bf16.mxu1 %v4120_v1 }
  0xda   : > { %3233 = vmatpush3.bf16.msra.mxu0 %v4654_v12  ;;  %3413 = vmatpush3.bf16.msra.mxu1 %v4654_v12 }
  0xdb   : > { %3234 = vmatprep.subr.bf16.mxu0 %v4120_v1  ;;  %3414 = vmatprep.subr.bf16.mxu1 %v4120_v1 }
  0xde   : > { %3235 = vmatpush3.bf16.msra.mxu0 %v4663_v13  ;;  %3415 = vmatpush3.bf16.msra.mxu1 %v4663_v13 }
  0xdf   : > { %3236 = vmatprep.subr.bf16.mxu0 %v4120_v1  ;;  %3416 = vmatprep.subr.bf16.mxu1 %v4120_v1 }
  0xe2   : > { %3237 = vmatpush3.bf16.msra.mxu0 %v4672_v14  ;;  %3417 = vmatpush3.bf16.msra.mxu1 %v4672_v14 }
  0xe3   : > { %3238 = vmatprep.subr.bf16.mxu0 %v4120_v1  ;;  %3418 = vmatprep.subr.bf16.mxu1 %v4120_v1 }
  0xe6   : > { %3239 = vmatpush3.bf16.msra.mxu0 %v4681_v15  ;;  %3419 = vmatpush3.bf16.msra.mxu1 %v4681_v15 }
  0xe7   : > { %3240 = vmatprep.subr.bf16.mxu0 %v4120_v1  ;;  %3420 = vmatprep.subr.bf16.mxu1 %v4120_v1 }
  0xea   : > { %3241 = vmatpush3.bf16.msra.mxu0 %v4690_v23  ;;  %3421 = vmatpush3.bf16.msra.mxu1 %v4690_v23 }
  0xeb   : > { %3242 = vmatprep.subr.bf16.mxu0 %v4120_v1  ;;  %3422 = vmatprep.subr.bf16.mxu1 %v4120_v1 }
  0xee   : > { %3243 = vmatpush3.bf16.msra.mxu0 %v4699_v30  ;;  %3423 = vmatpush3.bf16.msra.mxu1 %v4699_v30 }
  0xef   : > { %3248 = vmatprep.subr.bf16.mxu0 %v4120_v1  ;;  %3428 = vmatprep.subr.bf16.mxu1 %v4120_v1 }
  0xf1   : > { %3245 = vmatmul.mubr.bf16.vlgmr.msra.gmra.mrb[0].mxu0 %v4706_v31  ;;  %3425 = vmatmul.mubr.bf16.vlgmr.msra.gmra.mrb[0].mxu1 %v4714_v34 }
  0xf2   : > { %3249 = vmatpush3.bf16.msra.mxu0 %v4711_v33  ;;  %3429 = vmatpush3.bf16.msra.mxu1 %v4711_v33 }
  0xf3   : > { %3250 = vmatprep.subr.bf16.mxu0 %v4120_v1  ;;  %3430 = vmatprep.subr.bf16.mxu1 %v4120_v1 }
  0xf4   : > { %3264 = vmatprep.mubr.msk.bf16.mxu0 %vm4121_vm0, %v4120_v1  ;;  %3444 = vmatprep.mubr.msk.bf16.mxu1 %vm4121_vm0, %v4120_v1 }
  0xf6   : > { %3251 = vmatpush3.bf16.msra.mxu0 %v4725_v36  ;;  %3431 = vmatpush3.bf16.msra.mxu1 %v4725_v36 }
  0xf7   : > { %3252 = vmatprep.subr.bf16.mxu0 %v4120_v1  ;;  %3432 = vmatprep.subr.bf16.mxu1 %v4120_v1 }
  0xfa   : > { %3253 = vmatpush3.bf16.msra.mxu0 %v4738_v53  ;;  %3433 = vmatpush3.bf16.msra.mxu1 %v4738_v53  ;;  %v4865_v53 = vld [vmem:[%s5258_s1 + $0x238] sm:$0xff]  }
  0xfb   : > { %3254 = vmatprep.subr.bf16.mxu0 %v4120_v1  ;;  %3434 = vmatprep.subr.bf16.mxu1 %v4120_v1 }
  0xfe   : > { %3255 = vmatpush3.bf16.msra.mxu0 %v4747_v54  ;;  %3435 = vmatpush3.bf16.msra.mxu1 %v4747_v54  ;;  %v4784_v54 = vld [vmem:[%s5258_s1 + $0x1f8] sm:$0xff]  }
  0xff   : > { %3256 = vmatprep.subr.bf16.mxu0 %v4120_v1  ;;  %3436 = vmatprep.subr.bf16.mxu1 %v4120_v1  ;;  %5290 = vst [vmem:[#allocation7_spill] sm:$0xff] %v4784_v54 }
 0x102   : > { %3257 = vmatpush3.bf16.msra.mxu0 %v4756_v56  ;;  %3437 = vmatpush3.bf16.msra.mxu1 %v4756_v56  ;;  %v1124_v56 = vrot.slane %v1122_v4, 1  ;;  %v4819_v4 = vld [vmem:[%s5258_s1 + $0x210] sm:$0xff]  }
 0x103   : > { %3258 = vmatprep.subr.bf16.mxu0 %v4120_v1  ;;  %3438 = vmatprep.subr.bf16.mxu1 %v4120_v1  ;;  %5293 = vst [vmem:[#allocation10_spill] sm:$0xff] %v4819_v4 }
 0x106   : > { %3259 = vmatpush3.bf16.msra.mxu0 %v4765_v57  ;;  %3439 = vmatpush3.bf16.msra.mxu1 %v4765_v57  ;;  %v4788_v57 = vor.u32 %v1124_v56, %v1120_v7  ;;  %v4806_v56 = vld [vmem:[%s5258_s1 + $0x208] sm:$0xff]   ;;  %v4828_v7 = vld [vmem:[%s5258_s1 + $0x218] sm:$0xff]  }
 0x107   : > { %3260 = vmatprep.subr.bf16.mxu0 %v4120_v1  ;;  %3440 = vmatprep.subr.bf16.mxu1 %v4120_v1  ;;  %5292 = vst [vmem:[#allocation9_spill] sm:$0xff] %v4806_v56  ;;  %5294 = vst [vmem:[#allocation11_spill] sm:$0xff] %v4828_v7 }
 0x10a   : > { %3261 = vmatpush3.bf16.msra.mxu0 %v4775_v6  ;;  %3441 = vmatpush3.bf16.msra.mxu1 %v4775_v6 }
 0x10b   : > { %3262 = vmatprep.subr.bf16.mxu0 %v4120_v1  ;;  %3442 = vmatprep.subr.bf16.mxu1 %v4120_v1 }
 0x10e   : > { %3263 = vmatpush3.bf16.msra.mxu0 %v4784_v54  ;;  %3443 = vmatpush3.bf16.msra.mxu1 %v4784_v54  ;;  %v4856_v54 = vld [vmem:[%s5258_s1 + $0x230] sm:$0xff]  }
 0x10f   : > { %3268 = vmatprep.subr.bf16.mxu0 %v4120_v1  ;;  %3448 = vmatprep.subr.bf16.mxu1 %v4120_v1 }
 0x111   : > { %3265 = vmatmul.mubr.bf16.vlgmr.msra.gmra.mrb[0].mxu0 %v4714_v34  ;;  %3445 = vmatmul.mubr.bf16.vlgmr.msra.gmra.mrb[0].mxu1 %v4788_v57 }
 0x112   : > { %3269 = vmatpush3.bf16.msra.mxu0 %v4795_v3  ;;  %3449 = vmatpush3.bf16.msra.mxu1 %v4795_v3  ;;  %v2762_v3 = vld.sshfl [vmem:[%s4208_s7 + $0x12] sm:$0x3 pattern:$0x76325410] }
 0x113   : > { %3270 = vmatprep.subr.bf16.mxu0 %v4120_v1  ;;  %3450 = vmatprep.subr.bf16.mxu1 %v4120_v1 }
 0x114   : > { %3284 = vmatprep.mubr.msk.bf16.mxu0 %vm4121_vm0, %v4120_v1  ;;  %3464 = vmatprep.mubr.msk.bf16.mxu1 %vm4121_vm0, %v4120_v1 }
 0x116   : > { %3271 = vmatpush3.bf16.msra.mxu0 %v4806_v56  ;;  %3451 = vmatpush3.bf16.msra.mxu1 %v4806_v56  ;;  %v4837_v56 = vld [vmem:[%s5258_s1 + $0x220] sm:$0xff]  }
 0x117   : > { %3272 = vmatprep.subr.bf16.mxu0 %v4120_v1  ;;  %3452 = vmatprep.subr.bf16.mxu1 %v4120_v1  ;;  %5295 = vst [vmem:[#allocation12_spill] sm:$0xff] %v4837_v56 }
 0x11a   : > { %3273 = vmatpush3.bf16.msra.mxu0 %v4819_v4  ;;  %3453 = vmatpush3.bf16.msra.mxu1 %v4819_v4  ;;  %v4846_v4 = vld [vmem:[%s5258_s1 + $0x228] sm:$0xff]  }
 0x11b   : > { %3274 = vmatprep.subr.bf16.mxu0 %v4120_v1  ;;  %3454 = vmatprep.subr.bf16.mxu1 %v4120_v1  ;;  %5296 = vst [vmem:[#allocation13_spill] sm:$0xff] %v4846_v4 }
 0x11e   : > { %3275 = vmatpush3.bf16.msra.mxu0 %v4828_v7  ;;  %3455 = vmatpush3.bf16.msra.mxu1 %v4828_v7  ;;  %v1588_v7 = vshll.u32 %v2762_v3, 16 }
 0x11f   : > { %3276 = vmatprep.subr.bf16.mxu0 %v4120_v1  ;;  %3456 = vmatprep.subr.bf16.mxu1 %v4120_v1 }
 0x120   : > { %v1590_v6 = vrot.slane %v1588_v7, 1  ;;  %v4074_v7 = vld [vmem:[%s5258_s1 + $0x58] sm:$0xff]  }
 0x122   : > { %3277 = vmatpush3.bf16.msra.mxu0 %v4837_v56  ;;  %3457 = vmatpush3.bf16.msra.mxu1 %v4837_v56  ;;  %v1586_v56 = vshrl.u32 %v2762_v3, 16  ;;  %v4071_v3 = vld [vmem:[%s5258_s1 + $0x40] sm:$0xff]  }
 0x123   : > { %3278 = vmatprep.subr.bf16.mxu0 %v4120_v1  ;;  %3458 = vmatprep.subr.bf16.mxu1 %v4120_v1 }
 0x126   : > { %3279 = vmatpush3.bf16.msra.mxu0 %v4846_v4  ;;  %3459 = vmatpush3.bf16.msra.mxu1 %v4846_v4  ;;  %v4869_v4 = vor.u32 %v1590_v6, %v1586_v56  ;;  %v4072_v6 = vld [vmem:[%s5258_s1 + $0x48] sm:$0xff]   ;;  %v4073_v56 = vld [vmem:[%s5258_s1 + $0x50] sm:$0xff]  }
 0x127   : > { %3280 = vmatprep.subr.bf16.mxu0 %v4120_v1  ;;  %3460 = vmatprep.subr.bf16.mxu1 %v4120_v1 }
 0x12a   : > { %3281 = vmatpush3.bf16.msra.mxu0 %v4856_v54  ;;  %3461 = vmatpush3.bf16.msra.mxu1 %v4856_v54 }
 0x12b   : > { %3282 = vmatprep.subr.bf16.mxu0 %v4120_v1  ;;  %3462 = vmatprep.subr.bf16.mxu1 %v4120_v1 }
 0x12e   : > { %3283 = vmatpush3.bf16.msra.mxu0 %v4865_v53  ;;  %3463 = vmatpush3.bf16.msra.mxu1 %v4865_v53 }
 0x12f   : > { %3468 = vmatprep.subr.bf16.mxu0 %v4120_v1  ;;  %3648 = vmatprep.subr.bf16.mxu1 %v4120_v1 }
 0x131   : > { %3285 = vmatmul.mubr.bf16.vlgmr.msra.gmra.mrb[0].mxu0 %v4788_v57  ;;  %3465 = vmatmul.mubr.bf16.vlgmr.msra.gmra.mrb[0].mxu1 %v4869_v4 }
 0x132   : > { %3469 = vmatpush3.bf16.msra.mxu0 %v4071_v3  ;;  %3649 = vmatpush3.bf16.msra.mxu1 %v4071_v3  ;;  %v4075_v3 = vld [vmem:[%s5258_s1 + $0x60] sm:$0xff]  }
 0x133   : > { %3470 = vmatprep.subr.bf16.mxu0 %v4120_v1  ;;  %3650 = vmatprep.subr.bf16.mxu1 %v4120_v1 }
 0x134   : > { %3484 = vmatprep.mubr.msk.bf16.mxu0 %vm4121_vm0, %v4120_v1  ;;  %3664 = vmatprep.mubr.msk.bf16.mxu1 %vm4121_vm0, %v4120_v1 }
 0x136   : > { %3471 = vmatpush3.bf16.msra.mxu0 %v4072_v6  ;;  %3651 = vmatpush3.bf16.msra.mxu1 %v4072_v6  ;;  %v4076_v6 = vld [vmem:[%s5258_s1 + $0x68] sm:$0xff]  }
 0x137   : > { %3472 = vmatprep.subr.bf16.mxu0 %v4120_v1  ;;  %3652 = vmatprep.subr.bf16.mxu1 %v4120_v1 }
 0x13a   : > { %3473 = vmatpush3.bf16.msra.mxu0 %v4073_v56  ;;  %3653 = vmatpush3.bf16.msra.mxu1 %v4073_v56  ;;  %v4077_v56 = vld [vmem:[%s5258_s1 + $0x70] sm:$0xff]  }
 0x13b   : > { %3474 = vmatprep.subr.bf16.mxu0 %v4120_v1  ;;  %3654 = vmatprep.subr.bf16.mxu1 %v4120_v1 }
 0x13e   : > { %3475 = vmatpush3.bf16.msra.mxu0 %v4074_v7  ;;  %3655 = vmatpush3.bf16.msra.mxu1 %v4074_v7  ;;  %v4078_v7 = vld [vmem:[%s5258_s1 + $0x78] sm:$0xff]  }
 0x13f   : > { %3476 = vmatprep.subr.bf16.mxu0 %v4120_v1  ;;  %3656 = vmatprep.subr.bf16.mxu1 %v4120_v1 }
 0x142   : > { %3477 = vmatpush3.bf16.msra.mxu0 %v4075_v3  ;;  %3657 = vmatpush3.bf16.msra.mxu1 %v4075_v3  ;;  %v4079_v3 = vld [vmem:[%s5258_s1] sm:$0xff]  }
 0x143   : > { %3478 = vmatprep.subr.bf16.mxu0 %v4120_v1  ;;  %3658 = vmatprep.subr.bf16.mxu1 %v4120_v1 }
 0x146   : > { %3479 = vmatpush3.bf16.msra.mxu0 %v4076_v6  ;;  %3659 = vmatpush3.bf16.msra.mxu1 %v4076_v6 }
 0x147   : > { %3480 = vmatprep.subr.bf16.mxu0 %v4120_v1  ;;  %3660 = vmatprep.subr.bf16.mxu1 %v4120_v1 }
 0x14a   : > { %3481 = vmatpush3.bf16.msra.mxu0 %v4077_v56  ;;  %3661 = vmatpush3.bf16.msra.mxu1 %v4077_v56 }
 0x14b   : > { %3482 = vmatprep.subr.bf16.mxu0 %v4120_v1  ;;  %3662 = vmatprep.subr.bf16.mxu1 %v4120_v1 }
 0x14e   : > { %3483 = vmatpush3.bf16.msra.mxu0 %v4078_v7  ;;  %3663 = vmatpush3.bf16.msra.mxu1 %v4078_v7 }
 0x14f   : > { %3488 = vmatprep.subr.bf16.mxu0 %v4120_v1  ;;  %3668 = vmatprep.subr.bf16.mxu1 %v4120_v1 }
 0x151   : > { %3485 = vmatmul.mubr.bf16.vlgmr.msra.gmra.mrb[4].mxu0 %v4468_v47  ;;  %3665 = vmatmul.mubr.bf16.vlgmr.msra.gmra.mrb[4].mxu1 %v4542_v59 }
 0x152   : > { %3489 = vmatpush3.bf16.msra.mxu0 %v4079_v3  ;;  %3669 = vmatpush3.bf16.msra.mxu1 %v4079_v3 }
 0x153   : > { %3490 = vmatprep.subr.bf16.mxu0 %v4120_v1  ;;  %3670 = vmatprep.subr.bf16.mxu1 %v4120_v1 }
 0x154   : > { %3504 = vmatprep.mubr.msk.bf16.mxu0 %vm4121_vm0, %v4120_v1  ;;  %3684 = vmatprep.mubr.msk.bf16.mxu1 %vm4121_vm0, %v4120_v1 }
 0x156   : > { %3491 = vmatpush3.bf16.msra.mxu0 %v4240_v16  ;;  %3671 = vmatpush3.bf16.msra.mxu1 %v4240_v16 }
 0x157   : > { %3492 = vmatprep.subr.bf16.mxu0 %v4120_v1  ;;  %3672 = vmatprep.subr.bf16.mxu1 %v4120_v1 }
 0x15a   : > { %3493 = vmatpush3.bf16.msra.mxu0 %v4253_v17  ;;  %3673 = vmatpush3.bf16.msra.mxu1 %v4253_v17 }
 0x15b   : > { %3494 = vmatprep.subr.bf16.mxu0 %v4120_v1  ;;  %3674 = vmatprep.subr.bf16.mxu1 %v4120_v1 }
 0x15e   : > { %3495 = vmatpush3.bf16.msra.mxu0 %v4262_v18  ;;  %3675 = vmatpush3.bf16.msra.mxu1 %v4262_v18 }
 0x15f   : > { %3496 = vmatprep.subr.bf16.mxu0 %v4120_v1  ;;  %3676 = vmatprep.subr.bf16.mxu1 %v4120_v1 }
 0x162   : > { %3497 = vmatpush3.bf16.msra.mxu0 %v4269_v19  ;;  %3677 = vmatpush3.bf16.msra.mxu1 %v4269_v19 }
 0x163   : > { %3498 = vmatprep.subr.bf16.mxu0 %v4120_v1  ;;  %3678 = vmatprep.subr.bf16.mxu1 %v4120_v1 }
 0x166   : > { %3499 = vmatpush3.bf16.msra.mxu0 %v4278_v20  ;;  %3679 = vmatpush3.bf16.msra.mxu1 %v4278_v20 }
 0x167   : > { %3500 = vmatprep.subr.bf16.mxu0 %v4120_v1  ;;  %3680 = vmatprep.subr.bf16.mxu1 %v4120_v1 }
 0x16a   : > { %3501 = vmatpush3.bf16.msra.mxu0 %v4287_v21  ;;  %3681 = vmatpush3.bf16.msra.mxu1 %v4287_v21 }
 0x16b   : > { %3502 = vmatprep.subr.bf16.mxu0 %v4120_v1  ;;  %3682 = vmatprep.subr.bf16.mxu1 %v4120_v1 }
 0x16e   : > { %3503 = vmatpush3.bf16.msra.mxu0 %v4296_v22  ;;  %3683 = vmatpush3.bf16.msra.mxu1 %v4296_v22 }
 0x16f   : > { %3508 = vmatprep.subr.bf16.mxu0 %v4120_v1  ;;  %3688 = vmatprep.subr.bf16.mxu1 %v4120_v1 }
 0x171   : > { %3505 = vmatmul.mubr.bf16.vlgmr.msra.gmra.mrb[4].mxu0 %v4460_v45  ;;  %3685 = vmatmul.mubr.bf16.vlgmr.msra.gmra.mrb[4].mxu1 %v4468_v47  ;;  %v5304_v45 = vld [vmem:[#allocation9_spill] sm:$0xff]  ;;  %v5306_v47 = vld [vmem:[#allocation11_spill] sm:$0xff] }
 0x172   : > { %3509 = vmatpush3.bf16.msra.mxu0 %v4308_v24  ;;  %3689 = vmatpush3.bf16.msra.mxu1 %v4308_v24 }
 0x173   : > { %3510 = vmatprep.subr.bf16.mxu0 %v4120_v1  ;;  %3690 = vmatprep.subr.bf16.mxu1 %v4120_v1 }
 0x174   : > { %3524 = vmatprep.mubr.msk.bf16.mxu0 %vm4121_vm0, %v4120_v1  ;;  %3704 = vmatprep.mubr.msk.bf16.mxu1 %vm4121_vm0, %v4120_v1 }
 0x176   : > { %3511 = vmatpush3.bf16.msra.mxu0 %v4315_v25  ;;  %3691 = vmatpush3.bf16.msra.mxu1 %v4315_v25 }
 0x177   : > { %3512 = vmatprep.subr.bf16.mxu0 %v4120_v1  ;;  %3692 = vmatprep.subr.bf16.mxu1 %v4120_v1 }
 0x17a   : > { %3513 = vmatpush3.bf16.msra.mxu0 %v4330_v26  ;;  %3693 = vmatpush3.bf16.msra.mxu1 %v4330_v26  ;;  %v2765_v26 = vld [vmem:[%s4208_s7 + $0x6] sm:$0x1] }
 0x17b   : > { %3514 = vmatprep.subr.bf16.mxu0 %v4120_v1  ;;  %3694 = vmatprep.subr.bf16.mxu1 %v4120_v1 }
 0x17e   : > { %3515 = vmatpush3.bf16.msra.mxu0 %v4339_v27  ;;  %3695 = vmatpush3.bf16.msra.mxu1 %v4339_v27  ;;  %v2768_v27 = vld [vmem:[%s4208_s7 + $0x14] sm:$0x1] }
 0x17f   : > { %3516 = vmatprep.subr.bf16.mxu0 %v4120_v1  ;;  %3696 = vmatprep.subr.bf16.mxu1 %v4120_v1 }
 0x182   : > { %3517 = vmatpush3.bf16.msra.mxu0 %v4348_v28  ;;  %3697 = vmatpush3.bf16.msra.mxu1 %v4348_v28  ;;  %v5297_v28 = vld [vmem:[#allocation2_spill] sm:$0xff] }
 0x183   : > { %3518 = vmatprep.subr.bf16.mxu0 %v4120_v1  ;;  %3698 = vmatprep.subr.bf16.mxu1 %v4120_v1 }
 0x186   : > { %3519 = vmatpush3.bf16.msra.mxu0 %v4357_v29  ;;  %3699 = vmatpush3.bf16.msra.mxu1 %v4357_v29  ;;  %v5298_v29 = vld [vmem:[#allocation3_spill] sm:$0xff] }
 0x187   : > { %3520 = vmatprep.subr.bf16.mxu0 %v4120_v1  ;;  %3700 = vmatprep.subr.bf16.mxu1 %v4120_v1 }
 0x18a   : > { %3521 = vmatpush3.bf16.msra.mxu0 %v4367_v32  ;;  %3701 = vmatpush3.bf16.msra.mxu1 %v4367_v32  ;;  %v5299_v32 = vld [vmem:[#allocation4_spill] sm:$0xff] }
 0x18b   : > { %3522 = vmatprep.subr.bf16.mxu0 %v4120_v1  ;;  %3702 = vmatprep.subr.bf16.mxu1 %v4120_v1 }
 0x18e   : > { %3523 = vmatpush3.bf16.msra.mxu0 %v4376_v35  ;;  %3703 = vmatpush3.bf16.msra.mxu1 %v4376_v35  ;;  %v2770_v35 = vld.sshfl [vmem:[%s4208_s7 + $0x6] sm:$0x3 pattern:$0x76325410] }
 0x18f   : > { %3528 = vmatprep.subr.bf16.mxu0 %v4120_v1  ;;  %3708 = vmatprep.subr.bf16.mxu1 %v4120_v1 }
 0x191   : > { %3525 = vmatmul.mubr.bf16.vlgmr.msra.gmra.mrb[4].mxu0 %v4542_v59  ;;  %3705 = vmatmul.mubr.bf16.vlgmr.msra.gmra.mrb[4].mxu1 %v4623_v9 }
 0x192   : > { %3529 = vmatpush3.bf16.msra.mxu0 %v4385_v37  ;;  %3709 = vmatpush3.bf16.msra.mxu1 %v4385_v37  ;;  %v1981_v37 = vshll.u32 %v2770_v35, 16 }
 0x193   : > { %3530 = vmatprep.subr.bf16.mxu0 %v4120_v1  ;;  %3710 = vmatprep.subr.bf16.mxu1 %v4120_v1 }
 0x194   : > { %3544 = vmatprep.mubr.msk.bf16.mxu0 %vm4121_vm0, %v4120_v1  ;;  %3724 = vmatprep.mubr.msk.bf16.mxu1 %vm4121_vm0, %v4120_v1 }
 0x196   : > { %3531 = vmatpush3.bf16.msra.mxu0 %v4395_v38  ;;  %3711 = vmatpush3.bf16.msra.mxu1 %v4395_v38  ;;  %v5300_v38 = vld [vmem:[#allocation5_spill] sm:$0xff] }
 0x197   : > { %3532 = vmatprep.subr.bf16.mxu0 %v4120_v1  ;;  %3712 = vmatprep.subr.bf16.mxu1 %v4120_v1 }
 0x19a   : > { %3533 = vmatpush3.bf16.msra.mxu0 %v4408_v39  ;;  %3713 = vmatpush3.bf16.msra.mxu1 %v4408_v39  ;;  %v1979_v39 = vshrl.u32 %v2770_v35, 16 }
 0x19b   : > { %3534 = vmatprep.subr.bf16.mxu0 %v4120_v1  ;;  %3714 = vmatprep.subr.bf16.mxu1 %v4120_v1 }
 0x19e   : > { %3535 = vmatpush3.bf16.msra.mxu0 %v4417_v40  ;;  %3715 = vmatpush3.bf16.msra.mxu1 %v4417_v40  ;;  %v1983_v40 = vrot.slane %v1981_v37, 1 }
 0x19f   : > { %3536 = vmatprep.subr.bf16.mxu0 %v4120_v1  ;;  %3716 = vmatprep.subr.bf16.mxu1 %v4120_v1 }
 0x1a2   : > { %3537 = vmatpush3.bf16.msra.mxu0 %v4426_v41  ;;  %3717 = vmatpush3.bf16.msra.mxu1 %v4426_v41  ;;  %v5301_v41 = vld [vmem:[#allocation6_spill] sm:$0xff] }
 0x1a3   : > { %3538 = vmatprep.subr.bf16.mxu0 %v4120_v1  ;;  %3718 = vmatprep.subr.bf16.mxu1 %v4120_v1 }
 0x1a6   : > { %3539 = vmatpush3.bf16.msra.mxu0 %v4435_v42  ;;  %3719 = vmatpush3.bf16.msra.mxu1 %v4435_v42  ;;  %v1984_v42 = vor.u32 %v1983_v40, %v1979_v39 }
 0x1a7   : > { %3540 = vmatprep.subr.bf16.mxu0 %v4120_v1  ;;  %3720 = vmatprep.subr.bf16.mxu1 %v4120_v1 }
 0x1aa   : > { %3541 = vmatpush3.bf16.msra.mxu0 %v4444_v43  ;;  %3721 = vmatpush3.bf16.msra.mxu1 %v4444_v43  ;;  %v5302_v43 = vld [vmem:[#allocation7_spill] sm:$0xff] }
 0x1ab   : > { %3542 = vmatprep.subr.bf16.mxu0 %v4120_v1  ;;  %3722 = vmatprep.subr.bf16.mxu1 %v4120_v1 }
 0x1ae   : > { %3543 = vmatpush3.bf16.msra.mxu0 %v4453_v44  ;;  %3723 = vmatpush3.bf16.msra.mxu1 %v4453_v44  ;;  %v5303_v44 = vld [vmem:[#allocation8_spill] sm:$0xff] }
 0x1af   : > { %3548 = vmatprep.subr.bf16.mxu0 %v4120_v1  ;;  %3728 = vmatprep.subr.bf16.mxu1 %v4120_v1 }
 0x1b1   : > { %3545 = vmatmul.mubr.bf16.vlgmr.msra.gmra.mrb[4].mxu0 %v4706_v31  ;;  %3725 = vmatmul.mubr.bf16.vlgmr.msra.gmra.mrb[4].mxu1 %v4714_v34 }
 0x1b2   : > { %3549 = vmatpush3.bf16.msra.mxu0 %v4465_v46  ;;  %3729 = vmatpush3.bf16.msra.mxu1 %v4465_v46  ;;  %v5305_v46 = vld [vmem:[#allocation10_spill] sm:$0xff] }
 0x1b3   : > { %3550 = vmatprep.subr.bf16.mxu0 %v4120_v1  ;;  %3730 = vmatprep.subr.bf16.mxu1 %v4120_v1 }
 0x1b4   : > { %3564 = vmatprep.mubr.msk.bf16.mxu0 %vm4121_vm0, %v4120_v1  ;;  %3744 = vmatprep.mubr.msk.bf16.mxu1 %vm4121_vm0, %v4120_v1 }
 0x1b6   : > { %3551 = vmatpush3.bf16.msra.mxu0 %v4479_v48  ;;  %3731 = vmatpush3.bf16.msra.mxu1 %v4479_v48  ;;  %v5307_v48 = vld [vmem:[#allocation12_spill] sm:$0xff] }
 0x1b7   : > { %3552 = vmatprep.subr.bf16.mxu0 %v4120_v1  ;;  %3732 = vmatprep.subr.bf16.mxu1 %v4120_v1 }
 0x1ba   : > { %3553 = vmatpush3.bf16.msra.mxu0 %v4492_v49  ;;  %3733 = vmatpush3.bf16.msra.mxu1 %v4492_v49  ;;  %v2772_v49 = vld.sshfl [vmem:[%s4208_s7 + $0x14] sm:$0x3 pattern:$0x76325410]  ;;  %s2534_s7 = sshll.u32 %s5320_s13, 1 }
 0x1bb   : > { %3554 = vmatprep.subr.bf16.mxu0 %v4120_v1  ;;  %3734 = vmatprep.subr.bf16.mxu1 %v4120_v1  ;;  %s187_s10 = sadd.s32 %s2534_s7, %s5322_s12 }
 0x1bc   : > { %s188_s20 = scalar_lea.vmem %s5260_s3, %s187_s10 }
 0x1be   : > { %3555 = vmatpush3.bf16.msra.mxu0 %v4501_v50  ;;  %3735 = vmatpush3.bf16.msra.mxu1 %v4501_v50  ;;  %v2366_v50 = vshll.u32 %v2772_v49, 16 }
 0x1bf   : > { %3556 = vmatprep.subr.bf16.mxu0 %v4120_v1  ;;  %3736 = vmatprep.subr.bf16.mxu1 %v4120_v1 }
 0x1c2   : > { %3557 = vmatpush3.bf16.msra.mxu0 %v4510_v51  ;;  %3737 = vmatpush3.bf16.msra.mxu1 %v4510_v51  ;;  %v5308_v51 = vld [vmem:[#allocation13_spill] sm:$0xff] }
 0x1c3   : > { %3558 = vmatprep.subr.bf16.mxu0 %v4120_v1  ;;  %3738 = vmatprep.subr.bf16.mxu1 %v4120_v1 }
 0x1c6   : > { %3559 = vmatpush3.bf16.msra.mxu0 %v4519_v52  ;;  %3739 = vmatpush3.bf16.msra.mxu1 %v4519_v52  ;;  %v2364_v52 = vshrl.u32 %v2772_v49, 16 }
 0x1c7   : > { %3560 = vmatprep.subr.bf16.mxu0 %v4120_v1  ;;  %3740 = vmatprep.subr.bf16.mxu1 %v4120_v1 }
 0x1ca   : > { %3561 = vmatpush3.bf16.msra.mxu0 %v4529_v55  ;;  %3741 = vmatpush3.bf16.msra.mxu1 %v4529_v55  ;;  %v2368_v55 = vrot.slane %v2366_v50, 1 }
 0x1cb   : > { %3562 = vmatprep.subr.bf16.mxu0 %v4120_v1  ;;  %3742 = vmatprep.subr.bf16.mxu1 %v4120_v1 }
 0x1ce   : > { %3563 = vmatpush3.bf16.msra.mxu0 %v4538_v58  ;;  %3743 = vmatpush3.bf16.msra.mxu1 %v4538_v58  ;;  %v2369_v58 = vor.u32 %v2368_v55, %v2364_v52 }
 0x1cf   : > { %3568 = vmatprep.subr.bf16.mxu0 %v4120_v1  ;;  %3748 = vmatprep.subr.bf16.mxu1 %v4120_v1 }
 0x1d1   : > { %3565 = vmatmul.mubr.bf16.vlgmr.msra.gmra.mrb[4].mxu0 %v4714_v34  ;;  %3745 = vmatmul.mubr.bf16.vlgmr.msra.gmra.mrb[4].mxu1 %v4788_v57 }
 0x1d2   : > { %3569 = vmatpush3.bf16.msra.mxu0 %v4549_v60  ;;  %3749 = vmatpush3.bf16.msra.mxu1 %v4549_v60 }
 0x1d3   : > { %3570 = vmatprep.subr.bf16.mxu0 %v4120_v1  ;;  %3750 = vmatprep.subr.bf16.mxu1 %v4120_v1 }
 0x1d4   : > { %3584 = vmatprep.mubr.msk.bf16.mxu0 %vm4121_vm0, %v4120_v1  ;;  %3764 = vmatprep.mubr.msk.bf16.mxu1 %vm4121_vm0, %v4120_v1 }
 0x1d6   : > { %3571 = vmatpush3.bf16.msra.mxu0 %v4560_v61  ;;  %3751 = vmatpush3.bf16.msra.mxu1 %v4560_v61 }
 0x1d7   : > { %3572 = vmatprep.subr.bf16.mxu0 %v4120_v1  ;;  %3752 = vmatprep.subr.bf16.mxu1 %v4120_v1 }
 0x1da   : > { %3573 = vmatpush3.bf16.msra.mxu0 %v4573_v62  ;;  %3753 = vmatpush3.bf16.msra.mxu1 %v4573_v62 }
 0x1db   : > { %3574 = vmatprep.subr.bf16.mxu0 %v4120_v1  ;;  %3754 = vmatprep.subr.bf16.mxu1 %v4120_v1 }
 0x1de   : > { %3575 = vmatpush3.bf16.msra.mxu0 %v4582_v63  ;;  %3755 = vmatpush3.bf16.msra.mxu1 %v4582_v63 }
 0x1df   : > { %3576 = vmatprep.subr.bf16.mxu0 %v4120_v1  ;;  %3756 = vmatprep.subr.bf16.mxu1 %v4120_v1 }
 0x1e2   : > { %3577 = vmatpush3.bf16.msra.mxu0 %v4591_v0  ;;  %3757 = vmatpush3.bf16.msra.mxu1 %v4591_v0 }
 0x1e3   : > { %3578 = vmatprep.subr.bf16.mxu0 %v4120_v1  ;;  %3758 = vmatprep.subr.bf16.mxu1 %v4120_v1 }
 0x1e6   : > { %3579 = vmatpush3.bf16.msra.mxu0 %v4600_v2  ;;  %3759 = vmatpush3.bf16.msra.mxu1 %v4600_v2 }
 0x1e7   : > { %3580 = vmatprep.subr.bf16.mxu0 %v4120_v1  ;;  %3760 = vmatprep.subr.bf16.mxu1 %v4120_v1 }
 0x1ea   : > { %3581 = vmatpush3.bf16.msra.mxu0 %v4610_v5  ;;  %3761 = vmatpush3.bf16.msra.mxu1 %v4610_v5 }
 0x1eb   : > { %3582 = vmatprep.subr.bf16.mxu0 %v4120_v1  ;;  %3762 = vmatprep.subr.bf16.mxu1 %v4120_v1 }
 0x1ee   : > { %3583 = vmatpush3.bf16.msra.mxu0 %v4619_v8  ;;  %3763 = vmatpush3.bf16.msra.mxu1 %v4619_v8 }
 0x1ef   : > { %3588 = vmatprep.subr.bf16.mxu0 %v4120_v1  ;;  %3768 = vmatprep.subr.bf16.mxu1 %v4120_v1 }
 0x1f1   : > { %3585 = vmatmul.mubr.bf16.vlgmr.msra.gmra.mrb[4].mxu0 %v4788_v57  ;;  %3765 = vmatmul.mubr.bf16.vlgmr.msra.gmra.mrb[4].mxu1 %v4869_v4 }
 0x1f2   : > { %3589 = vmatpush3.bf16.msra.mxu0 %v4630_v10  ;;  %3769 = vmatpush3.bf16.msra.mxu1 %v4630_v10 }
 0x1f3   : > { %3590 = vmatprep.subr.bf16.mxu0 %v4120_v1  ;;  %3770 = vmatprep.subr.bf16.mxu1 %v4120_v1 }
 0x1f4   : > { %3604 = vmatprep.mubr.msk.bf16.mxu0 %vm4121_vm0, %v4120_v1  ;;  %3784 = vmatprep.mubr.msk.bf16.mxu1 %vm4121_vm0, %v4120_v1 }
 0x1f6   : > { %3591 = vmatpush3.bf16.msra.mxu0 %v4641_v11  ;;  %3771 = vmatpush3.bf16.msra.mxu1 %v4641_v11 }
 0x1f7   : > { %3592 = vmatprep.subr.bf16.mxu0 %v4120_v1  ;;  %3772 = vmatprep.subr.bf16.mxu1 %v4120_v1 }
 0x1fa   : > { %3593 = vmatpush3.bf16.msra.mxu0 %v4654_v12  ;;  %3773 = vmatpush3.bf16.msra.mxu1 %v4654_v12 }
 0x1fb   : > { %3594 = vmatprep.subr.bf16.mxu0 %v4120_v1  ;;  %3774 = vmatprep.subr.bf16.mxu1 %v4120_v1 }
 0x1fe   : > { %3595 = vmatpush3.bf16.msra.mxu0 %v4663_v13  ;;  %3775 = vmatpush3.bf16.msra.mxu1 %v4663_v13 }
 0x1ff   : > { %3596 = vmatprep.subr.bf16.mxu0 %v4120_v1  ;;  %3776 = vmatprep.subr.bf16.mxu1 %v4120_v1 }
 0x202   : > { %3597 = vmatpush3.bf16.msra.mxu0 %v4672_v14  ;;  %3777 = vmatpush3.bf16.msra.mxu1 %v4672_v14 }
 0x203   : > { %3598 = vmatprep.subr.bf16.mxu0 %v4120_v1  ;;  %3778 = vmatprep.subr.bf16.mxu1 %v4120_v1 }
 0x204   : > { %v5138_v16 = vpop.f32.mrb[0].mxu0  ;;  %v5140_v17 = vpop.f32.mrb[0].mxu1 }
 0x205   : > { %v1634_v18 = vmax.f32 %v5138_v16, %v5140_v17  ;;  %v3286_v19 = vpop.f32.mrb[1].mxu0  ;;  %v3466_v20 = vpop.f32.mrb[1].mxu1 }
 0x206   : > { %v1212_v21 = vpop.f32.mrb[2].mxu0  ;;  %v1630_v22 = vpop.f32.mrb[2].mxu1  ;;  %3599 = vmatpush3.bf16.msra.mxu0 %v4681_v15  ;;  %3779 = vmatpush3.bf16.msra.mxu1 %v4681_v15 }
 0x207   : > { %v3287_v24 = vpop.f32.mrb[3].mxu0  ;;  %v3467_v25 = vpop.f32.mrb[3].mxu1  ;;  %3600 = vmatprep.subr.bf16.mxu0 %v4120_v1  ;;  %3780 = vmatprep.subr.bf16.mxu1 %v4120_v1 }
 0x20a   : > { %3601 = vmatpush3.bf16.msra.mxu0 %v4690_v23  ;;  %3781 = vmatpush3.bf16.msra.mxu1 %v4690_v23 }
 0x20b   : > { %3602 = vmatprep.subr.bf16.mxu0 %v4120_v1  ;;  %3782 = vmatprep.subr.bf16.mxu1 %v4120_v1 }
 0x20e   : > { %3603 = vmatpush3.bf16.msra.mxu0 %v4699_v30  ;;  %3783 = vmatpush3.bf16.msra.mxu1 %v4699_v30 }
 0x20f   : > { %3608 = vmatprep.subr.bf16.mxu0 %v4120_v1  ;;  %3788 = vmatprep.subr.bf16.mxu1 %v4120_v1 }
 0x211   : > { %3605 = vmatmul.mubr.bf16.vlgmr.msra.gmra.mrb[4].mxu0 %v2765_v26  ;;  %3785 = vmatmul.mubr.bf16.vlgmr.msra.gmra.mrb[4].mxu1 %v2768_v27 }
 0x212   : > { %3609 = vmatpush3.bf16.msra.mxu0 %v4711_v33  ;;  %3789 = vmatpush3.bf16.msra.mxu1 %v4711_v33 }
 0x213   : > { %3610 = vmatprep.subr.bf16.mxu0 %v4120_v1  ;;  %3790 = vmatprep.subr.bf16.mxu1 %v4120_v1 }
 0x214   : > { %3624 = vmatprep.mubr.msk.bf16.mxu0 %vm4121_vm0, %v4120_v1  ;;  %3804 = vmatprep.mubr.msk.bf16.mxu1 %vm4121_vm0, %v4120_v1 }
 0x216   : > { %3611 = vmatpush3.bf16.msra.mxu0 %v4725_v36  ;;  %3791 = vmatpush3.bf16.msra.mxu1 %v4725_v36 }
 0x217   : > { %3612 = vmatprep.subr.bf16.mxu0 %v4120_v1  ;;  %3792 = vmatprep.subr.bf16.mxu1 %v4120_v1 }
 0x21a   : > { %3613 = vmatpush3.bf16.msra.mxu0 %v5297_v28  ;;  %3793 = vmatpush3.bf16.msra.mxu1 %v5297_v28 }
 0x21b   : > { %3614 = vmatprep.subr.bf16.mxu0 %v4120_v1  ;;  %3794 = vmatprep.subr.bf16.mxu1 %v4120_v1 }
 0x21e   : > { %3615 = vmatpush3.bf16.msra.mxu0 %v5298_v29  ;;  %3795 = vmatpush3.bf16.msra.mxu1 %v5298_v29 }
 0x21f   : > { %3616 = vmatprep.subr.bf16.mxu0 %v4120_v1  ;;  %3796 = vmatprep.subr.bf16.mxu1 %v4120_v1 }
 0x222   : > { %3617 = vmatpush3.bf16.msra.mxu0 %v5299_v32  ;;  %3797 = vmatpush3.bf16.msra.mxu1 %v5299_v32 }
 0x223   : > { %3618 = vmatprep.subr.bf16.mxu0 %v4120_v1  ;;  %3798 = vmatprep.subr.bf16.mxu1 %v4120_v1 }
 0x226   : > { %3619 = vmatpush3.bf16.msra.mxu0 %v5300_v38  ;;  %3799 = vmatpush3.bf16.msra.mxu1 %v5300_v38 }
 0x227   : > { %3620 = vmatprep.subr.bf16.mxu0 %v4120_v1  ;;  %3800 = vmatprep.subr.bf16.mxu1 %v4120_v1 }
 0x22a   : > { %3621 = vmatpush3.bf16.msra.mxu0 %v5301_v41  ;;  %3801 = vmatpush3.bf16.msra.mxu1 %v5301_v41 }
 0x22b   : > { %3622 = vmatprep.subr.bf16.mxu0 %v4120_v1  ;;  %3802 = vmatprep.subr.bf16.mxu1 %v4120_v1 }
 0x22e   : > { %3623 = vmatpush3.bf16.msra.mxu0 %v5302_v43  ;;  %3803 = vmatpush3.bf16.msra.mxu1 %v5302_v43 }
 0x22f   : > { %3628 = vmatprep.subr.bf16.mxu0 %v4120_v1  ;;  %3808 = vmatprep.subr.bf16.mxu1 %v4120_v1 }
 0x231   : > { %3625 = vmatmul.mubr.bf16.vlgmr.msra.gmra.mrb[4].mxu0 %v2768_v27  ;;  %3805 = vmatmul.mubr.bf16.vlgmr.msra.gmra.mrb[4].mxu1 %v1984_v42 }
 0x232   : > { %3629 = vmatpush3.bf16.msra.mxu0 %v5303_v44  ;;  %3809 = vmatpush3.bf16.msra.mxu1 %v5303_v44 }
 0x233   : > { %3630 = vmatprep.subr.bf16.mxu0 %v4120_v1  ;;  %3810 = vmatprep.subr.bf16.mxu1 %v4120_v1 }
 0x234   : > { %3644 = vmatprep.mubr.msk.bf16.mxu0 %vm4121_vm0, %v4120_v1  ;;  %3824 = vmatprep.mubr.msk.bf16.mxu1 %vm4121_vm0, %v4120_v1 }
 0x236   : > { %3631 = vmatpush3.bf16.msra.mxu0 %v5304_v45  ;;  %3811 = vmatpush3.bf16.msra.mxu1 %v5304_v45 }
 0x237   : > { %3632 = vmatprep.subr.bf16.mxu0 %v4120_v1  ;;  %3812 = vmatprep.subr.bf16.mxu1 %v4120_v1 }
 0x23a   : > { %3633 = vmatpush3.bf16.msra.mxu0 %v5305_v46  ;;  %3813 = vmatpush3.bf16.msra.mxu1 %v5305_v46 }
 0x23b   : > { %3634 = vmatprep.subr.bf16.mxu0 %v4120_v1  ;;  %3814 = vmatprep.subr.bf16.mxu1 %v4120_v1 }
 0x23e   : > { %3635 = vmatpush3.bf16.msra.mxu0 %v5306_v47  ;;  %3815 = vmatpush3.bf16.msra.mxu1 %v5306_v47 }
 0x23f   : > { %3636 = vmatprep.subr.bf16.mxu0 %v4120_v1  ;;  %3816 = vmatprep.subr.bf16.mxu1 %v4120_v1 }
 0x242   : > { %3637 = vmatpush3.bf16.msra.mxu0 %v5307_v48  ;;  %3817 = vmatpush3.bf16.msra.mxu1 %v5307_v48 }
 0x243   : > { %3638 = vmatprep.subr.bf16.mxu0 %v4120_v1  ;;  %3818 = vmatprep.subr.bf16.mxu1 %v4120_v1 }
 0x246   : > { %3639 = vmatpush3.bf16.msra.mxu0 %v5308_v51  ;;  %3819 = vmatpush3.bf16.msra.mxu1 %v5308_v51 }
 0x247   : > { %3640 = vmatprep.subr.bf16.mxu0 %v4120_v1  ;;  %3820 = vmatprep.subr.bf16.mxu1 %v4120_v1 }
 0x24a   : > { %3641 = vmatpush3.bf16.msra.mxu0 %v4856_v54  ;;  %3821 = vmatpush3.bf16.msra.mxu1 %v4856_v54 }
 0x24b   : > { %3642 = vmatprep.subr.bf16.mxu0 %v4120_v1  ;;  %3822 = vmatprep.subr.bf16.mxu1 %v4120_v1  ;;  %v2773_v1 = vld [vmem:[%s5259_s2] ss:$0 sm:$0xff] }
 0x24e   : > { %3643 = vmatpush3.bf16.msra.mxu0 %v4865_v53  ;;  %3823 = vmatpush3.bf16.msra.mxu1 %v4865_v53 }
 0x251   : > { %3645 = vmatmul.mubr.bf16.vlgmr.msra.gmra.mrb[4].mxu0 %v1984_v42  ;;  %3825 = vmatmul.mubr.bf16.vlgmr.msra.gmra.mrb[4].mxu1 %v2369_v58 }
 0x324   : > { %v2020_v59 = vpop.f32.mrb[4].mxu0  ;;  %v2405_v60 = vpop.f32.mrb[4].mxu1 }
 0x325   : > { %v2027_v61 = vmax.f32 %v1634_v18, %v2020_v59  ;;  %v3646_v62 = vpop.f32.mrb[5].mxu0  ;;  %v3826_v63 = vpop.f32.mrb[5].mxu1 }
 0x326   : > { %v2023_v0 = vpop.f32.mrb[6].mxu0  ;;  %v2408_v2 = vpop.f32.mrb[6].mxu1 }
 0x327   : > { %v2412_v5 = vmax.f32 %v2027_v61, %v2405_v60  ;;  %v3647_v8 = vpop.f32.mrb[7].mxu0  ;;  %v3827_v9 = vpop.f32.mrb[7].mxu1 }
 0x329   : > { %v2420_v10 = vadd.f32 %v2773_v1, %v2412_v5 }
 0x32b   : > { %v2421_v11 = vmax.f32 %v2420_v10, 0.0 }
 0x32d   : > { %v2422_v12 = vpack.c.bf16 %v2421_v11, %v2421_v11 }
 0x32f   : > { %2423 = vst [vmem:[%s188_s20] sm:$0x1] %v2422_v12 }
 0x330 PF: > { %s13_s16 = sadd.s32 1, %s4118_s16   ;;  %s5309_s12 = smov %s4110_s14 }
 0x331   : > { %p10_p7 = scmp.ge.s32.totalorder %s13_s16, 6   ;;  %s5310_s13 = smov %s4114_s15 }
 0x332   : > { %s5311_s14 = smov %s5314_s17  ;;  %s5312_s15 = smov %s5318_s18 }
 0x333   :  { %12 = sbr.rel (!%p10_p7) target bundleno = 3 (0x3), region = 78 }

</bundles_post_ra>
